<compile_context>
chip_gen: v5e
topology: v5e:2x2
jax: 0.10.0
libtpu: 0.0.40
codegen_flags: <defaults>
</compile_context>

<pallas_src>
import functools

import jax
import jax.numpy as jnp
from jax.experimental import pallas as pl
from jax.experimental.pallas import tpu as pltpu


# -----------------------------------------------------------------------------
# Kernel 1: adaptive supports, Chebyshev orders 1..K-1 (order 0 == I is skipped)
#   supports = stack([softmax(relu(E E^T)), 2*A*S_{k-1} - S_{k-2}, ...])
# -----------------------------------------------------------------------------
def supports_kernel(e_ref, sup_ref):
    E = e_ref[...]                                   # (N, D) f32
    N = E.shape[0]
    k_hi = sup_ref.shape[0]                          # = cheb_k - 1

    # relu(E @ E^T)  (contract axis 1 of both -> no explicit transpose)
    a = jax.lax.dot_general(E, E, (((1,), (1,)), ((), ())),
                            preferred_element_type=jnp.float32)   # (N, N)
    a = jnp.maximum(a, 0.0)
    # row softmax (dim=1), max-subtracted like torch.softmax
    a = a - jnp.max(a, axis=1, keepdims=True)
    ea = jnp.exp(a)
    sm = ea / jnp.sum(ea, axis=1, keepdims=True)

    # identity only needed internally for the Chebyshev recursion (k >= 2)
    row = jax.lax.broadcasted_iota(jnp.int32, (N, N), 0)
    col = jax.lax.broadcasted_iota(jnp.int32, (N, N), 1)
    eye = (row == col).astype(jnp.float32)

    supp = [eye, sm]
    for _ in range(2, k_hi + 1):
        supp.append(2.0 * jnp.dot(sm, supp[-1],
                                  preferred_element_type=jnp.float32) - supp[-2])
    for k in range(k_hi):
        sup_ref[k] = supp[k + 1]


def compute_supports(node_embeddings, cheb_k):
    assert cheb_k >= 2
    N, _ = node_embeddings.shape
    vmem = pl.BlockSpec(memory_space=pltpu.MemorySpace.VMEM)
    return pl.pallas_call(
        supports_kernel,
        out_shape=jax.ShapeDtypeStruct((cheb_k - 1, N, N), jnp.float32),
        in_specs=[vmem],
        out_specs=vmem,
    )(node_embeddings)


# -----------------------------------------------------------------------------
# Kernel 2: one full AGCRN layer over the whole sequence.
#   grid = (T,)  ["arbitrary": the recurrence is sequential]
#   hidden state lives in VMEM scratch; pools/supports are VMEM-resident.
#
# Math (identical to torch AGCRNCell, graph conv split by linearity, with the
# node-adaptive weights factored through the embedding pool so the contraction
# runs on the MXU):
#   g_k            = S_k @ [x | h]                 (k=0 -> identity, skipped)
#   P[d*2H+o]      = sum_{k,c} g_k[:,c] * Wg_pool[d,k,c,o]       (MXU matmuls)
#   [z | r]        = sigmoid( sum_d E[:,d]*P_d + E@bg_pool )     (rank-D reduce)
#   c_k            = [S_k @ x | S_k @ (z*h)]       (S_k @ x reused from g_k)
#   hc             = tanh( ... same pool contraction with Wu_pool ... )
#   h'             = r*h + (1-r)*hc
# -----------------------------------------------------------------------------
def agcrn_layer_kernel(x_ref, h0_ref, sup_ref, e_ref, wx_ref, wgh_ref, wuh_ref,
                       bg_ref, bu_ref, out_ref, state_ref,
                       *, batch, cin, hdim, cheb_k, embed_dim):
    t = pl.program_id(0)

    @pl.when(t == 0)
    def _():
        state_ref[...] = h0_ref[...]

    B, Cin, H, K, D = batch, cin, hdim, cheb_k, embed_dim

    xp = x_ref[0]                      # (N, B*Cin)  batch packed along lanes
    hp = state_ref[...]                # (N, B*H)
    sup = sup_ref[...]                 # (K-1, N, N)
    ev = e_ref[...]                    # (N, D)
    wx = wx_ref[...]                   # (K*Cin, D*3H)   [gate D*2H | cand D*H]
    wgh = wgh_ref[...]                 # (K*H,  D*2H)
    wuh = wuh_ref[...]                 # (K*H,  D*H)
    bg = bg_ref[...]                   # (N, 2H)
    bu = bu_ref[...]                   # (N, H)

    # per-node embedding columns for the rank-D reduction (hoisted once/step)
    ecols = [ev[:, d:d + 1] for d in range(D)]

    def dreduce(p, o):
        # p: (N, D*o) packed d-major -> (N, o); per-node weighted sum over d.
        acc = ecols[0] * p[:, :o]
        for d in range(1, D):
            acc = acc + ecols[d] * p[:, d * o:(d + 1) * o]
        return acc

    # --- graph propagation: one wide MXU matmul per Chebyshev order (k>=1) ---
    inp = jnp.concatenate([xp, hp], axis=-1)               # (N, B*(Cin+H))
    g = [inp]                                               # k = 0 -> identity
    for k in range(1, K):
        g.append(jnp.dot(sup[k - 1], inp, preferred_element_type=jnp.float32))

    def x_part(gp, b):                 # (N, Cin) slice of batch b
        return gp[:, b * Cin:(b + 1) * Cin]

    def h_part(gp, b):                 # (N, H) slice of batch b
        off = B * Cin
        return gp[:, off + b * H: off + (b + 1) * H]

    # --- gates: all K orders fused along the contraction axis; the x-part ----
    # --- matmul also produces the candidate's x-contribution (shared S_k@x) --
    r_list, h_list, zh_list, candx_list = [], [], [], []
    for b in range(B):
        gx_b = jnp.concatenate([x_part(g[k], b) for k in range(K)], axis=-1)
        gh_b = jnp.concatenate([h_part(g[k], b) for k in range(K)], axis=-1)
        a_b = jnp.dot(gx_b, wx, preferred_element_type=jnp.float32)  # (N,D*3H)
        p_gate = a_b[:, :D * 2 * H] + jnp.dot(gh_b, wgh,
                                              preferred_element_type=jnp.float32)
        zr_b = jax.nn.sigmoid(dreduce(p_gate, 2 * H) + bg)           # (N, 2H)
        z_b, r_b = zr_b[:, :H], zr_b[:, H:]
        h_b = hp[:, b * H:(b + 1) * H]
        r_list.append(r_b)
        h_list.append(h_b)
        zh_list.append(z_b * h_b)
        candx_list.append(a_b[:, D * 2 * H:])                        # (N, D*H)

    # --- candidate: reuse S_k @ x, only re-propagate z*h (packed over batch) --
    zh_pack = jnp.concatenate(zh_list, axis=-1)             # (N, B*H)
    gz = [zh_pack]
    for k in range(1, K):
        gz.append(jnp.dot(sup[k - 1], zh_pack,
                          preferred_element_type=jnp.float32))

    h_new_list = []
    for b in range(B):
        gzh_b = jnp.concatenate([gz[k][:, b * H:(b + 1) * H] for k in range(K)],
                                axis=-1)                    # (N, K*H)
        p_cand = candx_list[b] + jnp.dot(gzh_b, wuh,
                                         preferred_element_type=jnp.float32)
        hc_b = jnp.tanh(dreduce(p_cand, H) + bu)            # (N, H)
        h_new_list.append(r_list[b] * h_list[b] + (1.0 - r_list[b]) * hc_b)

    h_new = jnp.concatenate(h_new_list, axis=-1)            # (N, B*H) lane-dense
    state_ref[...] = h_new
    out_ref[0] = h_new


def agcrn_layer(x_pack, h0_pack, supports, node_embeddings,
                wx, wgh, wuh, bg, bu, *, batch, cin, hdim, cheb_k):
    """x_pack (T, N, B*Cin), h0_pack (N, B*H) -> (T, N, B*H)."""
    T, N, _ = x_pack.shape
    H = hdim
    D = node_embeddings.shape[1]
    C = cin + H

    def full_spec(shape):
        n = len(shape)
        return pl.BlockSpec(shape, lambda t, _n=n: (0,) * _n)

    flops_step = (2 * (cheb_k - 1) * N * N * batch * (C + H)   # graph matmuls
                  + 6 * batch * N * cheb_k * D * H * C         # pool matmuls
                  + 2 * batch * N * D * 3 * H)                 # rank-D reduce
    cost = pl.CostEstimate(
        flops=int(T * flops_step),
        transcendentals=int(T * batch * N * 3 * H),
        bytes_accessed=int(4 * (x_pack.size + T * N * batch * H
                                + supports.size + node_embeddings.size
                                + wx.size + wgh.size + wuh.size
                                + bg.size + bu.size)))

    kernel = functools.partial(agcrn_layer_kernel, batch=batch, cin=cin,
                               hdim=H, cheb_k=cheb_k, embed_dim=D)
    return pl.pallas_call(
        kernel,
        out_shape=jax.ShapeDtypeStruct((T, N, batch * H), jnp.float32),
        grid=(T,),
        in_specs=[
            pl.BlockSpec((1, N, batch * cin), lambda t: (t, 0, 0)),   # x_t slab
            full_spec(h0_pack.shape),                                 # h0
            full_spec(supports.shape),                                # supports
            full_spec(node_embeddings.shape),                         # E
            full_spec(wx.shape), full_spec(wgh.shape),                # pools
            full_spec(wuh.shape),
            full_spec(bg.shape), full_spec(bu.shape),                 # biases
        ],
        out_specs=pl.BlockSpec((1, N, batch * H), lambda t: (t, 0, 0)),
        scratch_shapes=[pltpu.VMEM((N, batch * H), jnp.float32)],
        compiler_params=pltpu.CompilerParams(
            dimension_semantics=("arbitrary",)),   # recurrence: T is sequential
        cost_estimate=cost,
    )(x_pack, h0_pack, supports, node_embeddings, wx, wgh, wuh, bg, bu)


# -----------------------------------------------------------------------------
# Parameter setup (plain JAX glue): weight / bias pools per layer.
# -----------------------------------------------------------------------------
def init_params(key, dim_in, dim_out, cheb_k, embed_dim, num_layers):
    layers = []
    for i in range(num_layers):
        d_in = dim_in if i == 0 else dim_out
        c = d_in + dim_out
        key, k1, k2, k3, k4 = jax.random.split(key, 5)
        gate_w = 0.1 * jax.random.normal(k1, (embed_dim, cheb_k, c, 2 * dim_out), jnp.float32)
        gate_b = 0.1 * jax.random.normal(k2, (embed_dim, 2 * dim_out), jnp.float32)
        upd_w = 0.1 * jax.random.normal(k3, (embed_dim, cheb_k, c, dim_out), jnp.float32)
        upd_b = 0.1 * jax.random.normal(k4, (embed_dim, dim_out), jnp.float32)
        layers.append((gate_w, gate_b, upd_w, upd_b))
    return layers


def avwdcrnn_forward(x, init_state, node_embeddings, params, cheb_k, dim_out):
    """Pallas implementation of AVWDCRNN.forward.

    x: (B, T, N, dim_in); init_state: (L, B, N, dim_out); node_embeddings: (N, E)
    Returns (current_inputs (B, T, N, dim_out), [state_l (B, N, dim_out)]).
    """
    B, T, N, _ = x.shape
    H = dim_out
    K = cheb_k
    D = node_embeddings.shape[1]
    supports = compute_supports(node_embeddings, cheb_k)     # (K-1, N, N)

    cur = x
    output_hidden = []
    for i, (gw_pool, gb_pool, uw_pool, ub_pool) in enumerate(params):
        cin = cur.shape[-1]
        # Pool matrices for the in-kernel MXU contraction (k-major rows,
        # d-major output columns). Per-node weights are never materialized.
        #   gw_pool (D, K, C, 2H), uw_pool (D, K, C, H), C = cin + H
        wgx = jnp.transpose(gw_pool[:, :, :cin, :], (1, 2, 0, 3)).reshape(K * cin, D * 2 * H)
        wux = jnp.transpose(uw_pool[:, :, :cin, :], (1, 2, 0, 3)).reshape(K * cin, D * H)
        wx = jnp.concatenate([wgx, wux], axis=1)              # (K*cin, D*3H)
        wgh = jnp.transpose(gw_pool[:, :, cin:, :], (1, 2, 0, 3)).reshape(K * H, D * 2 * H)
        wuh = jnp.transpose(uw_pool[:, :, cin:, :], (1, 2, 0, 3)).reshape(K * H, D * H)
        bg = node_embeddings @ gb_pool                         # (N, 2H)
        bu = node_embeddings @ ub_pool                         # (N, H)

        # lane-pack the batch dim (layout plumbing only)
        x_pack = jnp.transpose(cur, (1, 2, 0, 3)).reshape(T, N, B * cin)
        h0_pack = jnp.transpose(init_state[i], (1, 0, 2)).reshape(N, B * H)

        out_pack = agcrn_layer(x_pack, h0_pack, supports, node_embeddings,
                               wx, wgh, wuh, bg, bu,
                               batch=B, cin=cin, hdim=H, cheb_k=cheb_k)
        out = jnp.transpose(out_pack.reshape(T, N, B, H), (2, 0, 1, 3))  # (B,T,N,H)
        output_hidden.append(out[:, -1])
        cur = out
    return cur, output_hidden


# -----------------------------------------------------------------------------
# Pure-JAX reference mirroring the PyTorch forward exactly (for validation).
# -----------------------------------------------------------------------------
def _ref_avwgcn(x, node_embeddings, weights_pool, bias_pool, cheb_k):
    N = node_embeddings.shape[0]
    supports = jax.nn.softmax(jax.nn.relu(node_embeddings @ node_embeddings.T), axis=1)
    support_set = [jnp.eye(N, dtype=jnp.float32), supports]
    for _ in range(2, cheb_k):
        support_set.append(2.0 * supports @ support_set[-1] - support_set[-2])
    supports = jnp.stack(support_set, axis=0)
    weights = jnp.einsum('nd,dkio->nkio', node_embeddings, weights_pool)
    bias = node_embeddings @ bias_pool
    x_g = jnp.einsum('knm,bmc->bknc', supports, x)
    x_g = jnp.transpose(x_g, (0, 2, 1, 3))
    return jnp.einsum('bnki,nkio->bno', x_g, weights) + bias


def _ref_cell(x, state, node_embeddings, gw, gb, uw, ub, cheb_k, H):
    inp = jnp.concatenate([x, state], axis=-1)
    z_r = jax.nn.sigmoid(_ref_avwgcn(inp, node_embeddings, gw, gb, cheb_k))
    z, r = z_r[..., :H], z_r[..., H:]
    cand = jnp.concatenate([x, z * state], axis=-1)
    hc = jnp.tanh(_ref_avwgcn(cand, node_embeddings, uw, ub, cheb_k))
    return r * state + (1.0 - r) * hc


def _ref_forward(x, init_state, node_embeddings, params, cheb_k, H):
    B, T, N, _ = x.shape
    cur = x
    hidden = []
    for i, (gw, gb, uw, ub) in enumerate(params):
        state = init_state[i]
        states = []
        for t in range(T):
            state = _ref_cell(cur[:, t], state, node_embeddings, gw, gb, uw, ub, cheb_k, H)
            states.append(state)
        hidden.append(state)
        cur = jnp.stack(states, axis=1)
    return cur, hidden


# -----------------------------------------------------------------------------
if __name__ == "__main__":
    B, T, N = 2, 8, 16
    DIM_IN, DIM_OUT, CHEB_K, EMBED_DIM, NUM_LAYERS = 2, 32, 3, 8, 2

    key = jax.random.PRNGKey(0)
    kx, ke, kp = jax.random.split(key, 3)
    x = jax.random.normal(kx, (B, T, N, DIM_IN), jnp.float32)
    node_embeddings = jax.random.normal(ke, (N, EMBED_DIM), jnp.float32)
    init_state = jnp.zeros((NUM_LAYERS, B, N, DIM_OUT), jnp.float32)  # init_hidden
    params = init_params(kp, DIM_IN, DIM_OUT, CHEB_K, EMBED_DIM, NUM_LAYERS)

    fwd = jax.jit(functools.partial(avwdcrnn_forward,
                                    cheb_k=CHEB_K, dim_out=DIM_OUT))
    out, hidden = fwd(x, init_state, node_embeddings, params)
    out = jax.block_until_ready(out)
    hidden = [jax.block_until_ready(h) for h in hidden]

    assert out.shape == (B, T, N, DIM_OUT)
    assert len(hidden) == NUM_LAYERS and hidden[0].shape == (B, N, DIM_OUT)

    ref_out, ref_hidden = _ref_forward(x, init_state, node_embeddings, params,
                                       CHEB_K, DIM_OUT)
    assert jnp.allclose(out, ref_out, atol=1e-3, rtol=1e-3)
    for h, rh in zip(hidden, ref_hidden):
        assert jnp.allclose(h, rh, atol=1e-3, rtol=1e-3)

    print("KERNEL_OK")
</pallas_src>

<mosaic_0001>
module attributes {stable_mosaic.version = 11 : i64} {
  func.func @supports_kernel(%arg0: memref<16x8xf32, #tpu.memory_space<vmem>>, %arg1: memref<2x16x16xf32, #tpu.memory_space<vmem>>) attributes {dimension_semantics = [], scalar_prefetch = 0 : i64, scratch_operands = 0 : i64, tpu.core_type = #tpu.core_type<tc>} {
    %c0 = arith.constant 0 : index
    %c0_0 = arith.constant 0 : index
    %0 = vector.load %arg0[%c0, %c0_0] : memref<16x8xf32, #tpu.memory_space<vmem>>, vector<16x8xf32>
    %cst = arith.constant dense<0.000000e+00> : vector<16x16xf32>
    %1 = tpu.matmul %0, %0, %cst {dimension_numbers = #tpu.dot_dimension_numbers<[1], [1], [0], [0], [0, 0, 1, 0], [], []>} : vector<16x8xf32>, vector<16x8xf32>, vector<16x16xf32> -> vector<16x16xf32>
    %cst_1 = arith.constant 0.000000e+00 : f32
    %2 = vector.broadcast %cst_1 : f32 to vector<16x16xf32>
    %3 = arith.maximumf %1, %2 : vector<16x16xf32>
    %cst_2 = arith.constant dense<0xFF800000> : vector<16xf32>
    %4 = vector.multi_reduction <maximumf>, %3, %cst_2 [1] : vector<16x16xf32> to vector<16xf32>
    %5 = vector.shape_cast %4 : vector<16xf32> to vector<16x1xf32>
    %6 = vector.broadcast %5 : vector<16x1xf32> to vector<16x16xf32>
    %7 = arith.subf %3, %6 : vector<16x16xf32>
    %8 = math.exp %7 : vector<16x16xf32>
    %cst_3 = arith.constant dense<0.000000e+00> : vector<16xf32>
    %9 = vector.multi_reduction <add>, %8, %cst_3 [1] : vector<16x16xf32> to vector<16xf32>
    %10 = vector.shape_cast %9 : vector<16xf32> to vector<16x1xf32>
    %11 = vector.broadcast %10 : vector<16x1xf32> to vector<16x16xf32>
    %12 = arith.divf %8, %11 : vector<16x16xf32>
    %13 = tpu.iota {dimensions = array<i32: 0>} : vector<16x16xi32>
    %14 = tpu.iota {dimensions = array<i32: 1>} : vector<16x16xi32>
    %15 = arith.cmpi eq, %13, %14 : vector<16x16xi32>
    %16 = arith.extui %15 : vector<16x16xi1> to vector<16x16xi32>
    %17 = arith.sitofp %16 : vector<16x16xi32> to vector<16x16xf32>
    %cst_4 = arith.constant dense<0.000000e+00> : vector<16x16xf32>
    %18 = tpu.matmul %12, %12, %cst_4 {dimension_numbers = #tpu.dot_dimension_numbers<[1], [0], [0], [1], [0, 0, 1, 1], [], []>} : vector<16x16xf32>, vector<16x16xf32>, vector<16x16xf32> -> vector<16x16xf32>
    %cst_5 = arith.constant 2.000000e+00 : f32
    %19 = vector.broadcast %cst_5 : f32 to vector<16x16xf32>
    %20 = arith.mulf %19, %18 : vector<16x16xf32>
    %21 = arith.subf %20, %17 : vector<16x16xf32>
    %c0_6 = arith.constant 0 : index
    %c0_7 = arith.constant 0 : index
    %c0_8 = arith.constant 0 : index
    %22 = vector.load %arg1[%c0_6, %c0_7, %c0_8] : memref<2x16x16xf32, #tpu.memory_space<vmem>>, vector<1x16x16xf32>
    %23 = vector.shape_cast %22 : vector<1x16x16xf32> to vector<16x16xf32>
    %24 = vector.shape_cast %12 : vector<16x16xf32> to vector<1x16x16xf32>
    tpu.vector_store %arg1[%c0_6, %c0_7, %c0_8], %24 {strides = array<i32>} : memref<2x16x16xf32, #tpu.memory_space<vmem>>, vector<1x16x16xf32>,
    %c1 = arith.constant 1 : index
    %c0_9 = arith.constant 0 : index
    %c0_10 = arith.constant 0 : index
    %25 = vector.load %arg1[%c1, %c0_9, %c0_10] : memref<2x16x16xf32, #tpu.memory_space<vmem>>, vector<1x16x16xf32>
    %26 = vector.shape_cast %25 : vector<1x16x16xf32> to vector<16x16xf32>
    %27 = vector.shape_cast %21 : vector<16x16xf32> to vector<1x16x16xf32>
    tpu.vector_store %arg1[%c1, %c0_9, %c0_10], %27 {strides = array<i32>} : memref<2x16x16xf32, #tpu.memory_space<vmem>>, vector<1x16x16xf32>,
    return
  }
}

module attributes {stable_mosaic.version = 11 : i64} {
  func.func @agcrn_layer_kernel(%arg0: i32, %arg1: memref<1x16x4xf32, #tpu.memory_space<vmem>>, %arg2: memref<16x64xf32, #tpu.memory_space<vmem>>, %arg3: memref<2x16x16xf32, #tpu.memory_space<vmem>>, %arg4: memref<16x8xf32, #tpu.memory_space<vmem>>, %arg5: memref<6x768xf32, #tpu.memory_space<vmem>>, %arg6: memref<96x512xf32, #tpu.memory_space<vmem>>, %arg7: memref<96x256xf32, #tpu.memory_space<vmem>>, %arg8: memref<16x64xf32, #tpu.memory_space<vmem>>, %arg9: memref<16x32xf32, #tpu.memory_space<vmem>>, %arg10: memref<1x16x64xf32, #tpu.memory_space<vmem>>, %arg11: memref<16x64xf32, #tpu.memory_space<vmem>>) attributes {dimension_semantics = [#tpu.dimension_semantics<arbitrary>], iteration_bounds = array<i64: 8>, scalar_prefetch = 0 : i64, scratch_operands = 1 : i64, tpu.core_type = #tpu.core_type<tc>, window_params = [{transform_indices = @transform_0, window_bounds = array<i64: 1, 16, 4>}, {pipeline_mode = #tpu.pipeline_mode<synchronous>, transform_indices = @transform_1, window_bounds = array<i64: 16, 64>}, {pipeline_mode = #tpu.pipeline_mode<synchronous>, transform_indices = @transform_2, window_bounds = array<i64: 2, 16, 16>}, {pipeline_mode = #tpu.pipeline_mode<synchronous>, transform_indices = @transform_3, window_bounds = array<i64: 16, 8>}, {pipeline_mode = #tpu.pipeline_mode<synchronous>, transform_indices = @transform_4, window_bounds = array<i64: 6, 768>}, {pipeline_mode = #tpu.pipeline_mode<synchronous>, transform_indices = @transform_5, window_bounds = array<i64: 96, 512>}, {pipeline_mode = #tpu.pipeline_mode<synchronous>, transform_indices = @transform_6, window_bounds = array<i64: 96, 256>}, {pipeline_mode = #tpu.pipeline_mode<synchronous>, transform_indices = @transform_7, window_bounds = array<i64: 16, 64>}, {pipeline_mode = #tpu.pipeline_mode<synchronous>, transform_indices = @transform_8, window_bounds = array<i64: 16, 32>}, {transform_indices = @transform_9, window_bounds = array<i64: 1, 16, 64>}]} {
    %c0_i32 = arith.constant 0 : i32
    %0 = arith.cmpi eq, %arg0, %c0_i32 : i32
    %1 = arith.extui %0 : i1 to i32
    %c0_i32_0 = arith.constant 0 : i32
    %2 = arith.cmpi ne, %1, %c0_i32_0 : i32
    scf.if %2 {
      %c0_38 = arith.constant 0 : index
      %c0_39 = arith.constant 0 : index
      %236 = vector.load %arg2[%c0_38, %c0_39] : memref<16x64xf32, #tpu.memory_space<vmem>>, vector<16x64xf32>
      %c0_40 = arith.constant 0 : index
      %c0_41 = arith.constant 0 : index
      %237 = vector.load %arg11[%c0_40, %c0_41] : memref<16x64xf32, #tpu.memory_space<vmem>>, vector<16x64xf32>
      tpu.vector_store %arg11[%c0_40, %c0_41], %236 {strides = array<i32>} : memref<16x64xf32, #tpu.memory_space<vmem>>, vector<16x64xf32>,
    } else {
    }
    %c0 = arith.constant 0 : index
    %c0_1 = arith.constant 0 : index
    %c0_2 = arith.constant 0 : index
    %3 = vector.load %arg1[%c0, %c0_1, %c0_2] : memref<1x16x4xf32, #tpu.memory_space<vmem>>, vector<1x16x4xf32>
    %4 = vector.shape_cast %3 : vector<1x16x4xf32> to vector<16x4xf32>
    %c0_3 = arith.constant 0 : index
    %c0_4 = arith.constant 0 : index
    %5 = vector.load %arg11[%c0_3, %c0_4] : memref<16x64xf32, #tpu.memory_space<vmem>>, vector<16x64xf32>
    %c0_5 = arith.constant 0 : index
    %c0_6 = arith.constant 0 : index
    %c0_7 = arith.constant 0 : index
    %6 = vector.load %arg3[%c0_5, %c0_6, %c0_7] : memref<2x16x16xf32, #tpu.memory_space<vmem>>, vector<2x16x16xf32>
    %c0_8 = arith.constant 0 : index
    %c0_9 = arith.constant 0 : index
    %7 = vector.load %arg4[%c0_8, %c0_9] : memref<16x8xf32, #tpu.memory_space<vmem>>, vector<16x8xf32>
    %c0_10 = arith.constant 0 : index
    %c0_11 = arith.constant 0 : index
    %8 = vector.load %arg5[%c0_10, %c0_11] : memref<6x768xf32, #tpu.memory_space<vmem>>, vector<6x768xf32>
    %c0_12 = arith.constant 0 : index
    %c0_13 = arith.constant 0 : index
    %9 = vector.load %arg6[%c0_12, %c0_13] : memref<96x512xf32, #tpu.memory_space<vmem>>, vector<96x512xf32>
    %c0_14 = arith.constant 0 : index
    %c0_15 = arith.constant 0 : index
    %10 = vector.load %arg7[%c0_14, %c0_15] : memref<96x256xf32, #tpu.memory_space<vmem>>, vector<96x256xf32>
    %c0_16 = arith.constant 0 : index
    %c0_17 = arith.constant 0 : index
    %11 = vector.load %arg8[%c0_16, %c0_17] : memref<16x64xf32, #tpu.memory_space<vmem>>, vector<16x64xf32>
    %c0_18 = arith.constant 0 : index
    %c0_19 = arith.constant 0 : index
    %12 = vector.load %arg9[%c0_18, %c0_19] : memref<16x32xf32, #tpu.memory_space<vmem>>, vector<16x32xf32>
    %13 = vector.extract_strided_slice %7 {offsets = [0, 0], sizes = [16, 1], strides = [1, 1]} : vector<16x8xf32> to vector<16x1xf32>
    %14 = vector.extract_strided_slice %7 {offsets = [0, 1], sizes = [16, 1], strides = [1, 1]} : vector<16x8xf32> to vector<16x1xf32>
    %15 = vector.extract_strided_slice %7 {offsets = [0, 2], sizes = [16, 1], strides = [1, 1]} : vector<16x8xf32> to vector<16x1xf32>
    %16 = vector.extract_strided_slice %7 {offsets = [0, 3], sizes = [16, 1], strides = [1, 1]} : vector<16x8xf32> to vector<16x1xf32>
    %17 = vector.extract_strided_slice %7 {offsets = [0, 4], sizes = [16, 1], strides = [1, 1]} : vector<16x8xf32> to vector<16x1xf32>
    %18 = vector.extract_strided_slice %7 {offsets = [0, 5], sizes = [16, 1], strides = [1, 1]} : vector<16x8xf32> to vector<16x1xf32>
    %19 = vector.extract_strided_slice %7 {offsets = [0, 6], sizes = [16, 1], strides = [1, 1]} : vector<16x8xf32> to vector<16x1xf32>
    %20 = vector.extract_strided_slice %7 {offsets = [0, 7], sizes = [16, 1], strides = [1, 1]} : vector<16x8xf32> to vector<16x1xf32>
    %21 = tpu.concatenate %4, %5 in 1 : vector<16x4xf32>, vector<16x64xf32> -> vector<16x68xf32>
    %22 = vector.extract_strided_slice %6 {offsets = [0, 0, 0], sizes = [1, 16, 16], strides = [1, 1, 1]} : vector<2x16x16xf32> to vector<1x16x16xf32>
    %23 = vector.shape_cast %22 : vector<1x16x16xf32> to vector<16x16xf32>
    %cst = arith.constant dense<0.000000e+00> : vector<16x68xf32>
    %24 = tpu.matmul %23, %21, %cst {dimension_numbers = #tpu.dot_dimension_numbers<[1], [0], [0], [1], [0, 0, 1, 1], [], []>} : vector<16x16xf32>, vector<16x68xf32>, vector<16x68xf32> -> vector<16x68xf32>
    %25 = vector.extract_strided_slice %6 {offsets = [1, 0, 0], sizes = [1, 16, 16], strides = [1, 1, 1]} : vector<2x16x16xf32> to vector<1x16x16xf32>
    %26 = vector.shape_cast %25 : vector<1x16x16xf32> to vector<16x16xf32>
    %cst_20 = arith.constant dense<0.000000e+00> : vector<16x68xf32>
    %27 = tpu.matmul %26, %21, %cst_20 {dimension_numbers = #tpu.dot_dimension_numbers<[1], [0], [0], [1], [0, 0, 1, 1], [], []>} : vector<16x16xf32>, vector<16x68xf32>, vector<16x68xf32> -> vector<16x68xf32>
    %28 = vector.extract_strided_slice %21 {offsets = [0, 0], sizes = [16, 2], strides = [1, 1]} : vector<16x68xf32> to vector<16x2xf32>
    %29 = vector.extract_strided_slice %24 {offsets = [0, 0], sizes = [16, 2], strides = [1, 1]} : vector<16x68xf32> to vector<16x2xf32>
    %30 = vector.extract_strided_slice %27 {offsets = [0, 0], sizes = [16, 2], strides = [1, 1]} : vector<16x68xf32> to vector<16x2xf32>
    %31 = tpu.concatenate %28, %29, %30 in 1 : vector<16x2xf32>, vector<16x2xf32>, vector<16x2xf32> -> vector<16x6xf32>
    %32 = vector.extract_strided_slice %21 {offsets = [0, 4], sizes = [16, 32], strides = [1, 1]} : vector<16x68xf32> to vector<16x32xf32>
    %33 = vector.extract_strided_slice %24 {offsets = [0, 4], sizes = [16, 32], strides = [1, 1]} : vector<16x68xf32> to vector<16x32xf32>
    %34 = vector.extract_strided_slice %27 {offsets = [0, 4], sizes = [16, 32], strides = [1, 1]} : vector<16x68xf32> to vector<16x32xf32>
    %35 = tpu.concatenate %32, %33, %34 in 1 : vector<16x32xf32>, vector<16x32xf32>, vector<16x32xf32> -> vector<16x96xf32>
    %cst_21 = arith.constant dense<0.000000e+00> : vector<16x768xf32>
    %36 = tpu.matmul %31, %8, %cst_21 {dimension_numbers = #tpu.dot_dimension_numbers<[1], [0], [0], [1], [0, 0, 1, 1], [], []>} : vector<16x6xf32>, vector<6x768xf32>, vector<16x768xf32> -> vector<16x768xf32>
    %37 = vector.extract_strided_slice %36 {offsets = [0, 0], sizes = [16, 512], strides = [1, 1]} : vector<16x768xf32> to vector<16x512xf32>
    %cst_22 = arith.constant dense<0.000000e+00> : vector<16x512xf32>
    %38 = tpu.matmul %35, %9, %cst_22 {dimension_numbers = #tpu.dot_dimension_numbers<[1], [0], [0], [1], [0, 0, 1, 1], [], []>} : vector<16x96xf32>, vector<96x512xf32>, vector<16x512xf32> -> vector<16x512xf32>
    %39 = arith.addf %37, %38 : vector<16x512xf32>
    %40 = vector.extract_strided_slice %39 {offsets = [0, 0], sizes = [16, 64], strides = [1, 1]} : vector<16x512xf32> to vector<16x64xf32>
    %41 = vector.broadcast %13 : vector<16x1xf32> to vector<16x64xf32>
    %42 = arith.mulf %41, %40 : vector<16x64xf32>
    %43 = vector.extract_strided_slice %39 {offsets = [0, 64], sizes = [16, 64], strides = [1, 1]} : vector<16x512xf32> to vector<16x64xf32>
    %44 = vector.broadcast %14 : vector<16x1xf32> to vector<16x64xf32>
    %45 = arith.mulf %44, %43 : vector<16x64xf32>
    %46 = arith.addf %42, %45 : vector<16x64xf32>
    %47 = vector.extract_strided_slice %39 {offsets = [0, 128], sizes = [16, 64], strides = [1, 1]} : vector<16x512xf32> to vector<16x64xf32>
    %48 = vector.broadcast %15 : vector<16x1xf32> to vector<16x64xf32>
    %49 = arith.mulf %48, %47 : vector<16x64xf32>
    %50 = arith.addf %46, %49 : vector<16x64xf32>
    %51 = vector.extract_strided_slice %39 {offsets = [0, 192], sizes = [16, 64], strides = [1, 1]} : vector<16x512xf32> to vector<16x64xf32>
    %52 = vector.broadcast %16 : vector<16x1xf32> to vector<16x64xf32>
    %53 = arith.mulf %52, %51 : vector<16x64xf32>
    %54 = arith.addf %50, %53 : vector<16x64xf32>
    %55 = vector.extract_strided_slice %39 {offsets = [0, 256], sizes = [16, 64], strides = [1, 1]} : vector<16x512xf32> to vector<16x64xf32>
    %56 = vector.broadcast %17 : vector<16x1xf32> to vector<16x64xf32>
    %57 = arith.mulf %56, %55 : vector<16x64xf32>
    %58 = arith.addf %54, %57 : vector<16x64xf32>
    %59 = vector.extract_strided_slice %39 {offsets = [0, 320], sizes = [16, 64], strides = [1, 1]} : vector<16x512xf32> to vector<16x64xf32>
    %60 = vector.broadcast %18 : vector<16x1xf32> to vector<16x64xf32>
    %61 = arith.mulf %60, %59 : vector<16x64xf32>
    %62 = arith.addf %58, %61 : vector<16x64xf32>
    %63 = vector.extract_strided_slice %39 {offsets = [0, 384], sizes = [16, 64], strides = [1, 1]} : vector<16x512xf32> to vector<16x64xf32>
    %64 = vector.broadcast %19 : vector<16x1xf32> to vector<16x64xf32>
    %65 = arith.mulf %64, %63 : vector<16x64xf32>
    %66 = arith.addf %62, %65 : vector<16x64xf32>
    %67 = vector.extract_strided_slice %39 {offsets = [0, 448], sizes = [16, 64], strides = [1, 1]} : vector<16x512xf32> to vector<16x64xf32>
    %68 = vector.broadcast %20 : vector<16x1xf32> to vector<16x64xf32>
    %69 = arith.mulf %68, %67 : vector<16x64xf32>
    %70 = arith.addf %66, %69 : vector<16x64xf32>
    %71 = arith.addf %70, %11 : vector<16x64xf32>
    %72 = arith.negf %71 : vector<16x64xf32>
    %73 = math.exp %72 : vector<16x64xf32>
    %cst_23 = arith.constant 1.000000e+00 : f32
    %74 = vector.broadcast %cst_23 : f32 to vector<16x64xf32>
    %75 = arith.addf %74, %73 : vector<16x64xf32>
    %76 = arith.divf %74, %75 : vector<16x64xf32>
    %77 = vector.extract_strided_slice %76 {offsets = [0, 0], sizes = [16, 32], strides = [1, 1]} : vector<16x64xf32> to vector<16x32xf32>
    %78 = vector.extract_strided_slice %76 {offsets = [0, 32], sizes = [16, 32], strides = [1, 1]} : vector<16x64xf32> to vector<16x32xf32>
    %79 = vector.extract_strided_slice %5 {offsets = [0, 0], sizes = [16, 32], strides = [1, 1]} : vector<16x64xf32> to vector<16x32xf32>
    %80 = arith.mulf %77, %79 : vector<16x32xf32>
    %81 = vector.extract_strided_slice %36 {offsets = [0, 512], sizes = [16, 256], strides = [1, 1]} : vector<16x768xf32> to vector<16x256xf32>
    %82 = vector.extract_strided_slice %21 {offsets = [0, 2], sizes = [16, 2], strides = [1, 1]} : vector<16x68xf32> to vector<16x2xf32>
    %83 = vector.extract_strided_slice %24 {offsets = [0, 2], sizes = [16, 2], strides = [1, 1]} : vector<16x68xf32> to vector<16x2xf32>
    %84 = vector.extract_strided_slice %27 {offsets = [0, 2], sizes = [16, 2], strides = [1, 1]} : vector<16x68xf32> to vector<16x2xf32>
    %85 = tpu.concatenate %82, %83, %84 in 1 : vector<16x2xf32>, vector<16x2xf32>, vector<16x2xf32> -> vector<16x6xf32>
    %86 = vector.extract_strided_slice %21 {offsets = [0, 36], sizes = [16, 32], strides = [1, 1]} : vector<16x68xf32> to vector<16x32xf32>
    %87 = vector.extract_strided_slice %24 {offsets = [0, 36], sizes = [16, 32], strides = [1, 1]} : vector<16x68xf32> to vector<16x32xf32>
    %88 = vector.extract_strided_slice %27 {offsets = [0, 36], sizes = [16, 32], strides = [1, 1]} : vector<16x68xf32> to vector<16x32xf32>
    %89 = tpu.concatenate %86, %87, %88 in 1 : vector<16x32xf32>, vector<16x32xf32>, vector<16x32xf32> -> vector<16x96xf32>
    %cst_24 = arith.constant dense<0.000000e+00> : vector<16x768xf32>
    %90 = tpu.matmul %85, %8, %cst_24 {dimension_numbers = #tpu.dot_dimension_numbers<[1], [0], [0], [1], [0, 0, 1, 1], [], []>} : vector<16x6xf32>, vector<6x768xf32>, vector<16x768xf32> -> vector<16x768xf32>
    %91 = vector.extract_strided_slice %90 {offsets = [0, 0], sizes = [16, 512], strides = [1, 1]} : vector<16x768xf32> to vector<16x512xf32>
    %cst_25 = arith.constant dense<0.000000e+00> : vector<16x512xf32>
    %92 = tpu.matmul %89, %9, %cst_25 {dimension_numbers = #tpu.dot_dimension_numbers<[1], [0], [0], [1], [0, 0, 1, 1], [], []>} : vector<16x96xf32>, vector<96x512xf32>, vector<16x512xf32> -> vector<16x512xf32>
    %93 = arith.addf %91, %92 : vector<16x512xf32>
    %94 = vector.extract_strided_slice %93 {offsets = [0, 0], sizes = [16, 64], strides = [1, 1]} : vector<16x512xf32> to vector<16x64xf32>
    %95 = vector.broadcast %13 : vector<16x1xf32> to vector<16x64xf32>
    %96 = arith.mulf %95, %94 : vector<16x64xf32>
    %97 = vector.extract_strided_slice %93 {offsets = [0, 64], sizes = [16, 64], strides = [1, 1]} : vector<16x512xf32> to vector<16x64xf32>
    %98 = vector.broadcast %14 : vector<16x1xf32> to vector<16x64xf32>
    %99 = arith.mulf %98, %97 : vector<16x64xf32>
    %100 = arith.addf %96, %99 : vector<16x64xf32>
    %101 = vector.extract_strided_slice %93 {offsets = [0, 128], sizes = [16, 64], strides = [1, 1]} : vector<16x512xf32> to vector<16x64xf32>
    %102 = vector.broadcast %15 : vector<16x1xf32> to vector<16x64xf32>
    %103 = arith.mulf %102, %101 : vector<16x64xf32>
    %104 = arith.addf %100, %103 : vector<16x64xf32>
    %105 = vector.extract_strided_slice %93 {offsets = [0, 192], sizes = [16, 64], strides = [1, 1]} : vector<16x512xf32> to vector<16x64xf32>
    %106 = vector.broadcast %16 : vector<16x1xf32> to vector<16x64xf32>
    %107 = arith.mulf %106, %105 : vector<16x64xf32>
    %108 = arith.addf %104, %107 : vector<16x64xf32>
    %109 = vector.extract_strided_slice %93 {offsets = [0, 256], sizes = [16, 64], strides = [1, 1]} : vector<16x512xf32> to vector<16x64xf32>
    %110 = vector.broadcast %17 : vector<16x1xf32> to vector<16x64xf32>
    %111 = arith.mulf %110, %109 : vector<16x64xf32>
    %112 = arith.addf %108, %111 : vector<16x64xf32>
    %113 = vector.extract_strided_slice %93 {offsets = [0, 320], sizes = [16, 64], strides = [1, 1]} : vector<16x512xf32> to vector<16x64xf32>
    %114 = vector.broadcast %18 : vector<16x1xf32> to vector<16x64xf32>
    %115 = arith.mulf %114, %113 : vector<16x64xf32>
    %116 = arith.addf %112, %115 : vector<16x64xf32>
    %117 = vector.extract_strided_slice %93 {offsets = [0, 384], sizes = [16, 64], strides = [1, 1]} : vector<16x512xf32> to vector<16x64xf32>
    %118 = vector.broadcast %19 : vector<16x1xf32> to vector<16x64xf32>
    %119 = arith.mulf %118, %117 : vector<16x64xf32>
    %120 = arith.addf %116, %119 : vector<16x64xf32>
    %121 = vector.extract_strided_slice %93 {offsets = [0, 448], sizes = [16, 64], strides = [1, 1]} : vector<16x512xf32> to vector<16x64xf32>
    %122 = vector.broadcast %20 : vector<16x1xf32> to vector<16x64xf32>
    %123 = arith.mulf %122, %121 : vector<16x64xf32>
    %124 = arith.addf %120, %123 : vector<16x64xf32>
    %125 = arith.addf %124, %11 : vector<16x64xf32>
    %126 = arith.negf %125 : vector<16x64xf32>
    %127 = math.exp %126 : vector<16x64xf32>
    %cst_26 = arith.constant 1.000000e+00 : f32
    %128 = vector.broadcast %cst_26 : f32 to vector<16x64xf32>
    %129 = arith.addf %128, %127 : vector<16x64xf32>
    %130 = arith.divf %128, %129 : vector<16x64xf32>
    %131 = vector.extract_strided_slice %130 {offsets = [0, 0], sizes = [16, 32], strides = [1, 1]} : vector<16x64xf32> to vector<16x32xf32>
    %132 = vector.extract_strided_slice %130 {offsets = [0, 32], sizes = [16, 32], strides = [1, 1]} : vector<16x64xf32> to vector<16x32xf32>
    %133 = vector.extract_strided_slice %5 {offsets = [0, 32], sizes = [16, 32], strides = [1, 1]} : vector<16x64xf32> to vector<16x32xf32>
    %134 = arith.mulf %131, %133 : vector<16x32xf32>
    %135 = vector.extract_strided_slice %90 {offsets = [0, 512], sizes = [16, 256], strides = [1, 1]} : vector<16x768xf32> to vector<16x256xf32>
    %136 = tpu.concatenate %80, %134 in 1 : vector<16x32xf32>, vector<16x32xf32> -> vector<16x64xf32>
    %137 = vector.extract_strided_slice %6 {offsets = [0, 0, 0], sizes = [1, 16, 16], strides = [1, 1, 1]} : vector<2x16x16xf32> to vector<1x16x16xf32>
    %138 = vector.shape_cast %137 : vector<1x16x16xf32> to vector<16x16xf32>
    %cst_27 = arith.constant dense<0.000000e+00> : vector<16x64xf32>
    %139 = tpu.matmul %138, %136, %cst_27 {dimension_numbers = #tpu.dot_dimension_numbers<[1], [0], [0], [1], [0, 0, 1, 1], [], []>} : vector<16x16xf32>, vector<16x64xf32>, vector<16x64xf32> -> vector<16x64xf32>
    %140 = vector.extract_strided_slice %6 {offsets = [1, 0, 0], sizes = [1, 16, 16], strides = [1, 1, 1]} : vector<2x16x16xf32> to vector<1x16x16xf32>
    %141 = vector.shape_cast %140 : vector<1x16x16xf32> to vector<16x16xf32>
    %cst_28 = arith.constant dense<0.000000e+00> : vector<16x64xf32>
    %142 = tpu.matmul %141, %136, %cst_28 {dimension_numbers = #tpu.dot_dimension_numbers<[1], [0], [0], [1], [0, 0, 1, 1], [], []>} : vector<16x16xf32>, vector<16x64xf32>, vector<16x64xf32> -> vector<16x64xf32>
    %143 = vector.extract_strided_slice %136 {offsets = [0, 0], sizes = [16, 32], strides = [1, 1]} : vector<16x64xf32> to vector<16x32xf32>
    %144 = vector.extract_strided_slice %139 {offsets = [0, 0], sizes = [16, 32], strides = [1, 1]} : vector<16x64xf32> to vector<16x32xf32>
    %145 = vector.extract_strided_slice %142 {offsets = [0, 0], sizes = [16, 32], strides = [1, 1]} : vector<16x64xf32> to vector<16x32xf32>
    %146 = tpu.concatenate %143, %144, %145 in 1 : vector<16x32xf32>, vector<16x32xf32>, vector<16x32xf32> -> vector<16x96xf32>
    %cst_29 = arith.constant dense<0.000000e+00> : vector<16x256xf32>
    %147 = tpu.matmul %146, %10, %cst_29 {dimension_numbers = #tpu.dot_dimension_numbers<[1], [0], [0], [1], [0, 0, 1, 1], [], []>} : vector<16x96xf32>, vector<96x256xf32>, vector<16x256xf32> -> vector<16x256xf32>
    %148 = arith.addf %81, %147 : vector<16x256xf32>
    %149 = vector.extract_strided_slice %148 {offsets = [0, 0], sizes = [16, 32], strides = [1, 1]} : vector<16x256xf32> to vector<16x32xf32>
    %150 = vector.broadcast %13 : vector<16x1xf32> to vector<16x32xf32>
    %151 = arith.mulf %150, %149 : vector<16x32xf32>
    %152 = vector.extract_strided_slice %148 {offsets = [0, 32], sizes = [16, 32], strides = [1, 1]} : vector<16x256xf32> to vector<16x32xf32>
    %153 = vector.broadcast %14 : vector<16x1xf32> to vector<16x32xf32>
    %154 = arith.mulf %153, %152 : vector<16x32xf32>
    %155 = arith.addf %151, %154 : vector<16x32xf32>
    %156 = vector.extract_strided_slice %148 {offsets = [0, 64], sizes = [16, 32], strides = [1, 1]} : vector<16x256xf32> to vector<16x32xf32>
    %157 = vector.broadcast %15 : vector<16x1xf32> to vector<16x32xf32>
    %158 = arith.mulf %157, %156 : vector<16x32xf32>
    %159 = arith.addf %155, %158 : vector<16x32xf32>
    %160 = vector.extract_strided_slice %148 {offsets = [0, 96], sizes = [16, 32], strides = [1, 1]} : vector<16x256xf32> to vector<16x32xf32>
    %161 = vector.broadcast %16 : vector<16x1xf32> to vector<16x32xf32>
    %162 = arith.mulf %161, %160 : vector<16x32xf32>
    %163 = arith.addf %159, %162 : vector<16x32xf32>
    %164 = vector.extract_strided_slice %148 {offsets = [0, 128], sizes = [16, 32], strides = [1, 1]} : vector<16x256xf32> to vector<16x32xf32>
    %165 = vector.broadcast %17 : vector<16x1xf32> to vector<16x32xf32>
    %166 = arith.mulf %165, %164 : vector<16x32xf32>
    %167 = arith.addf %163, %166 : vector<16x32xf32>
    %168 = vector.extract_strided_slice %148 {offsets = [0, 160], sizes = [16, 32], strides = [1, 1]} : vector<16x256xf32> to vector<16x32xf32>
    %169 = vector.broadcast %18 : vector<16x1xf32> to vector<16x32xf32>
    %170 = arith.mulf %169, %168 : vector<16x32xf32>
    %171 = arith.addf %167, %170 : vector<16x32xf32>
    %172 = vector.extract_strided_slice %148 {offsets = [0, 192], sizes = [16, 32], strides = [1, 1]} : vector<16x256xf32> to vector<16x32xf32>
    %173 = vector.broadcast %19 : vector<16x1xf32> to vector<16x32xf32>
    %174 = arith.mulf %173, %172 : vector<16x32xf32>
    %175 = arith.addf %171, %174 : vector<16x32xf32>
    %176 = vector.extract_strided_slice %148 {offsets = [0, 224], sizes = [16, 32], strides = [1, 1]} : vector<16x256xf32> to vector<16x32xf32>
    %177 = vector.broadcast %20 : vector<16x1xf32> to vector<16x32xf32>
    %178 = arith.mulf %177, %176 : vector<16x32xf32>
    %179 = arith.addf %175, %178 : vector<16x32xf32>
    %180 = arith.addf %179, %12 : vector<16x32xf32>
    %181 = math.tanh %180 : vector<16x32xf32>
    %182 = arith.mulf %78, %79 : vector<16x32xf32>
    %cst_30 = arith.constant 1.000000e+00 : f32
    %183 = vector.broadcast %cst_30 : f32 to vector<16x32xf32>
    %184 = arith.subf %183, %78 : vector<16x32xf32>
    %185 = arith.mulf %184, %181 : vector<16x32xf32>
    %186 = arith.addf %182, %185 : vector<16x32xf32>
    %187 = vector.extract_strided_slice %136 {offsets = [0, 32], sizes = [16, 32], strides = [1, 1]} : vector<16x64xf32> to vector<16x32xf32>
    %188 = vector.extract_strided_slice %139 {offsets = [0, 32], sizes = [16, 32], strides = [1, 1]} : vector<16x64xf32> to vector<16x32xf32>
    %189 = vector.extract_strided_slice %142 {offsets = [0, 32], sizes = [16, 32], strides = [1, 1]} : vector<16x64xf32> to vector<16x32xf32>
    %190 = tpu.concatenate %187, %188, %189 in 1 : vector<16x32xf32>, vector<16x32xf32>, vector<16x32xf32> -> vector<16x96xf32>
    %cst_31 = arith.constant dense<0.000000e+00> : vector<16x256xf32>
    %191 = tpu.matmul %190, %10, %cst_31 {dimension_numbers = #tpu.dot_dimension_numbers<[1], [0], [0], [1], [0, 0, 1, 1], [], []>} : vector<16x96xf32>, vector<96x256xf32>, vector<16x256xf32> -> vector<16x256xf32>
    %192 = arith.addf %135, %191 : vector<16x256xf32>
    %193 = vector.extract_strided_slice %192 {offsets = [0, 0], sizes = [16, 32], strides = [1, 1]} : vector<16x256xf32> to vector<16x32xf32>
    %194 = vector.broadcast %13 : vector<16x1xf32> to vector<16x32xf32>
    %195 = arith.mulf %194, %193 : vector<16x32xf32>
    %196 = vector.extract_strided_slice %192 {offsets = [0, 32], sizes = [16, 32], strides = [1, 1]} : vector<16x256xf32> to vector<16x32xf32>
    %197 = vector.broadcast %14 : vector<16x1xf32> to vector<16x32xf32>
    %198 = arith.mulf %197, %196 : vector<16x32xf32>
    %199 = arith.addf %195, %198 : vector<16x32xf32>
    %200 = vector.extract_strided_slice %192 {offsets = [0, 64], sizes = [16, 32], strides = [1, 1]} : vector<16x256xf32> to vector<16x32xf32>
    %201 = vector.broadcast %15 : vector<16x1xf32> to vector<16x32xf32>
    %202 = arith.mulf %201, %200 : vector<16x32xf32>
    %203 = arith.addf %199, %202 : vector<16x32xf32>
    %204 = vector.extract_strided_slice %192 {offsets = [0, 96], sizes = [16, 32], strides = [1, 1]} : vector<16x256xf32> to vector<16x32xf32>
    %205 = vector.broadcast %16 : vector<16x1xf32> to vector<16x32xf32>
    %206 = arith.mulf %205, %204 : vector<16x32xf32>
    %207 = arith.addf %203, %206 : vector<16x32xf32>
    %208 = vector.extract_strided_slice %192 {offsets = [0, 128], sizes = [16, 32], strides = [1, 1]} : vector<16x256xf32> to vector<16x32xf32>
    %209 = vector.broadcast %17 : vector<16x1xf32> to vector<16x32xf32>
    %210 = arith.mulf %209, %208 : vector<16x32xf32>
    %211 = arith.addf %207, %210 : vector<16x32xf32>
    %212 = vector.extract_strided_slice %192 {offsets = [0, 160], sizes = [16, 32], strides = [1, 1]} : vector<16x256xf32> to vector<16x32xf32>
    %213 = vector.broadcast %18 : vector<16x1xf32> to vector<16x32xf32>
    %214 = arith.mulf %213, %212 : vector<16x32xf32>
    %215 = arith.addf %211, %214 : vector<16x32xf32>
    %216 = vector.extract_strided_slice %192 {offsets = [0, 192], sizes = [16, 32], strides = [1, 1]} : vector<16x256xf32> to vector<16x32xf32>
    %217 = vector.broadcast %19 : vector<16x1xf32> to vector<16x32xf32>
    %218 = arith.mulf %217, %216 : vector<16x32xf32>
    %219 = arith.addf %215, %218 : vector<16x32xf32>
    %220 = vector.extract_strided_slice %192 {offsets = [0, 224], sizes = [16, 32], strides = [1, 1]} : vector<16x256xf32> to vector<16x32xf32>
    %221 = vector.broadcast %20 : vector<16x1xf32> to vector<16x32xf32>
    %222 = arith.mulf %221, %220 : vector<16x32xf32>
    %223 = arith.addf %219, %222 : vector<16x32xf32>
    %224 = arith.addf %223, %12 : vector<16x32xf32>
    %225 = math.tanh %224 : vector<16x32xf32>
    %226 = arith.mulf %132, %133 : vector<16x32xf32>
    %cst_32 = arith.constant 1.000000e+00 : f32
    %227 = vector.broadcast %cst_32 : f32 to vector<16x32xf32>
    %228 = arith.subf %227, %132 : vector<16x32xf32>
    %229 = arith.mulf %228, %225 : vector<16x32xf32>
    %230 = arith.addf %226, %229 : vector<16x32xf32>
    %231 = tpu.concatenate %186, %230 in 1 : vector<16x32xf32>, vector<16x32xf32> -> vector<16x64xf32>
    %c0_33 = arith.constant 0 : index
    %c0_34 = arith.constant 0 : index
    %232 = vector.load %arg11[%c0_33, %c0_34] : memref<16x64xf32, #tpu.memory_space<vmem>>, vector<16x64xf32>
    tpu.vector_store %arg11[%c0_33, %c0_34], %231 {strides = array<i32>} : memref<16x64xf32, #tpu.memory_space<vmem>>, vector<16x64xf32>,
    %c0_35 = arith.constant 0 : index
    %c0_36 = arith.constant 0 : index
    %c0_37 = arith.constant 0 : index
    %233 = vector.load %arg10[%c0_35, %c0_36, %c0_37] : memref<1x16x64xf32, #tpu.memory_space<vmem>>, vector<1x16x64xf32>
    %234 = vector.shape_cast %233 : vector<1x16x64xf32> to vector<16x64xf32>
    %235 = vector.shape_cast %231 : vector<16x64xf32> to vector<1x16x64xf32>
    tpu.vector_store %arg10[%c0_35, %c0_36, %c0_37], %235 {strides = array<i32>} : memref<1x16x64xf32, #tpu.memory_space<vmem>>, vector<1x16x64xf32>,
    return
  }
  func.func @transform_0(%arg0: i32) -> (i32, i32, i32) {
    %c0_i32 = arith.constant 0 : i32
    %c0_i32_0 = arith.constant 0 : i32
    %c0_i32_1 = arith.constant 0 : i32
    return %arg0, %c0_i32, %c0_i32_0 : i32, i32, i32
  }
  func.func @transform_1(%arg0: i32) -> (i32, i32) {
    %c0_i32 = arith.constant 0 : i32
    %c0_i32_0 = arith.constant 0 : i32
    %c0_i32_1 = arith.constant 0 : i32
    return %c0_i32, %c0_i32_0 : i32, i32
  }
  func.func @transform_2(%arg0: i32) -> (i32, i32, i32) {
    %c0_i32 = arith.constant 0 : i32
    %c0_i32_0 = arith.constant 0 : i32
    %c0_i32_1 = arith.constant 0 : i32
    %c0_i32_2 = arith.constant 0 : i32
    return %c0_i32, %c0_i32_0, %c0_i32_1 : i32, i32, i32
  }
  func.func @transform_3(%arg0: i32) -> (i32, i32) {
    %c0_i32 = arith.constant 0 : i32
    %c0_i32_0 = arith.constant 0 : i32
    %c0_i32_1 = arith.constant 0 : i32
    return %c0_i32, %c0_i32_0 : i32, i32
  }
  func.func @transform_4(%arg0: i32) -> (i32, i32) {
    %c0_i32 = arith.constant 0 : i32
    %c0_i32_0 = arith.constant 0 : i32
    %c0_i32_1 = arith.constant 0 : i32
    return %c0_i32, %c0_i32_0 : i32, i32
  }
  func.func @transform_5(%arg0: i32) -> (i32, i32) {
    %c0_i32 = arith.constant 0 : i32
    %c0_i32_0 = arith.constant 0 : i32
    %c0_i32_1 = arith.constant 0 : i32
    return %c0_i32, %c0_i32_0 : i32, i32
  }
  func.func @transform_6(%arg0: i32) -> (i32, i32) {
    %c0_i32 = arith.constant 0 : i32
    %c0_i32_0 = arith.constant 0 : i32
    %c0_i32_1 = arith.constant 0 : i32
    return %c0_i32, %c0_i32_0 : i32, i32
  }
  func.func @transform_7(%arg0: i32) -> (i32, i32) {
    %c0_i32 = arith.constant 0 : i32
    %c0_i32_0 = arith.constant 0 : i32
    %c0_i32_1 = arith.constant 0 : i32
    return %c0_i32, %c0_i32_0 : i32, i32
  }
  func.func @transform_8(%arg0: i32) -> (i32, i32) {
    %c0_i32 = arith.constant 0 : i32
    %c0_i32_0 = arith.constant 0 : i32
    %c0_i32_1 = arith.constant 0 : i32
    return %c0_i32, %c0_i32_0 : i32, i32
  }
  func.func @transform_9(%arg0: i32) -> (i32, i32, i32) {
    %c0_i32 = arith.constant 0 : i32
    %c0_i32_0 = arith.constant 0 : i32
    %c0_i32_1 = arith.constant 0 : i32
    return %arg0, %c0_i32, %c0_i32_0 : i32, i32, i32
  }
}

module attributes {stable_mosaic.version = 11 : i64} {
  func.func @agcrn_layer_kernel(%arg0: i32, %arg1: memref<1x16x64xf32, #tpu.memory_space<vmem>>, %arg2: memref<16x64xf32, #tpu.memory_space<vmem>>, %arg3: memref<2x16x16xf32, #tpu.memory_space<vmem>>, %arg4: memref<16x8xf32, #tpu.memory_space<vmem>>, %arg5: memref<96x768xf32, #tpu.memory_space<vmem>>, %arg6: memref<96x512xf32, #tpu.memory_space<vmem>>, %arg7: memref<96x256xf32, #tpu.memory_space<vmem>>, %arg8: memref<16x64xf32, #tpu.memory_space<vmem>>, %arg9: memref<16x32xf32, #tpu.memory_space<vmem>>, %arg10: memref<1x16x64xf32, #tpu.memory_space<vmem>>, %arg11: memref<16x64xf32, #tpu.memory_space<vmem>>) attributes {dimension_semantics = [#tpu.dimension_semantics<arbitrary>], iteration_bounds = array<i64: 8>, scalar_prefetch = 0 : i64, scratch_operands = 1 : i64, tpu.core_type = #tpu.core_type<tc>, window_params = [{transform_indices = @transform_0, window_bounds = array<i64: 1, 16, 64>}, {pipeline_mode = #tpu.pipeline_mode<synchronous>, transform_indices = @transform_1, window_bounds = array<i64: 16, 64>}, {pipeline_mode = #tpu.pipeline_mode<synchronous>, transform_indices = @transform_2, window_bounds = array<i64: 2, 16, 16>}, {pipeline_mode = #tpu.pipeline_mode<synchronous>, transform_indices = @transform_3, window_bounds = array<i64: 16, 8>}, {pipeline_mode = #tpu.pipeline_mode<synchronous>, transform_indices = @transform_4, window_bounds = array<i64: 96, 768>}, {pipeline_mode = #tpu.pipeline_mode<synchronous>, transform_indices = @transform_5, window_bounds = array<i64: 96, 512>}, {pipeline_mode = #tpu.pipeline_mode<synchronous>, transform_indices = @transform_6, window_bounds = array<i64: 96, 256>}, {pipeline_mode = #tpu.pipeline_mode<synchronous>, transform_indices = @transform_7, window_bounds = array<i64: 16, 64>}, {pipeline_mode = #tpu.pipeline_mode<synchronous>, transform_indices = @transform_8, window_bounds = array<i64: 16, 32>}, {transform_indices = @transform_9, window_bounds = array<i64: 1, 16, 64>}]} {
    %c0_i32 = arith.constant 0 : i32
    %0 = arith.cmpi eq, %arg0, %c0_i32 : i32
    %1 = arith.extui %0 : i1 to i32
    %c0_i32_0 = arith.constant 0 : i32
    %2 = arith.cmpi ne, %1, %c0_i32_0 : i32
    scf.if %2 {
      %c0_38 = arith.constant 0 : index
      %c0_39 = arith.constant 0 : index
      %236 = vector.load %arg2[%c0_38, %c0_39] : memref<16x64xf32, #tpu.memory_space<vmem>>, vector<16x64xf32>
      %c0_40 = arith.constant 0 : index
      %c0_41 = arith.constant 0 : index
      %237 = vector.load %arg11[%c0_40, %c0_41] : memref<16x64xf32, #tpu.memory_space<vmem>>, vector<16x64xf32>
      tpu.vector_store %arg11[%c0_40, %c0_41], %236 {strides = array<i32>} : memref<16x64xf32, #tpu.memory_space<vmem>>, vector<16x64xf32>,
    } else {
    }
    %c0 = arith.constant 0 : index
    %c0_1 = arith.constant 0 : index
    %c0_2 = arith.constant 0 : index
    %3 = vector.load %arg1[%c0, %c0_1, %c0_2] : memref<1x16x64xf32, #tpu.memory_space<vmem>>, vector<1x16x64xf32>
    %4 = vector.shape_cast %3 : vector<1x16x64xf32> to vector<16x64xf32>
    %c0_3 = arith.constant 0 : index
    %c0_4 = arith.constant 0 : index
    %5 = vector.load %arg11[%c0_3, %c0_4] : memref<16x64xf32, #tpu.memory_space<vmem>>, vector<16x64xf32>
    %c0_5 = arith.constant 0 : index
    %c0_6 = arith.constant 0 : index
    %c0_7 = arith.constant 0 : index
    %6 = vector.load %arg3[%c0_5, %c0_6, %c0_7] : memref<2x16x16xf32, #tpu.memory_space<vmem>>, vector<2x16x16xf32>
    %c0_8 = arith.constant 0 : index
    %c0_9 = arith.constant 0 : index
    %7 = vector.load %arg4[%c0_8, %c0_9] : memref<16x8xf32, #tpu.memory_space<vmem>>, vector<16x8xf32>
    %c0_10 = arith.constant 0 : index
    %c0_11 = arith.constant 0 : index
    %8 = vector.load %arg5[%c0_10, %c0_11] : memref<96x768xf32, #tpu.memory_space<vmem>>, vector<96x768xf32>
    %c0_12 = arith.constant 0 : index
    %c0_13 = arith.constant 0 : index
    %9 = vector.load %arg6[%c0_12, %c0_13] : memref<96x512xf32, #tpu.memory_space<vmem>>, vector<96x512xf32>
    %c0_14 = arith.constant 0 : index
    %c0_15 = arith.constant 0 : index
    %10 = vector.load %arg7[%c0_14, %c0_15] : memref<96x256xf32, #tpu.memory_space<vmem>>, vector<96x256xf32>
    %c0_16 = arith.constant 0 : index
    %c0_17 = arith.constant 0 : index
    %11 = vector.load %arg8[%c0_16, %c0_17] : memref<16x64xf32, #tpu.memory_space<vmem>>, vector<16x64xf32>
    %c0_18 = arith.constant 0 : index
    %c0_19 = arith.constant 0 : index
    %12 = vector.load %arg9[%c0_18, %c0_19] : memref<16x32xf32, #tpu.memory_space<vmem>>, vector<16x32xf32>
    %13 = vector.extract_strided_slice %7 {offsets = [0, 0], sizes = [16, 1], strides = [1, 1]} : vector<16x8xf32> to vector<16x1xf32>
    %14 = vector.extract_strided_slice %7 {offsets = [0, 1], sizes = [16, 1], strides = [1, 1]} : vector<16x8xf32> to vector<16x1xf32>
    %15 = vector.extract_strided_slice %7 {offsets = [0, 2], sizes = [16, 1], strides = [1, 1]} : vector<16x8xf32> to vector<16x1xf32>
    %16 = vector.extract_strided_slice %7 {offsets = [0, 3], sizes = [16, 1], strides = [1, 1]} : vector<16x8xf32> to vector<16x1xf32>
    %17 = vector.extract_strided_slice %7 {offsets = [0, 4], sizes = [16, 1], strides = [1, 1]} : vector<16x8xf32> to vector<16x1xf32>
    %18 = vector.extract_strided_slice %7 {offsets = [0, 5], sizes = [16, 1], strides = [1, 1]} : vector<16x8xf32> to vector<16x1xf32>
    %19 = vector.extract_strided_slice %7 {offsets = [0, 6], sizes = [16, 1], strides = [1, 1]} : vector<16x8xf32> to vector<16x1xf32>
    %20 = vector.extract_strided_slice %7 {offsets = [0, 7], sizes = [16, 1], strides = [1, 1]} : vector<16x8xf32> to vector<16x1xf32>
    %21 = tpu.concatenate %4, %5 in 1 : vector<16x64xf32>, vector<16x64xf32> -> vector<16x128xf32>
    %22 = vector.extract_strided_slice %6 {offsets = [0, 0, 0], sizes = [1, 16, 16], strides = [1, 1, 1]} : vector<2x16x16xf32> to vector<1x16x16xf32>
    %23 = vector.shape_cast %22 : vector<1x16x16xf32> to vector<16x16xf32>
    %cst = arith.constant dense<0.000000e+00> : vector<16x128xf32>
    %24 = tpu.matmul %23, %21, %cst {dimension_numbers = #tpu.dot_dimension_numbers<[1], [0], [0], [1], [0, 0, 1, 1], [], []>} : vector<16x16xf32>, vector<16x128xf32>, vector<16x128xf32> -> vector<16x128xf32>
    %25 = vector.extract_strided_slice %6 {offsets = [1, 0, 0], sizes = [1, 16, 16], strides = [1, 1, 1]} : vector<2x16x16xf32> to vector<1x16x16xf32>
    %26 = vector.shape_cast %25 : vector<1x16x16xf32> to vector<16x16xf32>
    %cst_20 = arith.constant dense<0.000000e+00> : vector<16x128xf32>
    %27 = tpu.matmul %26, %21, %cst_20 {dimension_numbers = #tpu.dot_dimension_numbers<[1], [0], [0], [1], [0, 0, 1, 1], [], []>} : vector<16x16xf32>, vector<16x128xf32>, vector<16x128xf32> -> vector<16x128xf32>
    %28 = vector.extract_strided_slice %21 {offsets = [0, 0], sizes = [16, 32], strides = [1, 1]} : vector<16x128xf32> to vector<16x32xf32>
    %29 = vector.extract_strided_slice %24 {offsets = [0, 0], sizes = [16, 32], strides = [1, 1]} : vector<16x128xf32> to vector<16x32xf32>
    %30 = vector.extract_strided_slice %27 {offsets = [0, 0], sizes = [16, 32], strides = [1, 1]} : vector<16x128xf32> to vector<16x32xf32>
    %31 = tpu.concatenate %28, %29, %30 in 1 : vector<16x32xf32>, vector<16x32xf32>, vector<16x32xf32> -> vector<16x96xf32>
    %32 = vector.extract_strided_slice %21 {offsets = [0, 64], sizes = [16, 32], strides = [1, 1]} : vector<16x128xf32> to vector<16x32xf32>
    %33 = vector.extract_strided_slice %24 {offsets = [0, 64], sizes = [16, 32], strides = [1, 1]} : vector<16x128xf32> to vector<16x32xf32>
    %34 = vector.extract_strided_slice %27 {offsets = [0, 64], sizes = [16, 32], strides = [1, 1]} : vector<16x128xf32> to vector<16x32xf32>
    %35 = tpu.concatenate %32, %33, %34 in 1 : vector<16x32xf32>, vector<16x32xf32>, vector<16x32xf32> -> vector<16x96xf32>
    %cst_21 = arith.constant dense<0.000000e+00> : vector<16x768xf32>
    %36 = tpu.matmul %31, %8, %cst_21 {dimension_numbers = #tpu.dot_dimension_numbers<[1], [0], [0], [1], [0, 0, 1, 1], [], []>} : vector<16x96xf32>, vector<96x768xf32>, vector<16x768xf32> -> vector<16x768xf32>
    %37 = vector.extract_strided_slice %36 {offsets = [0, 0], sizes = [16, 512], strides = [1, 1]} : vector<16x768xf32> to vector<16x512xf32>
    %cst_22 = arith.constant dense<0.000000e+00> : vector<16x512xf32>
    %38 = tpu.matmul %35, %9, %cst_22 {dimension_numbers = #tpu.dot_dimension_numbers<[1], [0], [0], [1], [0, 0, 1, 1], [], []>} : vector<16x96xf32>, vector<96x512xf32>, vector<16x512xf32> -> vector<16x512xf32>
    %39 = arith.addf %37, %38 : vector<16x512xf32>
    %40 = vector.extract_strided_slice %39 {offsets = [0, 0], sizes = [16, 64], strides = [1, 1]} : vector<16x512xf32> to vector<16x64xf32>
    %41 = vector.broadcast %13 : vector<16x1xf32> to vector<16x64xf32>
    %42 = arith.mulf %41, %40 : vector<16x64xf32>
    %43 = vector.extract_strided_slice %39 {offsets = [0, 64], sizes = [16, 64], strides = [1, 1]} : vector<16x512xf32> to vector<16x64xf32>
    %44 = vector.broadcast %14 : vector<16x1xf32> to vector<16x64xf32>
    %45 = arith.mulf %44, %43 : vector<16x64xf32>
    %46 = arith.addf %42, %45 : vector<16x64xf32>
    %47 = vector.extract_strided_slice %39 {offsets = [0, 128], sizes = [16, 64], strides = [1, 1]} : vector<16x512xf32> to vector<16x64xf32>
    %48 = vector.broadcast %15 : vector<16x1xf32> to vector<16x64xf32>
    %49 = arith.mulf %48, %47 : vector<16x64xf32>
    %50 = arith.addf %46, %49 : vector<16x64xf32>
    %51 = vector.extract_strided_slice %39 {offsets = [0, 192], sizes = [16, 64], strides = [1, 1]} : vector<16x512xf32> to vector<16x64xf32>
    %52 = vector.broadcast %16 : vector<16x1xf32> to vector<16x64xf32>
    %53 = arith.mulf %52, %51 : vector<16x64xf32>
    %54 = arith.addf %50, %53 : vector<16x64xf32>
    %55 = vector.extract_strided_slice %39 {offsets = [0, 256], sizes = [16, 64], strides = [1, 1]} : vector<16x512xf32> to vector<16x64xf32>
    %56 = vector.broadcast %17 : vector<16x1xf32> to vector<16x64xf32>
    %57 = arith.mulf %56, %55 : vector<16x64xf32>
    %58 = arith.addf %54, %57 : vector<16x64xf32>
    %59 = vector.extract_strided_slice %39 {offsets = [0, 320], sizes = [16, 64], strides = [1, 1]} : vector<16x512xf32> to vector<16x64xf32>
    %60 = vector.broadcast %18 : vector<16x1xf32> to vector<16x64xf32>
    %61 = arith.mulf %60, %59 : vector<16x64xf32>
    %62 = arith.addf %58, %61 : vector<16x64xf32>
    %63 = vector.extract_strided_slice %39 {offsets = [0, 384], sizes = [16, 64], strides = [1, 1]} : vector<16x512xf32> to vector<16x64xf32>
    %64 = vector.broadcast %19 : vector<16x1xf32> to vector<16x64xf32>
    %65 = arith.mulf %64, %63 : vector<16x64xf32>
    %66 = arith.addf %62, %65 : vector<16x64xf32>
    %67 = vector.extract_strided_slice %39 {offsets = [0, 448], sizes = [16, 64], strides = [1, 1]} : vector<16x512xf32> to vector<16x64xf32>
    %68 = vector.broadcast %20 : vector<16x1xf32> to vector<16x64xf32>
    %69 = arith.mulf %68, %67 : vector<16x64xf32>
    %70 = arith.addf %66, %69 : vector<16x64xf32>
    %71 = arith.addf %70, %11 : vector<16x64xf32>
    %72 = arith.negf %71 : vector<16x64xf32>
    %73 = math.exp %72 : vector<16x64xf32>
    %cst_23 = arith.constant 1.000000e+00 : f32
    %74 = vector.broadcast %cst_23 : f32 to vector<16x64xf32>
    %75 = arith.addf %74, %73 : vector<16x64xf32>
    %76 = arith.divf %74, %75 : vector<16x64xf32>
    %77 = vector.extract_strided_slice %76 {offsets = [0, 0], sizes = [16, 32], strides = [1, 1]} : vector<16x64xf32> to vector<16x32xf32>
    %78 = vector.extract_strided_slice %76 {offsets = [0, 32], sizes = [16, 32], strides = [1, 1]} : vector<16x64xf32> to vector<16x32xf32>
    %79 = vector.extract_strided_slice %5 {offsets = [0, 0], sizes = [16, 32], strides = [1, 1]} : vector<16x64xf32> to vector<16x32xf32>
    %80 = arith.mulf %77, %79 : vector<16x32xf32>
    %81 = vector.extract_strided_slice %36 {offsets = [0, 512], sizes = [16, 256], strides = [1, 1]} : vector<16x768xf32> to vector<16x256xf32>
    %82 = vector.extract_strided_slice %21 {offsets = [0, 32], sizes = [16, 32], strides = [1, 1]} : vector<16x128xf32> to vector<16x32xf32>
    %83 = vector.extract_strided_slice %24 {offsets = [0, 32], sizes = [16, 32], strides = [1, 1]} : vector<16x128xf32> to vector<16x32xf32>
    %84 = vector.extract_strided_slice %27 {offsets = [0, 32], sizes = [16, 32], strides = [1, 1]} : vector<16x128xf32> to vector<16x32xf32>
    %85 = tpu.concatenate %82, %83, %84 in 1 : vector<16x32xf32>, vector<16x32xf32>, vector<16x32xf32> -> vector<16x96xf32>
    %86 = vector.extract_strided_slice %21 {offsets = [0, 96], sizes = [16, 32], strides = [1, 1]} : vector<16x128xf32> to vector<16x32xf32>
    %87 = vector.extract_strided_slice %24 {offsets = [0, 96], sizes = [16, 32], strides = [1, 1]} : vector<16x128xf32> to vector<16x32xf32>
    %88 = vector.extract_strided_slice %27 {offsets = [0, 96], sizes = [16, 32], strides = [1, 1]} : vector<16x128xf32> to vector<16x32xf32>
    %89 = tpu.concatenate %86, %87, %88 in 1 : vector<16x32xf32>, vector<16x32xf32>, vector<16x32xf32> -> vector<16x96xf32>
    %cst_24 = arith.constant dense<0.000000e+00> : vector<16x768xf32>
    %90 = tpu.matmul %85, %8, %cst_24 {dimension_numbers = #tpu.dot_dimension_numbers<[1], [0], [0], [1], [0, 0, 1, 1], [], []>} : vector<16x96xf32>, vector<96x768xf32>, vector<16x768xf32> -> vector<16x768xf32>
    %91 = vector.extract_strided_slice %90 {offsets = [0, 0], sizes = [16, 512], strides = [1, 1]} : vector<16x768xf32> to vector<16x512xf32>
    %cst_25 = arith.constant dense<0.000000e+00> : vector<16x512xf32>
    %92 = tpu.matmul %89, %9, %cst_25 {dimension_numbers = #tpu.dot_dimension_numbers<[1], [0], [0], [1], [0, 0, 1, 1], [], []>} : vector<16x96xf32>, vector<96x512xf32>, vector<16x512xf32> -> vector<16x512xf32>
    %93 = arith.addf %91, %92 : vector<16x512xf32>
    %94 = vector.extract_strided_slice %93 {offsets = [0, 0], sizes = [16, 64], strides = [1, 1]} : vector<16x512xf32> to vector<16x64xf32>
    %95 = vector.broadcast %13 : vector<16x1xf32> to vector<16x64xf32>
    %96 = arith.mulf %95, %94 : vector<16x64xf32>
    %97 = vector.extract_strided_slice %93 {offsets = [0, 64], sizes = [16, 64], strides = [1, 1]} : vector<16x512xf32> to vector<16x64xf32>
    %98 = vector.broadcast %14 : vector<16x1xf32> to vector<16x64xf32>
    %99 = arith.mulf %98, %97 : vector<16x64xf32>
    %100 = arith.addf %96, %99 : vector<16x64xf32>
    %101 = vector.extract_strided_slice %93 {offsets = [0, 128], sizes = [16, 64], strides = [1, 1]} : vector<16x512xf32> to vector<16x64xf32>
    %102 = vector.broadcast %15 : vector<16x1xf32> to vector<16x64xf32>
    %103 = arith.mulf %102, %101 : vector<16x64xf32>
    %104 = arith.addf %100, %103 : vector<16x64xf32>
    %105 = vector.extract_strided_slice %93 {offsets = [0, 192], sizes = [16, 64], strides = [1, 1]} : vector<16x512xf32> to vector<16x64xf32>
    %106 = vector.broadcast %16 : vector<16x1xf32> to vector<16x64xf32>
    %107 = arith.mulf %106, %105 : vector<16x64xf32>
    %108 = arith.addf %104, %107 : vector<16x64xf32>
    %109 = vector.extract_strided_slice %93 {offsets = [0, 256], sizes = [16, 64], strides = [1, 1]} : vector<16x512xf32> to vector<16x64xf32>
    %110 = vector.broadcast %17 : vector<16x1xf32> to vector<16x64xf32>
    %111 = arith.mulf %110, %109 : vector<16x64xf32>
    %112 = arith.addf %108, %111 : vector<16x64xf32>
    %113 = vector.extract_strided_slice %93 {offsets = [0, 320], sizes = [16, 64], strides = [1, 1]} : vector<16x512xf32> to vector<16x64xf32>
    %114 = vector.broadcast %18 : vector<16x1xf32> to vector<16x64xf32>
    %115 = arith.mulf %114, %113 : vector<16x64xf32>
    %116 = arith.addf %112, %115 : vector<16x64xf32>
    %117 = vector.extract_strided_slice %93 {offsets = [0, 384], sizes = [16, 64], strides = [1, 1]} : vector<16x512xf32> to vector<16x64xf32>
    %118 = vector.broadcast %19 : vector<16x1xf32> to vector<16x64xf32>
    %119 = arith.mulf %118, %117 : vector<16x64xf32>
    %120 = arith.addf %116, %119 : vector<16x64xf32>
    %121 = vector.extract_strided_slice %93 {offsets = [0, 448], sizes = [16, 64], strides = [1, 1]} : vector<16x512xf32> to vector<16x64xf32>
    %122 = vector.broadcast %20 : vector<16x1xf32> to vector<16x64xf32>
    %123 = arith.mulf %122, %121 : vector<16x64xf32>
    %124 = arith.addf %120, %123 : vector<16x64xf32>
    %125 = arith.addf %124, %11 : vector<16x64xf32>
    %126 = arith.negf %125 : vector<16x64xf32>
    %127 = math.exp %126 : vector<16x64xf32>
    %cst_26 = arith.constant 1.000000e+00 : f32
    %128 = vector.broadcast %cst_26 : f32 to vector<16x64xf32>
    %129 = arith.addf %128, %127 : vector<16x64xf32>
    %130 = arith.divf %128, %129 : vector<16x64xf32>
    %131 = vector.extract_strided_slice %130 {offsets = [0, 0], sizes = [16, 32], strides = [1, 1]} : vector<16x64xf32> to vector<16x32xf32>
    %132 = vector.extract_strided_slice %130 {offsets = [0, 32], sizes = [16, 32], strides = [1, 1]} : vector<16x64xf32> to vector<16x32xf32>
    %133 = vector.extract_strided_slice %5 {offsets = [0, 32], sizes = [16, 32], strides = [1, 1]} : vector<16x64xf32> to vector<16x32xf32>
    %134 = arith.mulf %131, %133 : vector<16x32xf32>
    %135 = vector.extract_strided_slice %90 {offsets = [0, 512], sizes = [16, 256], strides = [1, 1]} : vector<16x768xf32> to vector<16x256xf32>
    %136 = tpu.concatenate %80, %134 in 1 : vector<16x32xf32>, vector<16x32xf32> -> vector<16x64xf32>
    %137 = vector.extract_strided_slice %6 {offsets = [0, 0, 0], sizes = [1, 16, 16], strides = [1, 1, 1]} : vector<2x16x16xf32> to vector<1x16x16xf32>
    %138 = vector.shape_cast %137 : vector<1x16x16xf32> to vector<16x16xf32>
    %cst_27 = arith.constant dense<0.000000e+00> : vector<16x64xf32>
    %139 = tpu.matmul %138, %136, %cst_27 {dimension_numbers = #tpu.dot_dimension_numbers<[1], [0], [0], [1], [0, 0, 1, 1], [], []>} : vector<16x16xf32>, vector<16x64xf32>, vector<16x64xf32> -> vector<16x64xf32>
    %140 = vector.extract_strided_slice %6 {offsets = [1, 0, 0], sizes = [1, 16, 16], strides = [1, 1, 1]} : vector<2x16x16xf32> to vector<1x16x16xf32>
    %141 = vector.shape_cast %140 : vector<1x16x16xf32> to vector<16x16xf32>
    %cst_28 = arith.constant dense<0.000000e+00> : vector<16x64xf32>
    %142 = tpu.matmul %141, %136, %cst_28 {dimension_numbers = #tpu.dot_dimension_numbers<[1], [0], [0], [1], [0, 0, 1, 1], [], []>} : vector<16x16xf32>, vector<16x64xf32>, vector<16x64xf32> -> vector<16x64xf32>
    %143 = vector.extract_strided_slice %136 {offsets = [0, 0], sizes = [16, 32], strides = [1, 1]} : vector<16x64xf32> to vector<16x32xf32>
    %144 = vector.extract_strided_slice %139 {offsets = [0, 0], sizes = [16, 32], strides = [1, 1]} : vector<16x64xf32> to vector<16x32xf32>
    %145 = vector.extract_strided_slice %142 {offsets = [0, 0], sizes = [16, 32], strides = [1, 1]} : vector<16x64xf32> to vector<16x32xf32>
    %146 = tpu.concatenate %143, %144, %145 in 1 : vector<16x32xf32>, vector<16x32xf32>, vector<16x32xf32> -> vector<16x96xf32>
    %cst_29 = arith.constant dense<0.000000e+00> : vector<16x256xf32>
    %147 = tpu.matmul %146, %10, %cst_29 {dimension_numbers = #tpu.dot_dimension_numbers<[1], [0], [0], [1], [0, 0, 1, 1], [], []>} : vector<16x96xf32>, vector<96x256xf32>, vector<16x256xf32> -> vector<16x256xf32>
    %148 = arith.addf %81, %147 : vector<16x256xf32>
    %149 = vector.extract_strided_slice %148 {offsets = [0, 0], sizes = [16, 32], strides = [1, 1]} : vector<16x256xf32> to vector<16x32xf32>
    %150 = vector.broadcast %13 : vector<16x1xf32> to vector<16x32xf32>
    %151 = arith.mulf %150, %149 : vector<16x32xf32>
    %152 = vector.extract_strided_slice %148 {offsets = [0, 32], sizes = [16, 32], strides = [1, 1]} : vector<16x256xf32> to vector<16x32xf32>
    %153 = vector.broadcast %14 : vector<16x1xf32> to vector<16x32xf32>
    %154 = arith.mulf %153, %152 : vector<16x32xf32>
    %155 = arith.addf %151, %154 : vector<16x32xf32>
    %156 = vector.extract_strided_slice %148 {offsets = [0, 64], sizes = [16, 32], strides = [1, 1]} : vector<16x256xf32> to vector<16x32xf32>
    %157 = vector.broadcast %15 : vector<16x1xf32> to vector<16x32xf32>
    %158 = arith.mulf %157, %156 : vector<16x32xf32>
    %159 = arith.addf %155, %158 : vector<16x32xf32>
    %160 = vector.extract_strided_slice %148 {offsets = [0, 96], sizes = [16, 32], strides = [1, 1]} : vector<16x256xf32> to vector<16x32xf32>
    %161 = vector.broadcast %16 : vector<16x1xf32> to vector<16x32xf32>
    %162 = arith.mulf %161, %160 : vector<16x32xf32>
    %163 = arith.addf %159, %162 : vector<16x32xf32>
    %164 = vector.extract_strided_slice %148 {offsets = [0, 128], sizes = [16, 32], strides = [1, 1]} : vector<16x256xf32> to vector<16x32xf32>
    %165 = vector.broadcast %17 : vector<16x1xf32> to vector<16x32xf32>
    %166 = arith.mulf %165, %164 : vector<16x32xf32>
    %167 = arith.addf %163, %166 : vector<16x32xf32>
    %168 = vector.extract_strided_slice %148 {offsets = [0, 160], sizes = [16, 32], strides = [1, 1]} : vector<16x256xf32> to vector<16x32xf32>
    %169 = vector.broadcast %18 : vector<16x1xf32> to vector<16x32xf32>
    %170 = arith.mulf %169, %168 : vector<16x32xf32>
    %171 = arith.addf %167, %170 : vector<16x32xf32>
    %172 = vector.extract_strided_slice %148 {offsets = [0, 192], sizes = [16, 32], strides = [1, 1]} : vector<16x256xf32> to vector<16x32xf32>
    %173 = vector.broadcast %19 : vector<16x1xf32> to vector<16x32xf32>
    %174 = arith.mulf %173, %172 : vector<16x32xf32>
    %175 = arith.addf %171, %174 : vector<16x32xf32>
    %176 = vector.extract_strided_slice %148 {offsets = [0, 224], sizes = [16, 32], strides = [1, 1]} : vector<16x256xf32> to vector<16x32xf32>
    %177 = vector.broadcast %20 : vector<16x1xf32> to vector<16x32xf32>
    %178 = arith.mulf %177, %176 : vector<16x32xf32>
    %179 = arith.addf %175, %178 : vector<16x32xf32>
    %180 = arith.addf %179, %12 : vector<16x32xf32>
    %181 = math.tanh %180 : vector<16x32xf32>
    %182 = arith.mulf %78, %79 : vector<16x32xf32>
    %cst_30 = arith.constant 1.000000e+00 : f32
    %183 = vector.broadcast %cst_30 : f32 to vector<16x32xf32>
    %184 = arith.subf %183, %78 : vector<16x32xf32>
    %185 = arith.mulf %184, %181 : vector<16x32xf32>
    %186 = arith.addf %182, %185 : vector<16x32xf32>
    %187 = vector.extract_strided_slice %136 {offsets = [0, 32], sizes = [16, 32], strides = [1, 1]} : vector<16x64xf32> to vector<16x32xf32>
    %188 = vector.extract_strided_slice %139 {offsets = [0, 32], sizes = [16, 32], strides = [1, 1]} : vector<16x64xf32> to vector<16x32xf32>
    %189 = vector.extract_strided_slice %142 {offsets = [0, 32], sizes = [16, 32], strides = [1, 1]} : vector<16x64xf32> to vector<16x32xf32>
    %190 = tpu.concatenate %187, %188, %189 in 1 : vector<16x32xf32>, vector<16x32xf32>, vector<16x32xf32> -> vector<16x96xf32>
    %cst_31 = arith.constant dense<0.000000e+00> : vector<16x256xf32>
    %191 = tpu.matmul %190, %10, %cst_31 {dimension_numbers = #tpu.dot_dimension_numbers<[1], [0], [0], [1], [0, 0, 1, 1], [], []>} : vector<16x96xf32>, vector<96x256xf32>, vector<16x256xf32> -> vector<16x256xf32>
    %192 = arith.addf %135, %191 : vector<16x256xf32>
    %193 = vector.extract_strided_slice %192 {offsets = [0, 0], sizes = [16, 32], strides = [1, 1]} : vector<16x256xf32> to vector<16x32xf32>
    %194 = vector.broadcast %13 : vector<16x1xf32> to vector<16x32xf32>
    %195 = arith.mulf %194, %193 : vector<16x32xf32>
    %196 = vector.extract_strided_slice %192 {offsets = [0, 32], sizes = [16, 32], strides = [1, 1]} : vector<16x256xf32> to vector<16x32xf32>
    %197 = vector.broadcast %14 : vector<16x1xf32> to vector<16x32xf32>
    %198 = arith.mulf %197, %196 : vector<16x32xf32>
    %199 = arith.addf %195, %198 : vector<16x32xf32>
    %200 = vector.extract_strided_slice %192 {offsets = [0, 64], sizes = [16, 32], strides = [1, 1]} : vector<16x256xf32> to vector<16x32xf32>
    %201 = vector.broadcast %15 : vector<16x1xf32> to vector<16x32xf32>
    %202 = arith.mulf %201, %200 : vector<16x32xf32>
    %203 = arith.addf %199, %202 : vector<16x32xf32>
    %204 = vector.extract_strided_slice %192 {offsets = [0, 96], sizes = [16, 32], strides = [1, 1]} : vector<16x256xf32> to vector<16x32xf32>
    %205 = vector.broadcast %16 : vector<16x1xf32> to vector<16x32xf32>
    %206 = arith.mulf %205, %204 : vector<16x32xf32>
    %207 = arith.addf %203, %206 : vector<16x32xf32>
    %208 = vector.extract_strided_slice %192 {offsets = [0, 128], sizes = [16, 32], strides = [1, 1]} : vector<16x256xf32> to vector<16x32xf32>
    %209 = vector.broadcast %17 : vector<16x1xf32> to vector<16x32xf32>
    %210 = arith.mulf %209, %208 : vector<16x32xf32>
    %211 = arith.addf %207, %210 : vector<16x32xf32>
    %212 = vector.extract_strided_slice %192 {offsets = [0, 160], sizes = [16, 32], strides = [1, 1]} : vector<16x256xf32> to vector<16x32xf32>
    %213 = vector.broadcast %18 : vector<16x1xf32> to vector<16x32xf32>
    %214 = arith.mulf %213, %212 : vector<16x32xf32>
    %215 = arith.addf %211, %214 : vector<16x32xf32>
    %216 = vector.extract_strided_slice %192 {offsets = [0, 192], sizes = [16, 32], strides = [1, 1]} : vector<16x256xf32> to vector<16x32xf32>
    %217 = vector.broadcast %19 : vector<16x1xf32> to vector<16x32xf32>
    %218 = arith.mulf %217, %216 : vector<16x32xf32>
    %219 = arith.addf %215, %218 : vector<16x32xf32>
    %220 = vector.extract_strided_slice %192 {offsets = [0, 224], sizes = [16, 32], strides = [1, 1]} : vector<16x256xf32> to vector<16x32xf32>
    %221 = vector.broadcast %20 : vector<16x1xf32> to vector<16x32xf32>
    %222 = arith.mulf %221, %220 : vector<16x32xf32>
    %223 = arith.addf %219, %222 : vector<16x32xf32>
    %224 = arith.addf %223, %12 : vector<16x32xf32>
    %225 = math.tanh %224 : vector<16x32xf32>
    %226 = arith.mulf %132, %133 : vector<16x32xf32>
    %cst_32 = arith.constant 1.000000e+00 : f32
    %227 = vector.broadcast %cst_32 : f32 to vector<16x32xf32>
    %228 = arith.subf %227, %132 : vector<16x32xf32>
    %229 = arith.mulf %228, %225 : vector<16x32xf32>
    %230 = arith.addf %226, %229 : vector<16x32xf32>
    %231 = tpu.concatenate %186, %230 in 1 : vector<16x32xf32>, vector<16x32xf32> -> vector<16x64xf32>
    %c0_33 = arith.constant 0 : index
    %c0_34 = arith.constant 0 : index
    %232 = vector.load %arg11[%c0_33, %c0_34] : memref<16x64xf32, #tpu.memory_space<vmem>>, vector<16x64xf32>
    tpu.vector_store %arg11[%c0_33, %c0_34], %231 {strides = array<i32>} : memref<16x64xf32, #tpu.memory_space<vmem>>, vector<16x64xf32>,
    %c0_35 = arith.constant 0 : index
    %c0_36 = arith.constant 0 : index
    %c0_37 = arith.constant 0 : index
    %233 = vector.load %arg10[%c0_35, %c0_36, %c0_37] : memref<1x16x64xf32, #tpu.memory_space<vmem>>, vector<1x16x64xf32>
    %234 = vector.shape_cast %233 : vector<1x16x64xf32> to vector<16x64xf32>
    %235 = vector.shape_cast %231 : vector<16x64xf32> to vector<1x16x64xf32>
    tpu.vector_store %arg10[%c0_35, %c0_36, %c0_37], %235 {strides = array<i32>} : memref<1x16x64xf32, #tpu.memory_space<vmem>>, vector<1x16x64xf32>,
    return
  }
  func.func @transform_0(%arg0: i32) -> (i32, i32, i32) {
    %c0_i32 = arith.constant 0 : i32
    %c0_i32_0 = arith.constant 0 : i32
    %c0_i32_1 = arith.constant 0 : i32
    return %arg0, %c0_i32, %c0_i32_0 : i32, i32, i32
  }
  func.func @transform_1(%arg0: i32) -> (i32, i32) {
    %c0_i32 = arith.constant 0 : i32
    %c0_i32_0 = arith.constant 0 : i32
    %c0_i32_1 = arith.constant 0 : i32
    return %c0_i32, %c0_i32_0 : i32, i32
  }
  func.func @transform_2(%arg0: i32) -> (i32, i32, i32) {
    %c0_i32 = arith.constant 0 : i32
    %c0_i32_0 = arith.constant 0 : i32
    %c0_i32_1 = arith.constant 0 : i32
    %c0_i32_2 = arith.constant 0 : i32
    return %c0_i32, %c0_i32_0, %c0_i32_1 : i32, i32, i32
  }
  func.func @transform_3(%arg0: i32) -> (i32, i32) {
    %c0_i32 = arith.constant 0 : i32
    %c0_i32_0 = arith.constant 0 : i32
    %c0_i32_1 = arith.constant 0 : i32
    return %c0_i32, %c0_i32_0 : i32, i32
  }
  func.func @transform_4(%arg0: i32) -> (i32, i32) {
    %c0_i32 = arith.constant 0 : i32
    %c0_i32_0 = arith.constant 0 : i32
    %c0_i32_1 = arith.constant 0 : i32
    return %c0_i32, %c0_i32_0 : i32, i32
  }
  func.func @transform_5(%arg0: i32) -> (i32, i32) {
    %c0_i32 = arith.constant 0 : i32
    %c0_i32_0 = arith.constant 0 : i32
    %c0_i32_1 = arith.constant 0 : i32
    return %c0_i32, %c0_i32_0 : i32, i32
  }
  func.func @transform_6(%arg0: i32) -> (i32, i32) {
    %c0_i32 = arith.constant 0 : i32
    %c0_i32_0 = arith.constant 0 : i32
    %c0_i32_1 = arith.constant 0 : i32
    return %c0_i32, %c0_i32_0 : i32, i32
  }
  func.func @transform_7(%arg0: i32) -> (i32, i32) {
    %c0_i32 = arith.constant 0 : i32
    %c0_i32_0 = arith.constant 0 : i32
    %c0_i32_1 = arith.constant 0 : i32
    return %c0_i32, %c0_i32_0 : i32, i32
  }
  func.func @transform_8(%arg0: i32) -> (i32, i32) {
    %c0_i32 = arith.constant 0 : i32
    %c0_i32_0 = arith.constant 0 : i32
    %c0_i32_1 = arith.constant 0 : i32
    return %c0_i32, %c0_i32_0 : i32, i32
  }
  func.func @transform_9(%arg0: i32) -> (i32, i32, i32) {
    %c0_i32 = arith.constant 0 : i32
    %c0_i32_0 = arith.constant 0 : i32
    %c0_i32_1 = arith.constant 0 : i32
    return %arg0, %c0_i32, %c0_i32_0 : i32, i32, i32
  }
}

</mosaic_0001>

<bundles_post_ra>
// kernel: avwdcrnn_forward.3
= control target key start
LH: loop header
LB: loop body
LE: loop exit
PB: predicated region body
PF: predicated region fallthrough
CT: control target
= control target key end

     0   :  { %vm10_vm0 = vcmask 64512   ;;  %vm42_vm1 = vcmask 130048   ;;  %v91_v42 = vlaneseq  ;;  %v167_v46 = vmov 0.0   ;;  %s206_s0 = inlined_call_operand.vmem [shape: f32[16,8], index: 0, kind: input, shape index: {}]   ;;  %s207_s1 = inlined_call_operand.vmem [shape: f32[2,16,16], index: 1, kind: output, shape index: {}]  }
   0x1   :  { %v9_v0 = vld [vmem:[%s206_s0 + $0x8] sm:$0xff]  ;;  %v8_v1 = vld [vmem:[%s206_s0] sm:$0xff] }
   0x2   :  { %154 = vmatpush.xpose.msk.msra.mxu2 %vm10_vm0, %v9_v0  ;;  %144 = vmatpush.xpose.msk.msra.mxu0 %vm10_vm0, %v9_v0  ;;  %v92_v43 = vshrl.u32 %v91_v42, 7  ;;  %v95_v44 = vand.u32 127, %v91_v42 }
   0x4   :  { %vm96_vm10 = vcmp.eq.s32.totalorder %v92_v43, %v95_v44  ;;  %v93_v45 = vadd.s32 8, %v92_v43 }
   0x5   :  { %v148_v47 = vsel %vm96_vm10, 1.0, %v167_v46 }
   0x6   :  { %155 = vmatpush.xpose.msk.msra.mxu2 %vm10_vm0, %v8_v1  ;;  %145 = vmatpush.xpose.msk.msra.mxu0 %vm10_vm0, %v8_v1  ;;  %vm97_vm11 = vcmp.eq.s32.totalorder %v93_v45, %v95_v44 }
   0x7   :  { %v149_v51 = vsel %vm97_vm11, 1.0, %v167_v46 }
   0x9   :  { %147 = vmatmul.msk.f32.vlgmr.msra.gmra.mxu2 %vm10_vm0, %v9_v0  ;;  %146 = vmatmul.msk.f32.vlgmr.msra.gmra.mxu0 %vm10_vm0, %v8_v1 }
  0x86   :  { %v34_v4 = vpop.f32.mrf.mxu0 }
  0x87   :  { %v40_v6 = vmax.f32 %v34_v4, 0.0 }
  0x89   :  { %v43_v7 = vsel %vm42_vm1, %v40_v6, -inf }
  0x8c   :  { %v37_v2 = vpop.f32.mrf.mxu2 }
  0x8d   :  { %v41_v3 = vmax.f32 %v37_v2, 0.0 }
  0x8f   :  { %v46_v5 = vsel %vm42_vm1, %v41_v3, -inf }
  0x90   :  { %47 = vmax.xlane.f32.xlu0 %v46_v5 }
  0x98   :  { %44 = vmax.xlane.f32.xlu0 %v43_v7 }
 0x103   :  { %v48_v8 = vpop.xlane.xlu0 %47 }
 0x104   :  { %v50_v9 = vsub.f32 %v41_v3, %v48_v8 }
 0x106   :  { %v53_v10 = vmul.f32 1.442695, %v50_v9 }
 0x108   :  { %159 = vpow2.f32 %v53_v10 }
 0x10b   :  { %v45_v11 = vpop.xlane.xlu0 %44 }
 0x10c   :  { %v49_v12 = vsub.f32 %v40_v6, %v45_v11 }
 0x10e   :  { %v160_v13 = vpop.eup %159  ;;  %v51_v14 = vmul.f32 1.442695, %v49_v12 }
 0x10f   :  { %v58_v15 = vsel %vm42_vm1, %v160_v13, 0.0 }
 0x110   :  { %161 = vpow2.f32 %v51_v14  ;;  %59 = vadd.xlane.f32.xlu1 %v58_v15 }
 0x116   :  { %v162_v16 = vpop.eup %161 }
 0x117   :  { %v55_v17 = vsel %vm42_vm1, %v162_v16, 0.0 }
 0x118   :  { %56 = vadd.xlane.f32.xlu1 %v55_v17 }
 0x183   :  { %v60_v18 = vpop.xlane.xlu1 %59 }
 0x184   :  { %163 = vrcp.f32 %v60_v18  ;;  %v87_v23 = vand.u32 2147483648, %v60_v18  ;;  %v85_v25 = vand.u32 2147483647, %v60_v18  ;;  %vm81_vm3 = vweird.f32 %v60_v18 }
 0x186   :  { %v88_v28 = vor.u32 1.1754944e-38, %v87_v23  ;;  %vm86_vm5 = vcmp.eq.f32.partialorder %v85_v25, 8.507059e+37 }
 0x18a   :  { %v164_v19 = vpop.eup %163 }
 0x18b   :  { %v77_v20 = vmul.f32 %v164_v19, %v60_v18  ;;  %v57_v21 = vpop.xlane.xlu1 %56  ;;  %vm82_vm2 = vweird.f32 %v164_v19 }
 0x18c   :  { %165 = vrcp.f32 %v57_v21  ;;  %vm83_vm4 = vmor %vm81_vm3, %vm82_vm2  ;;  %v72_v34 = vand.u32 2147483648, %v57_v21  ;;  %v70_v36 = vand.u32 2147483647, %v57_v21  ;;  %vm66_vm7 = vweird.f32 %v57_v21 }
 0x18d   :  { %v78_v22 = vsub.f32 1.0, %v77_v20 }
 0x18e   :  { %v73_v38 = vor.u32 1.1754944e-38, %v72_v34  ;;  %vm71_vm9 = vcmp.eq.f32.partialorder %v70_v36, 8.507059e+37 }
 0x18f   :  { %v79_v24 = vmul.f32 %v164_v19, %v78_v22 }
 0x191   :  { %v80_v26 = vadd.f32 %v164_v19, %v79_v24 }
 0x192   :  { %v166_v27 = vpop.eup %165 }
 0x193   :  { %v62_v29 = vmul.f32 %v166_v27, %v57_v21  ;;  %v84_v30 = vsel %vm83_vm4, %v164_v19, %v80_v26  ;;  %vm67_vm6 = vweird.f32 %v166_v27 }
 0x194   :  { %v89_v31 = vsel %vm86_vm5, %v88_v28, %v84_v30  ;;  %vm68_vm8 = vmor %vm66_vm7, %vm67_vm6 }
 0x195   :  { %v63_v32 = vsub.f32 1.0, %v62_v29  ;;  %v90_v33 = vmul.f32 %v160_v13, %v89_v31 }
 0x197   :  { %v64_v35 = vmul.f32 %v166_v27, %v63_v32  ;;  %122 = vmatpush.msra.mxu1 %v90_v33  ;;  %156 = vmatpush.msra.mxu3 %v90_v33  ;;  %136 = vst.msk [vmem:[%s207_s1 + $0x8] sm:$0xff] %vm42_vm1, %v90_v33 }
 0x199   :  { %v65_v37 = vadd.f32 %v166_v27, %v64_v35 }
 0x19b   :  { %v69_v39 = vsel %vm68_vm8, %v166_v27, %v65_v37 }
 0x19c   :  { %v74_v40 = vsel %vm71_vm9, %v73_v38, %v69_v39 }
 0x19d   :  { %v75_v41 = vmul.f32 %v162_v16, %v74_v40 }
 0x19f   :  { %123 = vmatpush.msra.mxu1 %v75_v41  ;;  %157 = vmatpush.msra.mxu3 %v75_v41  ;;  %135 = vst.msk [vmem:[%s207_s1] sm:$0xff] %vm42_vm1, %v75_v41 }
 0x1a0   :  { %150 = vmatmul.msk.f32.vlgmr.msra.gmra.mxu1 %vm42_vm1, %v75_v41  ;;  %151 = vmatmul.msk.f32.vlgmr.msra.gmra.mxu3 %vm42_vm1, %v90_v33 }
 0x21d   :  { %v125_v48 = vpop.f32.mrf.mxu1 }
 0x21e   :  { %v131_v49 = vmul.f32 2.0, %v125_v48 }
 0x220   :  { %v133_v50 = vsub.f32 %v131_v49, %v148_v47 }
 0x222   :  { %152 = vst.msk [vmem:[%s207_s1 + $0x10] sm:$0xff] %vm42_vm1, %v133_v50 }
 0x223   :  { %v128_v52 = vpop.f32.mrf.mxu3 }
 0x224   :  { %v132_v53 = vmul.f32 2.0, %v128_v52 }
 0x226   :  { %v134_v54 = vsub.f32 %v132_v53, %v149_v51 }
 0x228   :  { %153 = vst.msk [vmem:[%s207_s1 + $0x18] sm:$0xff] %vm42_vm1, %v134_v54 }

// kernel: avwdcrnn_forward.4
= control target key start
LH: loop header
LB: loop body
LE: loop exit
PB: predicated region body
PF: predicated region fallthrough
CT: control target
= control target key end

     0   :  { %s2101_s30 = smov 0   ;;  %s3072_s0 = inlined_call_operand.vmem [shape: f32[8,16,4], index: 0, kind: input, shape index: {}]   ;;  %s3073_s1 = inlined_call_operand.vmem [shape: f32[16,64], index: 1, kind: input, shape index: {}]   ;;  %s3074_s2 = inlined_call_operand.vmem [shape: f32[2,16,16], index: 2, kind: input, shape index: {}]   ;;  %s3075_s3 = inlined_call_operand.vmem [shape: f32[16,8], index: 3, kind: input, shape index: {}]   ;;  %s3076_s4 = inlined_call_operand.vmem [shape: f32[6,768], index: 4, kind: input, shape index: {}]   ;;  %s3077_s5 = inlined_call_operand.vmem [shape: f32[96,512], index: 5, kind: input, shape index: {}]   ;;  %s3078_s6 = inlined_call_operand.vmem [shape: f32[96,256], index: 6, kind: input, shape index: {}]   ;;  %s3079_s7 = inlined_call_operand.vmem [shape: f32[16,64], index: 7, kind: input, shape index: {}]   ;;  %s3080_s8 = inlined_call_operand.vmem [shape: f32[16,32], index: 8, kind: input, shape index: {}]   ;;  %s3081_s9 = inlined_call_operand.vmem [shape: f32[8,16,64], index: 9, kind: output, shape index: {}]  }
   0x1 LB: > { %s1867_s10 = sadd.s32 4294967295, %s2031_s30   ;;  %p1871_p0 = scmp.ge.s32.totalorder %s2031_s30, 1  ;;  %s2031_s30 = sphi %s2101_s30, %s19_s30  }
   0x2   : > { %p287_p1 = scmp.lt.s32.totalorder %s2031_s30, 9 }
   0x4   : > { %p288_p2 = pnand %p1871_p0, %p287_p1 }
   0x5   : > { %p323_p3 = scmp.lt.s32.totalorder (!%p288_p2), %s1867_s10, 7  ;;  %p1876_p4 = scmp.ne.s32.totalorder (!%p288_p2), %s1867_s10, 0 }
   0x6   : > { %291 = sbr.rel (%p288_p2) target bundleno = 1646 (0x66e), region = 56 }
   0xb   : > { %s324_s11 = scalar_select %p323_p3, %s1867_s10, 7 }
   0xc   : > { %336 = sbr.rel (%p1876_p4) target bundleno = 20 (0x14), region = 60 }
   0xd   : > { %s1951_s12 = sshll.u32 %s324_s11, 4 }
   0xe   : > { %s327_s15 = scalar_lea.vmem %s3072_s0, %s1951_s12  ;;  %s2115_s18 = scalar_lea.vmem %s3081_s9, %s1951_s12 }
  0x11   : > { %v337_v0 = vld [vmem:[%s3073_s1] sm:$0xff]  ;;  %vm339_vm0 = vcmask 523264   ;;  %v338_v1 = vld [vmem:[%s3073_s1 + $0x8] sm:$0xff] }
  0x12   : > { %340 = vst.msk [vmem:[#allocation2] sm:$0xff] %vm339_vm0, %v337_v0 }
  0x13   : > { %341 = vst.msk [vmem:[#allocation2 + $0x8] sm:$0xff] %vm339_vm0, %v338_v1 }
  0x14 PF: > { %s2033_s23 = smov 4   ;;  %vm442_vm1 = vcmask 31744   ;;  %v343_v4 = vld [vmem:[%s327_s15 + $0x8] sm:$0xff]  ;;  %v342_v7 = vld [vmem:[%s327_s15] sm:$0xff]  ;;  %vm445_vm2 = vcmask 130048   ;;  %v348_v11 = vld [vmem:[%s3074_s2 + $0x10] sm:$0xff] }
  0x15   : > { %v346_v9 = vld [vmem:[%s3074_s2] sm:$0xff]  ;;  %s2034_s28 = smov 124   ;;  %v347_v12 = vld [vmem:[%s3074_s2 + $0x8] sm:$0xff]  ;;  %v349_v13 = vld [vmem:[%s3074_s2 + $0x18] sm:$0xff]  ;;  %s2035_s13 = smov 126   ;;  %vm558_vm3 = vcmask 1045504  }
  0x16   : > { %s2036_s14 = smov 2   ;;  %s2037_s15 = smov 28   ;;  %v2182_v18 = vld [vmem:[%s3076_s4 + $0x20] sm:$0x3f]  ;;  %v2187_v19 = vld [vmem:[%s3076_s4 + $0x28] sm:$0x3f] }
  0x17   : > { %s2038_s16 = smov 60   ;;  %s2039_s17 = smov 92   ;;  %v2192_v20 = vld [vmem:[%s3077_s5 + $0x170] sm:$0xff]  ;;  %v2201_v21 = vld [vmem:[%s3077_s5 + $0x178] sm:$0xff]  ;;  %v2040_v24 = vmov 1   ;;  %v2232_v27 = vld [vmem:[%s3075_s3 + $0x8] sm:$0xff] }
  0x18   : > { %v2206_v22 = vld [vmem:[%s3077_s5 + $0x150] sm:$0xff]  ;;  %v2211_v23 = vld [vmem:[%s3077_s5 + $0x158] sm:$0xff]  ;;  %1979 = vset.pattern.permute.xlu1 %v2040_v24  ;;  %1980 = vset.pattern.permute.xlu2 %v2040_v24  ;;  %v2238_v28 = vld [vmem:[%s3076_s4] sm:$0x3f]  ;;  %v2041_v41 = vmov 3   ;;  %v2042_v52 = vmov 5  }
  0x19   : > { %v2127_v3 = vld [vmem:[#allocation2] sm:$0xff]  ;;  %v2218_v25 = vld [vmem:[%s3077_s5 + $0x130] sm:$0xff]  ;;  %v2223_v26 = vld [vmem:[%s3077_s5 + $0x138] sm:$0xff]  ;;  %1881 = vmatpush.msk.msra.mxu2 %vm558_vm3, %v2238_v28  ;;  %1981 = vset.pattern.permute.xlu0 %v2041_v41  ;;  %v2043_v55 = vmov 0   ;;  %vm520_vm4 = vcmask 15360   ;;  %vm551_vm5 = vcmask 48128  }
  0x1a   : > { %v2123_v2 = vld [vmem:[#allocation2 + $0x8] sm:$0xff]  ;;  %v2248_v30 = vld [vmem:[%s3077_s5 + $0x110] sm:$0xff]  ;;  %v2257_v31 = vld [vmem:[%s3077_s5 + $0x118] sm:$0xff]  ;;  %vm545_vm6 = vcmask 261120   ;;  %vm548_vm7 = vcmask 523264   ;;  %vm715_vm8 = vcmask 785408  }
  0x1b   : > { %438 = vrot.lane.b32.xlu0 %v2123_v2, %s2033_s23  ;;  %v2243_v29 = vld [vmem:[%s3076_s4 + $0x8] sm:$0x3f]  ;;  %v2264_v32 = vld [vmem:[%s3077_s5 + $0xf0] sm:$0xff]  ;;  %v2269_v33 = vld [vmem:[%s3077_s5 + $0xf8] sm:$0xff] }
  0x1c   : > { %1884 = vmatpush.msk.msra.mxu3 %vm558_vm3, %v2243_v29  ;;  %v2274_v34 = vld [vmem:[%s3077_s5 + $0xd0] sm:$0xff]  ;;  %v2279_v35 = vld [vmem:[%s3077_s5 + $0xd8] sm:$0xff]  ;;  %v2310_v40 = vld [vmem:[%s3075_s3] sm:$0xff] }
  0x1d   : > { %v2286_v36 = vld [vmem:[%s3077_s5 + $0xb0] sm:$0xff]  ;;  %v2291_v37 = vld [vmem:[%s3077_s5 + $0xb8] sm:$0xff]  ;;  %v2382_v59 = vld [vmem:[%s3077_s5 + $0x160] sm:$0xff] }
  0x1e   : > { %v2300_v38 = vld [vmem:[%s3077_s5 + $0x90] sm:$0xff]  ;;  %v2305_v39 = vld [vmem:[%s3077_s5 + $0x98] sm:$0xff]  ;;  %v2387_v60 = vld [vmem:[%s3077_s5 + $0x168] sm:$0xff] }
  0x1f   : > { %v354_v42 = vld [vmem:[%s3076_s4 + $0x10] sm:$0x3f]  ;;  %v355_v43 = vld [vmem:[%s3076_s4 + $0x18] sm:$0x3f]  ;;  %v2396_v61 = vld [vmem:[%s3077_s5 + $0x140] sm:$0xff] }
  0x20   : > { %1887 = vmatpush.msk.msrb.mxu2 %vm558_vm3, %v354_v42  ;;  %v2324_v44 = vld [vmem:[%s3077_s5 + $0x70] sm:$0xff]  ;;  %v2331_v45 = vld [vmem:[%s3077_s5 + $0x78] sm:$0xff]  ;;  %1890 = vmatpush.msk.msrb.mxu3 %vm558_vm3, %v355_v43  ;;  %v2401_v62 = vld [vmem:[%s3077_s5 + $0x148] sm:$0xff] }
  0x21   : > { %v2338_v46 = vld [vmem:[%s3077_s5 + $0x50] sm:$0xff]  ;;  %v2343_v47 = vld [vmem:[%s3077_s5 + $0x58] sm:$0xff]  ;;  %v2408_v0 = vld [vmem:[%s3077_s5 + $0x120] sm:$0xff] }
  0x22   : > { %v2349_v48 = vld [vmem:[%s3077_s5 + $0x30] sm:$0xff]  ;;  %v2355_v49 = vld [vmem:[%s3077_s5 + $0x38] sm:$0xff]  ;;  %v2413_v1 = vld [vmem:[%s3077_s5 + $0x128] sm:$0xff] }
  0x23   : > { %436 = vrot.lane.b32.xlu0 %v2127_v3, %s2033_s23  ;;  %v2363_v50 = vld [vmem:[%s3077_s5 + $0x10] sm:$0xff]  ;;  %v2369_v51 = vld [vmem:[%s3077_s5 + $0x18] sm:$0xff] }
  0x8d   : > { %v439_v5 = vpop.permute.xlu0 %438 }
  0x8e   : > { %v2132_v6 = vsel %vm442_vm1, %v343_v4, %v439_v5  ;;  %v2044_v4 = vmov 7   ;;  %v2045_v5 = vmov 2  }
  0x8f   : > { %466 = vmatpush.msra.mxu0 %v2132_v6  ;;  %495 = vmatpush.msra.mxu1 %v2132_v6 }
  0x95   : > { %v437_v8 = vpop.permute.xlu0 %436 }
  0x96   : > { %v2140_v10 = vsel %vm442_vm1, %v342_v7, %v437_v8 }
  0x97   : > { %527 = vrot.lane.b32.xlu0 %v2140_v10, %s2034_s28  ;;  %467 = vmatpush.msra.mxu0 %v2140_v10 }
  0x98   : > { %496 = vmatpush.msra.mxu1 %v2140_v10  ;;  %1877 = vmatmul.msk.f32.vlgmr.msra.gmra.mxu0 %vm445_vm2, %v346_v9  ;;  %v2429_v9 = vld [vmem:[%s3077_s5 + $0x100] sm:$0xff] }
  0x99   : > { %1879 = vmatmul.msk.f32.vlgmr.msra.gmra.mxu1 %vm445_vm2, %v348_v11  ;;  %1893 = vmatpush.msk.msrb.mxu0 %vm558_vm3, %v2182_v18 }
  0x9a   : > { %1896 = vmatpush.msk.msrb.mxu1 %vm558_vm3, %v2187_v19 }
  0x9b   : > { %772 = vmatpush.msra.mxu0 %v2192_v20 }
  0x9c   : > { %795 = vmatpush.msra.mxu1 %v2201_v21 }
  0x9d   : > { %773 = vmatpush.msra.mxu0 %v2206_v22 }
  0x9e   : > { %796 = vmatpush.msra.mxu1 %v2211_v23 }
  0x9f   : > { %529 = vrot.lane.b32.xlu0 %v2132_v6, %s2034_s28  ;;  %774 = vmatpush.msra.mxu0 %v2218_v25 }
  0xa0   : > { %1878 = vmatmul.msk.f32.gmra.mxu0 %vm445_vm2, %v347_v12  ;;  %797 = vmatpush.msra.mxu1 %v2223_v26  ;;  %v2445_v12 = vld [vmem:[%s3077_s5 + $0xe0] sm:$0xff] }
  0xa1   : > { %1880 = vmatmul.msk.f32.gmra.mxu1 %vm445_vm2, %v349_v13  ;;  %775 = vmatpush.msra.mxu0 %v2248_v30  ;;  %v2450_v13 = vld [vmem:[%s3077_s5 + $0xe8] sm:$0xff] }
  0xa2   : > { %798 = vmatpush.msra.mxu1 %v2257_v31 }
  0xa3   : > { %776 = vmatpush.msra.mxu0 %v2264_v32 }
  0xa4   : > { %799 = vmatpush.msra.mxu1 %v2269_v33 }
  0xa5   : > { %777 = vmatpush.msra.mxu0 %v2274_v34 }
  0xa6   : > { %800 = vmatpush.msra.mxu1 %v2279_v35 }
  0xa7   : > { %992 = vrot.lane.b32.xlu0 %v2140_v10, %s2035_s13  ;;  %778 = vmatpush.msra.mxu0 %v2286_v36 }
  0xa8   : > { %801 = vmatpush.msra.mxu1 %v2291_v37 }
  0xa9   : > { %779 = vmatpush.msra.mxu0 %v2300_v38 }
  0xaa   : > { %802 = vmatpush.msra.mxu1 %v2305_v39 }
  0xab   : > { %780 = vmatpush.msra.mxu0 %v2324_v44 }
  0xac   : > { %803 = vmatpush.msra.mxu1 %v2331_v45 }
  0xad   : > { %781 = vmatpush.msra.mxu0 %v2338_v46 }
  0xae   : > { %804 = vmatpush.msra.mxu1 %v2343_v47 }
  0xaf   : > { %782 = vmatpush.msra.mxu0 %v2349_v48 }
  0xb0   : > { %805 = vmatpush.msra.mxu1 %v2355_v49 }
  0xb1   : > { %783 = vmatpush.msra.mxu0 %v2363_v50 }
  0xb2   : > { %806 = vmatpush.msra.mxu1 %v2369_v51 }
 0x115   : > { %v2162_v14 = vpop.f32.mrf.mxu0 }
 0x116   : > { %v498_v15 = vpop.f32.mrf.mxu1  ;;  %506 = vrot.lane.b32.xlu1 %v2162_v14, %s2036_s14 }
 0x11d   : > { %v2165_v16 = vpop.f32.mrf.mxu0 }
 0x11e   : > { %v501_v17 = vpop.f32.mrf.mxu1  ;;  %514 = vrot.lane.b32.xlu1 %v498_v15, %s2033_s23  ;;  %508 = vrot.lane.b32.xlu2 %v2165_v16, %s2036_s14 }
 0x11f   : > { %1000 = vrot.lane.b32.xlu0 %v501_v17, %s2036_s14 }
 0x126   : > { %533 = vrot.lane.b32.xlu1 %v2162_v14, %s2037_s15  ;;  %516 = vrot.lane.b32.xlu2 %v501_v17, %s2033_s23  ;;  %s2050_s23 = smov 32  }
 0x127   : > { %1020 = vrot.lane.b32.xlu0 %v498_v15, %s2037_s15 }
 0x12e   : > { %535 = vrot.lane.b32.xlu1 %v2165_v16, %s2037_s15  ;;  %539 = vrot.lane.b32.xlu2 %v498_v15, %s2038_s16 }
 0x12f   : > { %1022 = vrot.lane.b32.xlu0 %v501_v17, %s2037_s15 }
 0x136   : > { %998 = vrot.lane.b32.xlu1 %v498_v15, %s2036_s14  ;;  %541 = vrot.lane.b32.xlu2 %v501_v17, %s2038_s16  ;;  %v2457_v15 = vld [vmem:[%s3077_s5 + $0xc0] sm:$0xff]  ;;  %v2462_v17 = vld [vmem:[%s3077_s5 + $0xc8] sm:$0xff]  ;;  %s2048_s16 = smov 64  }
 0x137   : > { %871 = vperm.xlu0 %1981, %v2232_v27  }
 0x13e   : > { %1008 = vrot.lane.b32.xlu1 %v2140_v10, %s2039_s17  ;;  %994 = vrot.lane.b32.xlu2 %v2132_v6, %s2035_s13 }
 0x13f   : > { %1986 = vset.pattern.permute.xlu0 %v2044_v4 }
 0x140   : > { %931 = vperm.xlu0 %1986, %v2310_v40  }
 0x146   : > { %1010 = vrot.lane.b32.xlu1 %v2132_v6, %s2039_s17  ;;  %1014 = vrot.lane.b32.xlu2 %v2162_v14, %s2034_s28  ;;  %s2049_s17 = smov 96  }
 0x148   : > { %1990 = vset.pattern.permute.xlu0 %v2045_v5 }
 0x149   : > { %855 = vperm.xlu0 %1990, %v2310_v40  }
 0x14e   : > { %1016 = vrot.lane.b32.xlu2 %v2165_v16, %s2034_s28  ;;  %839 = vperm.xlu1 %1979, %v2232_v27  }
 0x156   : > { %1982 = vset.pattern.permute.xlu1 %v2041_v41  ;;  %835 = vperm.xlu2 %1980, %v2310_v40  }
 0x157   : > { %867 = vperm.xlu1 %1982, %v2310_v40  }
 0x15e   : > { %1983 = vset.pattern.permute.xlu2 %v2042_v52 }
 0x15f   : > { %903 = vperm.xlu2 %1983, %v2232_v27   ;;  %1984 = vset.pattern.permute.xlu1 %v2042_v52 }
 0x160   : > { %899 = vperm.xlu1 %1984, %v2310_v40  }
 0x167   : > { %1985 = vset.pattern.permute.xlu2 %v2044_v4 }
 0x168   : > { %1987 = vset.pattern.permute.xlu1 %v2043_v55  ;;  %935 = vperm.xlu2 %1985, %v2232_v27  }
 0x169   : > { %829 = vperm.xlu1 %1987, %v2232_v27  }
 0x170   : > { %1988 = vset.pattern.permute.xlu2 %v2043_v55 }
 0x171   : > { %1989 = vset.pattern.permute.xlu1 %v2045_v5  ;;  %824 = vperm.xlu2 %1988, %v2310_v40   ;;  %v2047_v5 = vmov 4  }
 0x172   : > { %859 = vperm.xlu1 %1989, %v2232_v27  }
 0x178   : > { %v509_v54 = vpop.permute.xlu2 %508 }
 0x179   : > { %v522_v7 = vsel %vm520_vm4, %v2132_v6, %v509_v54  ;;  %v528_v6 = vpop.permute.xlu0 %527  ;;  %v375_v54 = vld [vmem:[%s3077_s5 + $0x88] sm:$0xff]  ;;  %1991 = vset.pattern.permute.xlu2 %v2047_v5 }
 0x17a   : > { %891 = vperm.xlu2 %1991, %v2232_v27  }
 0x180   : > { %v517_v63 = vpop.permute.xlu2 %516 }
 0x181   : > { %v524_v8 = vsel %vm442_vm1, %v522_v7, %v517_v63 }
 0x182   : > { %887 = vperm.xlu2 %1991, %v2310_v40  }
 0x188   : > { %v507_v53 = vpop.permute.xlu1 %506  ;;  %v540_v24 = vpop.permute.xlu2 %539 }
 0x189   : > { %v521_v56 = vsel %vm520_vm4, %v2140_v10, %v507_v53  ;;  %v2434_v10 = vld [vmem:[%s3077_s5 + $0x108] sm:$0xff]  ;;  %v374_v53 = vld [vmem:[%s3077_s5 + $0x80] sm:$0xff] }
 0x190   : > { %v515_v57 = vpop.permute.xlu1 %514  ;;  %v542_v7 = vpop.permute.xlu2 %541 }
 0x191   : > { %v523_v58 = vsel %vm442_vm1, %v521_v56, %v515_v57  ;;  %v530_v56 = vpop.permute.xlu0 %529  ;;  %v370_v57 = vld [vmem:[%s3077_s5 + $0x60] sm:$0xff] }
 0x192   : > { %1882 = vmatmul.msk.f32.vlgmr.msra.gmra.mxu2 %vm551_vm5, %v523_v58  ;;  %1885 = vmatmul.msk.f32.vlgmr.msra.gmra.mxu3 %vm551_vm5, %v523_v58 }
 0x193   : > { %1894 = vmatmul.msk.f32.vlgmr.msrb.gmra.mxu0 %vm551_vm5, %v523_v58  ;;  %1897 = vmatmul.msk.f32.vlgmr.msrb.gmra.mxu1 %vm551_vm5, %v523_v58 }
 0x194   : > { %726 = vmatpush.msra.mxu2 %v2382_v59  ;;  %749 = vmatpush.msra.mxu3 %v2387_v60 }
 0x195   : > { %1915 = vmatpush.msk.msrb.mxu0 %vm558_vm3, %v354_v42  ;;  %1918 = vmatpush.msk.msrb.mxu1 %vm558_vm3, %v355_v43  ;;  %v378_v42 = vld [vmem:[%s3077_s5 + $0xa0] sm:$0xff]  ;;  %v379_v43 = vld [vmem:[%s3077_s5 + $0xa8] sm:$0xff] }
 0x196   : > { %727 = vmatpush.msra.mxu2 %v2396_v61  ;;  %750 = vmatpush.msra.mxu3 %v2401_v62 }
 0x198   : > { %728 = vmatpush.msra.mxu2 %v2408_v0  ;;  %751 = vmatpush.msra.mxu3 %v2413_v1  ;;  %v534_v11 = vpop.permute.xlu1 %533 }
 0x199   : > { %v546_v41 = vsel %vm545_vm6, %v528_v6, %v534_v11  ;;  %v366_v6 = vld [vmem:[%s3077_s5 + $0x40] sm:$0xff] }
 0x19a   : > { %1883 = vmatmul.msk.f32.gmra.mxu2 %vm551_vm5, %v524_v8  ;;  %1886 = vmatmul.msk.f32.gmra.mxu3 %vm551_vm5, %v524_v8  ;;  %v549_v52 = vsel %vm548_vm7, %v546_v41, %v540_v24 }
 0x19b   : > { %1895 = vmatmul.msk.f32.gmra.mxu0 %vm551_vm5, %v524_v8  ;;  %1898 = vmatmul.msk.f32.gmra.mxu1 %vm551_vm5, %v524_v8 }
 0x19c   : > { %729 = vmatpush.msra.mxu2 %v2429_v9  ;;  %752 = vmatpush.msra.mxu3 %v2434_v10 }
 0x19e   : > { %730 = vmatpush.msra.mxu2 %v2445_v12  ;;  %753 = vmatpush.msra.mxu3 %v2450_v13 }
 0x1a0   : > { %731 = vmatpush.msra.mxu2 %v2457_v15  ;;  %754 = vmatpush.msra.mxu3 %v2462_v17  ;;  %v536_v55 = vpop.permute.xlu1 %535 }
 0x1a1   : > { %v547_v63 = vsel %vm545_vm6, %v530_v56, %v536_v55 }
 0x1a2   : > { %1888 = vmatmul.msk.f32.vlgmr.msrb.gmra.mxu2 %vm551_vm5, %v523_v58  ;;  %1891 = vmatmul.msk.f32.vlgmr.msrb.gmra.mxu3 %vm551_vm5, %v523_v58  ;;  %v371_v58 = vld [vmem:[%s3077_s5 + $0x68] sm:$0xff] }
 0x1a3   : > { %1903 = vmatmul.msk.f32.vlgmr.msra.gmra.mxu0 %vm715_vm8, %v549_v52  ;;  %1905 = vmatmul.msk.f32.vlgmr.msra.gmra.mxu1 %vm715_vm8, %v549_v52 }
 0x1a4   : > { %732 = vmatpush.msra.mxu2 %v378_v42  ;;  %755 = vmatpush.msra.mxu3 %v379_v43 }
 0x1a5   : > { %1184 = vmatpush.msra.mxu0 %v2382_v59  ;;  %1207 = vmatpush.msra.mxu1 %v2387_v60  ;;  %v367_v59 = vld [vmem:[%s3077_s5 + $0x48] sm:$0xff]  ;;  %v550_v60 = vsel %vm548_vm7, %v547_v63, %v542_v7 }
 0x1a6   : > { %733 = vmatpush.msra.mxu2 %v374_v53  ;;  %756 = vmatpush.msra.mxu3 %v375_v54 }
 0x1a7   : > { %1185 = vmatpush.msra.mxu0 %v2396_v61  ;;  %1208 = vmatpush.msra.mxu1 %v2401_v62  ;;  %v362_v61 = vld [vmem:[%s3077_s5 + $0x20] sm:$0xff]  ;;  %v363_v62 = vld [vmem:[%s3077_s5 + $0x28] sm:$0xff] }
 0x1a8   : > { %734 = vmatpush.msra.mxu2 %v370_v57  ;;  %757 = vmatpush.msra.mxu3 %v371_v58  ;;  %v999_v11 = vpop.permute.xlu1 %998 }
 0x1a9   : > { %1186 = vmatpush.msra.mxu0 %v2408_v0  ;;  %1209 = vmatpush.msra.mxu1 %v2413_v1  ;;  %v358_v0 = vld [vmem:[%s3077_s5] sm:$0xff]  ;;  %v359_v1 = vld [vmem:[%s3077_s5 + $0x8] sm:$0xff] }
 0x1aa   : > { %1889 = vmatmul.msk.f32.gmra.mxu2 %vm551_vm5, %v524_v8  ;;  %1892 = vmatmul.msk.f32.gmra.mxu3 %vm551_vm5, %v524_v8  ;;  %v993_v8 = vpop.permute.xlu0 %992 }
 0x1ab   : > { %1904 = vmatmul.msk.f32.gmra.mxu0 %vm715_vm8, %v550_v60  ;;  %1906 = vmatmul.msk.f32.gmra.mxu1 %vm715_vm8, %v550_v60  ;;  %v1004_v24 = vsel %vm520_vm4, %v993_v8, %v2162_v14  ;;  %v2046_v14 = vmov 6  }
 0x1ac   : > { %735 = vmatpush.msra.mxu2 %v366_v6  ;;  %758 = vmatpush.msra.mxu3 %v367_v59 }
 0x1ad   : > { %1187 = vmatpush.msra.mxu0 %v2429_v9  ;;  %1210 = vmatpush.msra.mxu1 %v2434_v10  ;;  %v995_v9 = vpop.permute.xlu2 %994  ;;  %v2533_v10 = vsel %vm442_vm1, %v1004_v24, %v999_v11 }
 0x1ae   : > { %736 = vmatpush.msra.mxu2 %v362_v61  ;;  %759 = vmatpush.msra.mxu3 %v363_v62 }
 0x1af   : > { %1188 = vmatpush.msra.mxu0 %v2445_v12  ;;  %1211 = vmatpush.msra.mxu1 %v2450_v13  ;;  %v1005_v13 = vsel %vm520_vm4, %v995_v9, %v2165_v16 }
 0x1b0   : > { %737 = vmatpush.msra.mxu2 %v358_v0  ;;  %760 = vmatpush.msra.mxu3 %v359_v1 }
 0x1b1   : > { %1189 = vmatpush.msra.mxu0 %v2457_v15  ;;  %1212 = vmatpush.msra.mxu1 %v2462_v17  ;;  %v1009_v15 = vpop.permute.xlu1 %1008 }
 0x1b2   : > { %1899 = vmatmul.msk.f32.vlgmr.msra.gmra.mxu2 %vm715_vm8, %v549_v52  ;;  %1901 = vmatmul.msk.f32.vlgmr.msra.gmra.mxu3 %vm715_vm8, %v549_v52  ;;  %v1001_v12 = vpop.permute.xlu0 %1000 }
 0x1b3   : > { %1916 = vmatmul.msk.f32.vlgmr.msrb.gmra.mxu0 %vm551_vm5, %v2533_v10  ;;  %1919 = vmatmul.msk.f32.vlgmr.msrb.gmra.mxu1 %vm551_vm5, %v2533_v10 }
 0x1b4   : > { %1190 = vmatpush.msra.mxu0 %v378_v42  ;;  %1213 = vmatpush.msra.mxu1 %v379_v43 }
 0x1b5   : > { %1909 = vmatpush.msk.msrb.mxu2 %vm558_vm3, %v2238_v28  ;;  %1992 = vset.pattern.permute.xlu1 %v2046_v14  ;;  %v1007_v28 = vsel %vm442_vm1, %v1005_v13, %v1001_v12  ;;  %v1015_v16 = vpop.permute.xlu2 %1014 }
 0x1b6   : > { %1191 = vmatpush.msra.mxu0 %v374_v53  ;;  %1214 = vmatpush.msra.mxu1 %v375_v54 }
 0x1b7   : > { %923 = vperm.xlu1 %1992, %v2232_v27   ;;  %1912 = vmatpush.msk.msrb.mxu3 %vm558_vm3, %v2243_v29  ;;  %v1026_v29 = vsel %vm545_vm6, %v1009_v15, %v1015_v16 }
 0x1b8   : > { %1192 = vmatpush.msra.mxu0 %v370_v57  ;;  %1215 = vmatpush.msra.mxu1 %v371_v58 }
 0x1b9   : > { %1921 = vmatpush.msk.msra.mxu2 %vm558_vm3, %v2182_v18  ;;  %1924 = vmatpush.msk.msra.mxu3 %vm558_vm3, %v2187_v19  ;;  %v1011_v18 = vpop.permute.xlu1 %1010 }
 0x1ba   : > { %1900 = vmatmul.msk.f32.gmra.mxu2 %vm715_vm8, %v550_v60  ;;  %1902 = vmatmul.msk.f32.gmra.mxu3 %vm715_vm8, %v550_v60  ;;  %v1021_v17 = vpop.permute.xlu0 %1020 }
 0x1bb   : > { %1917 = vmatmul.msk.f32.gmra.mxu0 %vm551_vm5, %v1007_v28  ;;  %1920 = vmatmul.msk.f32.gmra.mxu1 %vm551_vm5, %v1007_v28  ;;  %v1028_v41 = vsel %vm548_vm7, %v1026_v29, %v1021_v17 }
 0x1bc   : > { %1193 = vmatpush.msra.mxu0 %v366_v6  ;;  %1216 = vmatpush.msra.mxu1 %v367_v59 }
 0x1bd   : > { %1993 = vset.pattern.permute.xlu0 %v2046_v14  ;;  %v1017_v19 = vpop.permute.xlu2 %1016 }
 0x1be   : > { %1194 = vmatpush.msra.mxu0 %v362_v61  ;;  %1217 = vmatpush.msra.mxu1 %v363_v62  ;;  %v1027_v27 = vsel %vm545_vm6, %v1011_v18, %v1017_v19 }
 0x1c0   : > { %1195 = vmatpush.msra.mxu0 %v358_v0  ;;  %1218 = vmatpush.msra.mxu1 %v359_v1 }
 0x1c1   : > { %v2628_v54 = vpop.permute.xlu1 %839 }
 0x1c2   : > { %1910 = vmatmul.msk.f32.vlgmr.msrb.gmra.mxu2 %vm551_vm5, %v2533_v10  ;;  %1913 = vmatmul.msk.f32.vlgmr.msrb.gmra.mxu3 %vm551_vm5, %v2533_v10  ;;  %v1023_v42 = vpop.permute.xlu0 %1022 }
 0x1c3   : > { %1927 = vmatmul.msk.f32.vlgmr.msra.gmra.mxu0 %vm715_vm8, %v1028_v41  ;;  %1929 = vmatmul.msk.f32.vlgmr.msra.gmra.mxu1 %vm715_vm8, %v1028_v41 }
 0x1c4   : > { %1230 = vmatpush.msrb.mxu2 %v2192_v20  ;;  %1253 = vmatpush.msrb.mxu3 %v2201_v21  ;;  %v1029_v20 = vsel %vm548_vm7, %v1027_v27, %v1023_v42 }
 0x1c5   : > { %v2636_v61 = vpop.permute.xlu2 %835 }
 0x1c6   : > { %1231 = vmatpush.msrb.mxu2 %v2206_v22  ;;  %1254 = vmatpush.msrb.mxu3 %v2211_v23 }
 0x1c8   : > { %1232 = vmatpush.msrb.mxu2 %v2218_v25  ;;  %1255 = vmatpush.msrb.mxu3 %v2223_v26 }
 0x1c9   : > { %v2638_v62 = vpop.permute.xlu1 %867 }
 0x1ca   : > { %1911 = vmatmul.msk.f32.gmra.mxu2 %vm551_vm5, %v1007_v28  ;;  %1914 = vmatmul.msk.f32.gmra.mxu3 %vm551_vm5, %v1007_v28  ;;  %v2646_v12 = vpop.permute.xlu0 %871 }
 0x1cb   : > { %1928 = vmatmul.msk.f32.gmra.mxu0 %vm715_vm8, %v1029_v20  ;;  %1930 = vmatmul.msk.f32.gmra.mxu1 %vm715_vm8, %v1029_v20 }
 0x1cc   : > { %1233 = vmatpush.msrb.mxu2 %v2248_v30  ;;  %1256 = vmatpush.msrb.mxu3 %v2257_v31 }
 0x1ce   : > { %1234 = vmatpush.msrb.mxu2 %v2264_v32  ;;  %1257 = vmatpush.msrb.mxu3 %v2269_v33 }
 0x1d0   : > { %1235 = vmatpush.msrb.mxu2 %v2274_v34  ;;  %1258 = vmatpush.msrb.mxu3 %v2279_v35 }
 0x1d2   : > { %1922 = vmatmul.msk.f32.vlgmr.msra.gmra.mxu2 %vm551_vm5, %v2533_v10  ;;  %1925 = vmatmul.msk.f32.vlgmr.msra.gmra.mxu3 %vm551_vm5, %v2533_v10  ;;  %v2672_v42 = vpop.permute.xlu1 %899 }
 0x1d3   : > { %1236 = vmatpush.msrb.mxu2 %v2286_v36  ;;  %1259 = vmatpush.msrb.mxu3 %v2291_v37 }
 0x1d5   : > { %1237 = vmatpush.msrb.mxu2 %v2300_v38  ;;  %1260 = vmatpush.msrb.mxu3 %v2305_v39 }
 0x1d7   : > { %1238 = vmatpush.msrb.mxu2 %v2324_v44  ;;  %1261 = vmatpush.msrb.mxu3 %v2331_v45 }
 0x1d9   : > { %1239 = vmatpush.msrb.mxu2 %v2338_v46  ;;  %1262 = vmatpush.msrb.mxu3 %v2343_v47 }
 0x1da   : > { %1923 = vmatmul.msk.f32.gmra.mxu2 %vm551_vm5, %v1007_v28  ;;  %1926 = vmatmul.msk.f32.gmra.mxu3 %vm551_vm5, %v1007_v28 }
 0x1db   : > { %1240 = vmatpush.msrb.mxu2 %v2349_v48  ;;  %1263 = vmatpush.msrb.mxu3 %v2355_v49 }
 0x1dd   : > { %1241 = vmatpush.msrb.mxu2 %v2363_v50  ;;  %1264 = vmatpush.msrb.mxu3 %v2369_v51 }
 0x1e2   : > { %1931 = vmatmul.msk.f32.vlgmr.msrb.gmra.mxu2 %vm715_vm8, %v1028_v41  ;;  %1933 = vmatmul.msk.f32.vlgmr.msrb.gmra.mxu3 %vm715_vm8, %v1028_v41 }
 0x1ea   : > { %1932 = vmatmul.msk.f32.gmra.mxu2 %vm715_vm8, %v1029_v20  ;;  %1934 = vmatmul.msk.f32.gmra.mxu3 %vm715_vm8, %v1029_v20 }
 0x210   : > { %v2610_v21 = vpop.f32.mrf.mxu1  ;;  %v2612_v22 = vpop.f32.mrf.mxu0 }
 0x215   : > { %v594_v23 = vpop.f32.mrf.mxu2  ;;  %v617_v25 = vpop.f32.mrf.mxu3 }
 0x218   : > { %v2614_v26 = vpop.f32.mrf.mxu1  ;;  %v2616_v30 = vpop.f32.mrf.mxu0 }
 0x21d   : > { %v597_v31 = vpop.f32.mrf.mxu2  ;;  %v2618_v32 = vpop.f32.mrf.mxu3 }
 0x220   : > { %v808_v33 = vpop.f32.mrf.mxu1  ;;  %v785_v34 = vpop.f32.mrf.mxu0 }
 0x225   : > { %v640_v35 = vpop.f32.mrf.mxu2  ;;  %v663_v36 = vpop.f32.mrf.mxu3 }
 0x226   : > { %v2620_v37 = vadd.f32 %v785_v34, %v640_v35  ;;  %v2622_v38 = vadd.f32 %v808_v33, %v663_v36  ;;  %v2683_v35 = vpop.permute.xlu0 %931 }
 0x228   : > { %v811_v39 = vpop.f32.mrf.mxu1  ;;  %v788_v44 = vpop.f32.mrf.mxu0 }
 0x22d   : > { %v643_v45 = vpop.f32.mrf.mxu2  ;;  %v666_v46 = vpop.f32.mrf.mxu3 }
 0x22e   : > { %v2624_v47 = vadd.f32 %v788_v44, %v643_v45  ;;  %v2626_v48 = vadd.f32 %v811_v39, %v666_v46 }
 0x230   : > { %v1099_v49 = vpop.f32.mrf.mxu0  ;;  %v1122_v50 = vpop.f32.mrf.mxu1 }
 0x235   : > { %v739_v51 = vpop.f32.mrf.mxu2  ;;  %v762_v43 = vpop.f32.mrf.mxu3 }
 0x236   : > { %v2653_v15 = vadd.f32 %v739_v51, %v594_v23  ;;  %v2663_v17 = vadd.f32 %v762_v43, %v617_v25  ;;  %v906_v23 = vmul.f32 %v2672_v42, %v2620_v37 }
 0x238   : > { %v1102_v52 = vpop.f32.mrf.mxu0  ;;  %v1125_v53 = vpop.f32.mrf.mxu1  ;;  %v842_v5 = vmul.f32 %v2636_v61, %v2653_v15  ;;  %v874_v18 = vmul.f32 %v2638_v62, %v2663_v17 }
 0x23d   : > { %v742_v56 = vpop.f32.mrf.mxu2  ;;  %v765_v55 = vpop.f32.mrf.mxu3 }
 0x23e   : > { %v2630_v57 = vadd.f32 %v742_v56, %v597_v31  ;;  %v2681_v31 = vpop.permute.xlu2 %903  ;;  %v2691_v45 = vadd.f32 %v765_v55, %v2618_v32  ;;  %v2720_v55 = vpop.permute.xlu1 %829 }
 0x240   : > { %v1197_v58 = vpop.f32.mrf.mxu0  ;;  %v1220_v63 = vpop.f32.mrf.mxu1  ;;  %v843_v43 = vmul.f32 %v2628_v54, %v2630_v57 }
 0x245   : > { %v1053_v7 = vpop.f32.mrf.mxu2  ;;  %v1076_v6 = vpop.f32.mrf.mxu3 }
 0x246   : > { %v2632_v59 = vadd.f32 %v1197_v58, %v1053_v7  ;;  %v2634_v60 = vadd.f32 %v1220_v63, %v1076_v6  ;;  %v2724_v63 = vpop.permute.xlu1 %859 }
 0x248   : > { %v1282_v0 = vmul.f32 %v2632_v59, %v2636_v61  ;;  %v1298_v1 = vmul.f32 %v2634_v60, %v2638_v62  ;;  %v1200_v8 = vpop.f32.mrf.mxu0  ;;  %v1223_v11 = vpop.f32.mrf.mxu1 }
 0x24a   : > { %1302 = vrot.lane.b32.xlu0 %v1298_v1, %s2048_s16  ;;  %1286 = vrot.lane.b32.xlu1 %v1282_v0, %s2048_s16 }
 0x24d   : > { %v1056_v24 = vpop.f32.mrf.mxu2  ;;  %v1079_v9 = vpop.f32.mrf.mxu3 }
 0x24e   : > { %v1276_v10 = vadd.f32 %v1200_v8, %v1056_v24  ;;  %v1277_v14 = vadd.f32 %v1223_v11, %v1079_v9  ;;  %v2728_v8 = vpop.permute.xlu1 %923  ;;  %v2730_v11 = vpop.permute.xlu0 %855 }
 0x250   : > { %v1283_v13 = vmul.f32 %v1276_v10, %v2628_v54  ;;  %v1299_v28 = vmul.f32 %v1277_v14, %v2646_v12  ;;  %v1295_v6 = vmul.f32 %v1277_v14, %v2724_v63 }
 0x252   : > { %919 = vperm.xlu0 %1993, %v2310_v40   ;;  %1304 = vrot.lane.b32.xlu1 %v1299_v28, %s2048_s16  ;;  %v1294_v28 = vmul.f32 %v2634_v60, %v2730_v11 }
 0x253   : > { %1288 = vrot.lane.b32.xlu2 %v1283_v13, %s2048_s16 }
 0x255   : > { %v2655_v16 = vpop.f32.mrf.mxu2  ;;  %v2657_v29 = vpop.f32.mrf.mxu3 }
 0x25a   : > { %846 = vrot.lane.b32.xlu0 %v842_v5, %s2048_s16 }
 0x25b   : > { %1994 = vset.pattern.permute.xlu0 %v2044_v4 }
 0x25d   : > { %v2665_v40 = vpop.f32.mrf.mxu2  ;;  %v2667_v41 = vpop.f32.mrf.mxu3 }
 0x262   : > { %878 = vrot.lane.b32.xlu0 %v874_v18, %s2048_s16 }
 0x265   : > { %v1243_v19 = vpop.f32.mrf.mxu2  ;;  %v1266_v20 = vpop.f32.mrf.mxu3 }
 0x266   : > { %v1274_v27 = vadd.f32 %v1243_v19, %v1099_v49  ;;  %v2679_v25 = vadd.f32 %v1266_v20, %v1122_v50  ;;  %v2693_v49 = vpop.permute.xlu2 %935  ;;  %v875_v50 = vmul.f32 %v2646_v12, %v2691_v45 }
 0x267   : > { %v939_v32 = vmul.f32 %v2693_v49, %v2626_v48 }
 0x268   : > { %v1314_v4 = vmul.f32 %v1274_v27, %v2672_v42  ;;  %v1330_v36 = vmul.f32 %v2679_v25, %v2683_v35 }
 0x26a   : > { %910 = vrot.lane.b32.xlu0 %v906_v23, %s2048_s16  ;;  %1318 = vrot.lane.b32.xlu1 %v1314_v4, %s2048_s16 }
 0x26d   : > { %v1246_v33 = vpop.f32.mrf.mxu2  ;;  %v1269_v44 = vpop.f32.mrf.mxu3 }
 0x26e   : > { %v1278_v34 = vadd.f32 %v1246_v33, %v1102_v52  ;;  %v1279_v46 = vadd.f32 %v1269_v44, %v1125_v53  ;;  %v907_v52 = vmul.f32 %v2681_v31, %v2624_v47  ;;  %v2712_v53 = vpop.permute.xlu2 %824 }
 0x26f   : > { %v1280_v24 = vmul.f32 %v2632_v59, %v2712_v53  ;;  %v832_v59 = vmul.f32 %v2712_v53, %v2653_v15 }
 0x270   : > { %v1315_v39 = vmul.f32 %v1278_v34, %v2681_v31  ;;  %v1331_v51 = vmul.f32 %v1279_v46, %v2693_v49  ;;  %v1327_v60 = vmul.f32 %v1279_v46, %v2728_v8 }
 0x272   : > { %1334 = vrot.lane.b32.xlu1 %v1330_v36, %s2048_s16  ;;  %1320 = vrot.lane.b32.xlu2 %v1315_v39, %s2048_s16 }
 0x276   : > { %v2718_v56 = vpop.permute.xlu2 %891 }
 0x277   : > { %v1311_v4 = vmul.f32 %v1278_v34, %v2718_v56  ;;  %v2748_v34 = vld [vmem:[%s3079_s7 + $0x8] sm:$0xff] }
 0x27a   : > { %880 = vrot.lane.b32.xlu1 %v875_v50, %s2048_s16  ;;  %1336 = vrot.lane.b32.xlu2 %v1331_v51, %s2048_s16 }
 0x27e   : > { %v2722_v58 = vpop.permute.xlu2 %887 }
 0x282   : > { %1382 = vrot.lane.b32.xlu1 %v2127_v3, %s2049_s17  ;;  %848 = vrot.lane.b32.xlu2 %v843_v43, %s2048_s16  ;;  %v938_v3 = vmul.f32 %v2683_v35, %v2622_v38 }
 0x28a   : > { %944 = vrot.lane.b32.xlu1 %v939_v32, %s2048_s16  ;;  %1384 = vrot.lane.b32.xlu2 %v2123_v2, %s2049_s17  ;;  %v1281_v2 = vmul.f32 %v1276_v10, %v2720_v55  ;;  %v1310_v10 = vmul.f32 %v1274_v27, %v2722_v58  ;;  %v862_v27 = vmul.f32 %v2730_v11, %v2663_v17 }
 0x292   : > { %912 = vrot.lane.b32.xlu2 %v907_v52, %s2048_s16 }
 0x29a   : > { %942 = vrot.lane.b32.xlu2 %v938_v3, %s2048_s16 }
 0x2ad   : > { %v1289_v7 = vpop.permute.xlu2 %1288 }
 0x2ae   : > { %v1293_v0 = vadd.f32 %v1289_v7, %v1281_v2  ;;  %v894_v7 = vmul.f32 %v2722_v58, %v2620_v37 }
 0x2b0   : > { %v1297_v1 = vadd.f32 %v1295_v6, %v1293_v0 }
 0x2bc   : > { %v1303_v9 = vpop.permute.xlu0 %1302  ;;  %v1287_v13 = vpop.permute.xlu1 %1286 }
 0x2bd   : > { %v1292_v5 = vadd.f32 %v1287_v13, %v1280_v24 }
 0x2bf   : > { %v1296_v18 = vadd.f32 %v1294_v28, %v1292_v5 }
 0x2c1   : > { %v1308_v19 = vadd.f32 %v1303_v9, %v1296_v18  ;;  %v863_v9 = vmul.f32 %v2724_v63, %v2691_v45 }
 0x2c3   : > { %v1312_v14 = vadd.f32 %v1310_v10, %v1308_v19 }
 0x2c4   : > { %v2737_v20 = vpop.permute.xlu0 %919  ;;  %v1305_v23 = vpop.permute.xlu1 %1304 }
 0x2c5   : > { %v1309_v33 = vadd.f32 %v1305_v23, %v1297_v1  ;;  %v833_v1 = vmul.f32 %v2720_v55, %v2630_v57  ;;  %v1326_v37 = vmul.f32 %v2679_v25, %v2737_v20  ;;  %v430_v23 = vld [vmem:[%s3079_s7] sm:$0xff] }
 0x2c7   : > { %v1313_v36 = vadd.f32 %v1311_v4, %v1309_v33 }
 0x2cc   : > { %v847_v39 = vpop.permute.xlu0 %846  ;;  %v1321_v44 = vpop.permute.xlu2 %1320 }
 0x2cd   : > { %v852_v50 = vadd.f32 %v847_v39, %v832_v59  ;;  %v1325_v51 = vadd.f32 %v1321_v44, %v1313_v36  ;;  %v895_v44 = vmul.f32 %v2718_v56, %v2624_v47 }
 0x2cf   : > { %v864_v43 = vadd.f32 %v862_v27, %v852_v50  ;;  %v1329_v32 = vadd.f32 %v1327_v60, %v1325_v51 }
 0x2d4   : > { %v879_v52 = vpop.permute.xlu0 %878  ;;  %v1337_v3 = vpop.permute.xlu2 %1336 }
 0x2d5   : > { %v884_v2 = vadd.f32 %v879_v52, %v864_v43  ;;  %v1341_v15 = vadd.f32 %v1337_v3, %v1329_v32 }
 0x2d7   : > { %v1343_v46 = vadd.f32 %v1341_v15, %v2748_v34  ;;  %v896_v6 = vadd.f32 %v894_v7, %v884_v2 }
 0x2d9   : > { %v1936_v0 = vmul.f32 -1.442695, %v1343_v46  ;;  %v927_v46 = vmul.f32 %v2728_v8, %v2626_v48 }
 0x2db   : > { %1995 = vpow2.f32 %v1936_v0 }
 0x2dc   : > { %v1319_v17 = vpop.permute.xlu1 %1318  ;;  %v849_v24 = vpop.permute.xlu2 %848 }
 0x2dd   : > { %v853_v13 = vadd.f32 %v849_v24, %v833_v1  ;;  %v1324_v28 = vadd.f32 %v1319_v17, %v1312_v14  ;;  %v911_v25 = vpop.permute.xlu0 %910  ;;  %v926_v17 = vmul.f32 %v2737_v20, %v2622_v38 }
 0x2de   : > { %v916_v3 = vadd.f32 %v911_v25, %v896_v6 }
 0x2df   : > { %v865_v5 = vadd.f32 %v863_v9, %v853_v13  ;;  %v1328_v19 = vadd.f32 %v1326_v37, %v1324_v28 }
 0x2e0   : > { %v928_v13 = vadd.f32 %v926_v17, %v916_v3 }
 0x2e1   : > { %v1996_v18 = vpop.eup %1995 }
 0x2e2   : > { %v1351_v10 = vadd.f32 1.0, %v1996_v18 }
 0x2e4   : > { %1997 = vrcp.f32 %v1351_v10  ;;  %v1335_v4 = vpop.permute.xlu1 %1334  ;;  %v1385_v33 = vpop.permute.xlu2 %1384  ;;  %v1378_v27 = vand.u32 2147483648, %v1351_v10  ;;  %v1376_v32 = vand.u32 2147483647, %v1351_v10  ;;  %vm1372_vm10 = vweird.f32 %v1351_v10 }
 0x2e5   : > { %v1340_v57 = vadd.f32 %v1335_v4, %v1328_v19 }
 0x2e6   : > { %v1379_v47 = vor.u32 1.1754944e-38, %v1378_v27  ;;  %vm1377_vm12 = vcmp.eq.f32.partialorder %v1376_v32, 8.507059e+37 }
 0x2e7   : > { %v1342_v36 = vadd.f32 %v1340_v57, %v430_v23 }
 0x2e9   : > { %v1935_v59 = vmul.f32 -1.442695, %v1342_v36 }
 0x2ea   : > { %v1998_v45 = vpop.eup %1997 }
 0x2eb   : > { %1999 = vpow2.f32 %v1935_v59  ;;  %v1368_v14 = vmul.f32 %v1998_v45, %v1351_v10  ;;  %vm1373_vm9 = vweird.f32 %v1998_v45 }
 0x2ec   : > { %v881_v39 = vpop.permute.xlu1 %880  ;;  %v913_v51 = vpop.permute.xlu2 %912  ;;  %vm1374_vm11 = vmor %vm1372_vm10, %vm1373_vm9 }
 0x2ed   : > { %v1369_v60 = vsub.f32 1.0, %v1368_v14  ;;  %v885_v50 = vadd.f32 %v881_v39, %v865_v5 }
 0x2ef   : > { %v1370_v43 = vmul.f32 %v1998_v45, %v1369_v60  ;;  %v897_v52 = vadd.f32 %v895_v44, %v885_v50 }
 0x2f1   : > { %v2000_v2 = vpop.eup %1999  ;;  %v1371_v15 = vadd.f32 %v1998_v45, %v1370_v43  ;;  %v917_v7 = vadd.f32 %v913_v51, %v897_v52 }
 0x2f2   : > { %v1350_v0 = vadd.f32 1.0, %v2000_v2 }
 0x2f3   : > { %v1375_v1 = vsel %vm1374_vm11, %v1998_v45, %v1371_v15  ;;  %v929_v24 = vadd.f32 %v927_v46, %v917_v7 }
 0x2f4   : > { %2001 = vrcp.f32 %v1350_v0  ;;  %v2768_v9 = vsel %vm1377_vm12, %v1379_v47, %v1375_v1  ;;  %v1383_v6 = vpop.permute.xlu1 %1382  ;;  %v943_v5 = vpop.permute.xlu2 %942  ;;  %v1363_v57 = vand.u32 2147483648, %v1350_v0  ;;  %v1361_v59 = vand.u32 2147483647, %v1350_v0 }
 0x2f5   : > { %v1389_v28 = vmul.f32 %v1385_v33, %v2768_v9  ;;  %v948_v18 = vadd.f32 %v943_v5, %v928_v13  ;;  %vm1357_vm14 = vweird.f32 %v1350_v0 }
 0x2f6   : > { %v1364_v33 = vor.u32 1.1754944e-38, %v1363_v57  ;;  %vm1362_vm0 = vcmp.eq.f32.partialorder %v1361_v59, 8.507059e+37  ;;  %v2790_v57 = vld [vmem:[#allocation2] sm:$0xff] }
 0x2f7   : > { %1394 = vrot.lane.b32.xlu0 %v1389_v28, %s2050_s23  ;;  %v950_v48 = vadd.f32 %v948_v18, %v430_v23 }
 0x2f9   : > { %v1907_v51 = vmul.f32 -1.442695, %v950_v48 }
 0x2fa   : > { %v2002_v37 = vpop.eup %2001 }
 0x2fb   : > { %v1353_v10 = vmul.f32 %v2002_v37, %v1350_v0  ;;  %vm1358_vm13 = vweird.f32 %v2002_v37 }
 0x2fc   : > { %v945_v19 = vpop.permute.xlu1 %944  ;;  %vm1359_vm15 = vmor %vm1357_vm14, %vm1358_vm13 }
 0x2fd   : > { %v1354_v38 = vsub.f32 1.0, %v1353_v10  ;;  %v949_v4 = vadd.f32 %v945_v19, %v929_v24 }
 0x2ff   : > { %v1355_v36 = vmul.f32 %v2002_v37, %v1354_v38  ;;  %v951_v45 = vadd.f32 %v949_v4, %v2748_v34 }
 0x301   : > { %v1356_v14 = vadd.f32 %v2002_v37, %v1355_v36  ;;  %v1908_v25 = vmul.f32 -1.442695, %v951_v45 }
 0x303   : > { %v1360_v39 = vsel %vm1359_vm15, %v2002_v37, %v1356_v14  ;;  %2003 = vpow2.f32 %v1908_v25  ;;  %v2021_v14 = vld [vmem:[%s3074_s2] sm:$0xff] }
 0x304   : > { %v2773_v44 = vsel %vm1362_vm0, %v1364_v33, %v1360_v39  ;;  %v2022_v33 = vld [vmem:[%s3074_s2 + $0x10] sm:$0xff]  ;;  %v2023_v39 = vld [vmem:[%s3074_s2 + $0x8] sm:$0xff] }
 0x305   : > { %v1388_v23 = vmul.f32 %v1383_v6, %v2773_v44  ;;  %v2779_v6 = vld [vmem:[#allocation2 + $0x8] sm:$0xff] }
 0x307   : > { %1392 = vrot.lane.b32.xlu1 %v1388_v23, %s2050_s23  ;;  %v2024_v23 = vld [vmem:[%s3074_s2 + $0x18] sm:$0xff] }
 0x309   : > { %v2004_v60 = vpop.eup %2003 }
 0x30a   : > { %v959_v50 = vadd.f32 1.0, %v2004_v60 }
 0x30c   : > { %2005 = vrcp.f32 %v959_v50  ;;  %v986_v7 = vand.u32 2147483648, %v959_v50  ;;  %vm980_vm3 = vweird.f32 %v959_v50  ;;  %v984_v46 = vand.u32 2147483647, %v959_v50 }
 0x30d   : > { %2007 = vpow2.f32 %v1907_v51 }
 0x30e   : > { %v987_v17 = vor.u32 1.1754944e-38, %v986_v7  ;;  %vm985_vm5 = vcmp.eq.f32.partialorder %v984_v46, 8.507059e+37  ;;  %v420_v7 = vld [vmem:[%s3078_s6 + $0x70] sm:$0xff]  ;;  %v421_v46 = vld [vmem:[%s3078_s6 + $0x78] sm:$0xff] }
 0x312   : > { %v2006_v34 = vpop.eup %2005 }
 0x313   : > { %v2008_v27 = vpop.eup %2007  ;;  %v976_v43 = vmul.f32 %v2006_v34, %v959_v50  ;;  %vm981_vm1 = vweird.f32 %v2006_v34 }
 0x314   : > { %v958_v32 = vadd.f32 1.0, %v2008_v27  ;;  %vm982_vm4 = vmor %vm980_vm3, %vm981_vm1  ;;  %v429_v27 = vld [vmem:[%s3078_s6 + $0xb8] sm:$0xff] }
 0x315   : > { %v977_v52 = vsub.f32 1.0, %v976_v43  ;;  %v426_v43 = vld [vmem:[%s3078_s6 + $0xa0] sm:$0xff]  ;;  %1499 = vmatpush.msra.mxu3 %v429_v27 }
 0x316   : > { %2009 = vrcp.f32 %v958_v32  ;;  %v971_v37 = vand.u32 2147483648, %v958_v32  ;;  %vm965_vm10 = vweird.f32 %v958_v32  ;;  %v969_v10 = vand.u32 2147483647, %v958_v32 }
 0x317   : > { %v978_v3 = vmul.f32 %v2006_v34, %v977_v52  ;;  %v424_v52 = vld [vmem:[%s3078_s6 + $0x90] sm:$0xff] }
 0x318   : > { %v972_v38 = vor.u32 1.1754944e-38, %v971_v37  ;;  %vm970_vm12 = vcmp.eq.f32.partialorder %v969_v10, 8.507059e+37  ;;  %v410_v37 = vld [vmem:[%s3078_s6 + $0x20] sm:$0xff]  ;;  %v411_v10 = vld [vmem:[%s3078_s6 + $0x28] sm:$0xff] }
 0x319   : > { %v979_v2 = vadd.f32 %v2006_v34, %v978_v3  ;;  %v425_v3 = vld [vmem:[%s3078_s6 + $0x98] sm:$0xff] }
 0x31b   : > { %v983_v47 = vsel %vm982_vm4, %v2006_v34, %v979_v2  ;;  %v428_v34 = vld [vmem:[%s3078_s6 + $0xb0] sm:$0xff]  ;;  %v422_v2 = vld [vmem:[%s3078_s6 + $0x80] sm:$0xff] }
 0x31c   : > { %v2010_v15 = vpop.eup %2009  ;;  %v2777_v1 = vsel %vm985_vm5, %v987_v17, %v983_v47  ;;  %1476 = vmatpush.msra.mxu2 %v428_v34  ;;  %v419_v47 = vld [vmem:[%s3078_s6 + $0x68] sm:$0xff]  ;;  %v416_v17 = vld [vmem:[%s3078_s6 + $0x50] sm:$0xff] }
 0x31d   : > { %v961_v0 = vmul.f32 %v2010_v15, %v958_v32  ;;  %v991_v13 = vmul.f32 %v2779_v6, %v2777_v1  ;;  %vm966_vm9 = vweird.f32 %v2010_v15  ;;  %v427_v32 = vld [vmem:[%s3078_s6 + $0xa8] sm:$0xff] }
 0x31e   : > { %vm967_vm11 = vmor %vm965_vm10, %vm966_vm9  ;;  %1477 = vmatpush.msra.mxu2 %v426_v43  ;;  %1500 = vmatpush.msra.mxu3 %v427_v32 }
 0x31f   : > { %v962_v24 = vsub.f32 1.0, %v961_v0  ;;  %v418_v0 = vld [vmem:[%s3078_s6 + $0x60] sm:$0xff] }
 0x320   : > { %1478 = vmatpush.msra.mxu2 %v424_v52  ;;  %1501 = vmatpush.msra.mxu3 %v425_v3 }
 0x321   : > { %v963_v18 = vmul.f32 %v2010_v15, %v962_v24  ;;  %v417_v24 = vld [vmem:[%s3078_s6 + $0x58] sm:$0xff] }
 0x322   : > { %1479 = vmatpush.msra.mxu2 %v422_v2 }
 0x323   : > { %v964_v48 = vadd.f32 %v2010_v15, %v963_v18  ;;  %v412_v18 = vld [vmem:[%s3078_s6 + $0x30] sm:$0xff] }
 0x324   : > { %1480 = vmatpush.msra.mxu2 %v420_v7 }
 0x325   : > { %v968_v19 = vsel %vm967_vm11, %v2010_v15, %v964_v48  ;;  %v423_v15 = vld [vmem:[%s3078_s6 + $0x88] sm:$0xff]  ;;  %v413_v48 = vld [vmem:[%s3078_s6 + $0x38] sm:$0xff] }
 0x326   : > { %v2788_v4 = vsel %vm970_vm12, %v972_v38, %v968_v19  ;;  %1502 = vmatpush.msra.mxu3 %v423_v15  ;;  %1481 = vmatpush.msra.mxu2 %v418_v0  ;;  %v408_v19 = vld [vmem:[%s3078_s6 + $0x10] sm:$0xff]  ;;  %v409_v38 = vld [vmem:[%s3078_s6 + $0x18] sm:$0xff] }
 0x327   : > { %v990_v36 = vmul.f32 %v2790_v57, %v2788_v4 }
 0x328   : > { %1503 = vmatpush.msra.mxu3 %v421_v46  ;;  %1482 = vmatpush.msra.mxu2 %v416_v17 }
 0x32a   : > { %1504 = vmatpush.msra.mxu3 %v419_v47 }
 0x32c   : > { %1505 = vmatpush.msra.mxu3 %v417_v24 }
 0x369   : > { %v1395_v28 = vpop.permute.xlu0 %1394 }
 0x36a   : > { %v2784_v5 = vsel %vm545_vm6, %v991_v13, %v1395_v28  ;;  %v414_v13 = vld [vmem:[%s3078_s6 + $0x40] sm:$0xff]  ;;  %v415_v28 = vld [vmem:[%s3078_s6 + $0x48] sm:$0xff] }
 0x36b   : > { %1414 = vmatpush.msrb.mxu0 %v2784_v5  ;;  %1437 = vmatpush.msrb.mxu1 %v2784_v5 }
 0x36c   : > { %1483 = vmatpush.msra.mxu2 %v414_v13  ;;  %1506 = vmatpush.msra.mxu3 %v415_v28 }
 0x36e   : > { %1484 = vmatpush.msra.mxu2 %v412_v18  ;;  %1507 = vmatpush.msra.mxu3 %v413_v48 }
 0x370   : > { %1485 = vmatpush.msra.mxu2 %v410_v37  ;;  %1508 = vmatpush.msra.mxu3 %v411_v10 }
 0x372   : > { %1486 = vmatpush.msra.mxu2 %v408_v19  ;;  %1509 = vmatpush.msra.mxu3 %v409_v38 }
 0x379   : > { %v1393_v59 = vpop.permute.xlu1 %1392 }
 0x37a   : > { %v2795_v45 = vsel %vm545_vm6, %v990_v36, %v1393_v59  ;;  %v406_v36 = vld [vmem:[%s3078_s6] sm:$0xff]  ;;  %v407_v59 = vld [vmem:[%s3078_s6 + $0x8] sm:$0xff] }
 0x37b   : > { %1415 = vmatpush.msrb.mxu0 %v2795_v45  ;;  %1438 = vmatpush.msrb.mxu1 %v2795_v45 }
 0x37c   : > { %1937 = vmatmul.msk.f32.vlgmr.msrb.gmra.mxu0 %vm445_vm2, %v2021_v14  ;;  %1939 = vmatmul.msk.f32.vlgmr.msrb.gmra.mxu1 %vm445_vm2, %v2022_v33 }
 0x37d   : > { %1654 = vmatpush.msra.mxu0 %v428_v34  ;;  %1677 = vmatpush.msra.mxu1 %v429_v27 }
 0x37e   : > { %1487 = vmatpush.msra.mxu2 %v406_v36  ;;  %1510 = vmatpush.msra.mxu3 %v407_v59 }
 0x37f   : > { %1655 = vmatpush.msra.mxu0 %v426_v43  ;;  %1678 = vmatpush.msra.mxu1 %v427_v32 }
 0x381   : > { %1656 = vmatpush.msra.mxu0 %v424_v52  ;;  %1679 = vmatpush.msra.mxu1 %v425_v3 }
 0x383   : > { %1657 = vmatpush.msra.mxu0 %v422_v2  ;;  %1680 = vmatpush.msra.mxu1 %v423_v15 }
 0x384   : > { %1938 = vmatmul.msk.f32.gmra.mxu0 %vm445_vm2, %v2023_v39  ;;  %1940 = vmatmul.msk.f32.gmra.mxu1 %vm445_vm2, %v2024_v23 }
 0x385   : > { %1658 = vmatpush.msra.mxu0 %v420_v7  ;;  %1681 = vmatpush.msra.mxu1 %v421_v46 }
 0x387   : > { %1659 = vmatpush.msra.mxu0 %v418_v0  ;;  %1682 = vmatpush.msra.mxu1 %v419_v47 }
 0x389   : > { %1660 = vmatpush.msra.mxu0 %v416_v17  ;;  %1683 = vmatpush.msra.mxu1 %v417_v24 }
 0x38b   : > { %1661 = vmatpush.msra.mxu0 %v414_v13  ;;  %1684 = vmatpush.msra.mxu1 %v415_v28 }
 0x38d   : > { %1662 = vmatpush.msra.mxu0 %v412_v18  ;;  %1685 = vmatpush.msra.mxu1 %v413_v48 }
 0x38f   : > { %1663 = vmatpush.msra.mxu0 %v410_v37  ;;  %1686 = vmatpush.msra.mxu1 %v411_v10 }
 0x391   : > { %1664 = vmatpush.msra.mxu0 %v408_v19  ;;  %1687 = vmatpush.msra.mxu1 %v409_v38 }
 0x393   : > { %1665 = vmatpush.msra.mxu0 %v406_v36  ;;  %1688 = vmatpush.msra.mxu1 %v407_v59 }
 0x3f9   : > { %v2815_v25 = vpop.f32.mrf.mxu0  ;;  %v1440_v60 = vpop.f32.mrf.mxu1 }
 0x3fa   : > { %1456 = vrot.lane.b32.xlu0 %v1440_v60, %s2048_s16  ;;  %1448 = vrot.lane.b32.xlu2 %v2815_v25, %s2050_s23 }
 0x401   : > { %v2820_v50 = vpop.f32.mrf.mxu0  ;;  %v1443_v51 = vpop.f32.mrf.mxu1 }
 0x402   : > { %1628 = vrot.lane.b32.xlu0 %v2795_v45, %s2049_s17  ;;  %1458 = vrot.lane.b32.xlu2 %v1443_v51, %s2048_s16 }
 0x403   : > { %1450 = vrot.lane.b32.xlu1 %v2820_v50, %s2050_s23 }
 0x40a   : > { %1636 = vrot.lane.b32.xlu0 %v1443_v51, %s2050_s23  ;;  %1630 = vrot.lane.b32.xlu2 %v2784_v5, %s2049_s17 }
 0x40b   : > { %1634 = vrot.lane.b32.xlu1 %v1440_v60, %s2050_s23 }
 0x454   : > { %v1449_v14 = vpop.permute.xlu2 %1448 }
 0x455   : > { %v1462_v33 = vsel %vm545_vm6, %v2795_v45, %v1449_v14 }
 0x45c   : > { %v1459_v51 = vpop.permute.xlu2 %1458 }
 0x464   : > { %v1631_v3 = vpop.permute.xlu2 %1630 }
 0x46c   : > { %v1457_v39 = vpop.permute.xlu0 %1456 }
 0x46d   : > { %v1464_v23 = vsel %vm548_vm7, %v1462_v33, %v1457_v39 }
 0x46e   : > { %1941 = vmatmul.msk.f32.vlgmr.msra.gmra.mxu2 %vm715_vm8, %v1464_v23  ;;  %1943 = vmatmul.msk.f32.vlgmr.msra.gmra.mxu3 %vm715_vm8, %v1464_v23 }
 0x474   : > { %v1629_v43 = vpop.permute.xlu0 %1628 }
 0x475   : > { %v1451_v60 = vpop.permute.xlu1 %1450  ;;  %v1640_v45 = vsel %vm545_vm6, %v1629_v43, %v2815_v25 }
 0x476   : > { %v1463_v34 = vsel %vm545_vm6, %v2784_v5, %v1451_v60  ;;  %v1641_v5 = vsel %vm545_vm6, %v1631_v3, %v2820_v50 }
 0x477   : > { %v1465_v27 = vsel %vm548_vm7, %v1463_v34, %v1459_v51 }
 0x478   : > { %1942 = vmatmul.msk.f32.gmra.mxu2 %vm715_vm8, %v1465_v27  ;;  %1944 = vmatmul.msk.f32.gmra.mxu3 %vm715_vm8, %v1465_v27 }
 0x47c   : > { %v1637_v2 = vpop.permute.xlu0 %1636 }
 0x47d   : > { %v1635_v32 = vpop.permute.xlu1 %1634  ;;  %v1643_v15 = vsel %vm548_vm7, %v1641_v5, %v1637_v2 }
 0x47e   : > { %v1642_v52 = vsel %vm548_vm7, %v1640_v45, %v1635_v32 }
 0x47f   : > { %1945 = vmatmul.msk.f32.vlgmr.msra.gmra.mxu0 %vm715_vm8, %v1642_v52  ;;  %1947 = vmatmul.msk.f32.vlgmr.msra.gmra.mxu1 %vm715_vm8, %v1642_v52 }
 0x487   : > { %1946 = vmatmul.msk.f32.gmra.mxu0 %vm715_vm8, %v1643_v15  ;;  %1948 = vmatmul.msk.f32.gmra.mxu1 %vm715_vm8, %v1643_v15 }
 0x4f1   : > { %v1489_v7 = vpop.f32.mrf.mxu2  ;;  %v1512_v50 = vpop.f32.mrf.mxu3 }
 0x4f2   : > { %v2924_v25 = vadd.f32 %v1489_v7, %v2612_v22  ;;  %v2936_v17 = vadd.f32 %v1512_v50, %v2610_v21 }
 0x4f4   : > { %v1548_v46 = vmul.f32 %v2924_v25, %v2638_v62  ;;  %v1536_v0 = vmul.f32 %v2924_v25, %v2730_v11  ;;  %v1524_v47 = vmul.f32 %v2924_v25, %v2636_v61  ;;  %v1576_v13 = vmul.f32 %v2936_v17, %v2737_v20 }
 0x4f5   : > { %v1564_v28 = vmul.f32 %v2936_v17, %v2672_v42  ;;  %v1588_v36 = vmul.f32 %v2936_v17, %v2683_v35  ;;  %v1560_v52 = vmul.f32 %v2936_v17, %v2722_v58 }
 0x4f6   : > { %1552 = vrot.lane.b32.xlu2 %v1548_v46, %s2050_s23  ;;  %1540 = vrot.lane.b32.xlu0 %v1536_v0, %s2048_s16  ;;  %v432_v0 = vld [vmem:[%s3080_s8] sm:$0xff] }
 0x4f7   : > { %1528 = vrot.lane.b32.xlu1 %v1524_v47, %s2049_s17 }
 0x4fb   : > { %v1492_v22 = vpop.f32.mrf.mxu2  ;;  %v1515_v48 = vpop.f32.mrf.mxu3 }
 0x4fc   : > { %v2939_v24 = vadd.f32 %v1492_v22, %v2616_v30  ;;  %v2951_v21 = vadd.f32 %v1515_v48, %v2614_v26  ;;  %v1667_v37 = vpop.f32.mrf.mxu0  ;;  %v1690_v23 = vpop.f32.mrf.mxu1 }
 0x4fd   : > { %v2971_v14 = vadd.f32 %v1667_v37, %v2655_v16 }
 0x4fe   : > { %1580 = vrot.lane.b32.xlu0 %v1576_v13, %s2048_s16  ;;  %v1525_v18 = vmul.f32 %v2939_v24, %v2628_v54  ;;  %v1549_v30 = vmul.f32 %v2939_v24, %v2646_v12  ;;  %v1537_v10 = vmul.f32 %v2939_v24, %v2724_v63  ;;  %v1565_v19 = vmul.f32 %v2951_v21, %v2681_v31 }
 0x4ff   : > { %1568 = vrot.lane.b32.xlu1 %v1564_v28, %s2049_s17  ;;  %v1589_v26 = vmul.f32 %v2951_v21, %v2693_v49  ;;  %v1577_v38 = vmul.f32 %v2951_v21, %v2728_v8  ;;  %v1714_v39 = vmul.f32 %v2971_v14, %v2730_v11  ;;  %v1702_v60 = vmul.f32 %v2971_v14, %v2636_v61 }
 0x500   : > { %1530 = vrot.lane.b32.xlu2 %v1525_v18, %s2049_s17  ;;  %v1726_v61 = vmul.f32 %v2971_v14, %v2638_v62  ;;  %v1561_v48 = vmul.f32 %v2951_v21, %v2718_v56  ;;  %v1700_v21 = vmul.f32 %v2971_v14, %v2712_v53 }
 0x504   : > { %v1670_v59 = vpop.f32.mrf.mxu0  ;;  %v1693_v11 = vpop.f32.mrf.mxu1 }
 0x505   : > { %v2975_v33 = vadd.f32 %v1670_v59, %v2665_v40  ;;  %v2999_v34 = vadd.f32 %v1693_v11, %v2667_v41 }
 0x506   : > { %1554 = vrot.lane.b32.xlu0 %v1549_v30, %s2050_s23 }
 0x507   : > { %1542 = vrot.lane.b32.xlu1 %v1537_v10, %s2048_s16  ;;  %v1703_v51 = vmul.f32 %v2975_v33, %v2628_v54  ;;  %v1727_v16 = vmul.f32 %v2975_v33, %v2646_v12  ;;  %v1715_v40 = vmul.f32 %v2975_v33, %v2724_v63  ;;  %v2995_v54 = vadd.f32 %v1690_v23, %v2657_v29 }
 0x508   : > { %1570 = vrot.lane.b32.xlu2 %v1565_v19, %s2049_s17  ;;  %v1743_v62 = vmul.f32 %v2999_v34, %v2681_v31  ;;  %v1767_v29 = vmul.f32 %v2999_v34, %v2693_v49  ;;  %v1755_v41 = vmul.f32 %v2999_v34, %v2728_v8  ;;  %v1522_v8 = vmul.f32 %v2924_v25, %v2712_v53 }
 0x509   : > { %v1754_v12 = vmul.f32 %v2995_v54, %v2737_v20  ;;  %v1742_v63 = vmul.f32 %v2995_v54, %v2672_v42  ;;  %v1766_v42 = vmul.f32 %v2995_v54, %v2683_v35  ;;  %v1523_v25 = vmul.f32 %v2939_v24, %v2720_v55 }
 0x50a   : > { %v1701_v11 = vmul.f32 %v2975_v33, %v2720_v55 }
 0x50e   : > { %1594 = vrot.lane.b32.xlu0 %v1589_v26, %s2050_s23 }
 0x50f   : > { %1582 = vrot.lane.b32.xlu1 %v1577_v38, %s2048_s16 }
 0x510   : > { %1592 = vrot.lane.b32.xlu2 %v1588_v36, %s2050_s23  ;;  %v433_v36 = vld [vmem:[%s3080_s8 + $0x8] sm:$0xff] }
 0x516   : > { %1718 = vrot.lane.b32.xlu0 %v1714_v39, %s2048_s16 }
 0x517   : > { %1706 = vrot.lane.b32.xlu1 %v1702_v60, %s2049_s17 }
 0x518   : > { %1708 = vrot.lane.b32.xlu2 %v1703_v51, %s2049_s17 }
 0x51e   : > { %1732 = vrot.lane.b32.xlu0 %v1727_v16, %s2050_s23 }
 0x51f   : > { %1720 = vrot.lane.b32.xlu1 %v1715_v40, %s2048_s16 }
 0x520   : > { %1730 = vrot.lane.b32.xlu2 %v1726_v61, %s2050_s23 }
 0x526   : > { %1758 = vrot.lane.b32.xlu0 %v1754_v12, %s2048_s16  ;;  %v1738_v12 = vmul.f32 %v2995_v54, %v2722_v58 }
 0x527   : > { %1746 = vrot.lane.b32.xlu1 %v1742_v63, %s2049_s17 }
 0x528   : > { %1748 = vrot.lane.b32.xlu2 %v1743_v62, %s2049_s17 }
 0x52e   : > { %1772 = vrot.lane.b32.xlu0 %v1767_v29, %s2050_s23 }
 0x52f   : > { %1760 = vrot.lane.b32.xlu1 %v1755_v41, %s2048_s16 }
 0x530   : > { %1770 = vrot.lane.b32.xlu2 %v1766_v42, %s2050_s23 }
 0x537   : > { %1604 = vrot.lane.b32.xlu1 %v2790_v57, %s2050_s23 }
 0x538   : > { %1606 = vrot.lane.b32.xlu2 %v2779_v6, %s2050_s23 }
 0x550   : > { %v1553_v31 = vpop.permute.xlu2 %1552 }
 0x55a   : > { %v1531_v49 = vpop.permute.xlu2 %1530 }
 0x55b   : > { %v1535_v50 = vadd.f32 %v1531_v49, %v1523_v25  ;;  %v1739_v49 = vmul.f32 %v2999_v34, %v2718_v56 }
 0x562   : > { %v1571_v45 = vpop.permute.xlu2 %1570 }
 0x568   : > { %v1541_v20 = vpop.permute.xlu0 %1540 }
 0x569   : > { %v1529_v27 = vpop.permute.xlu1 %1528 }
 0x56a   : > { %v1534_v43 = vadd.f32 %v1529_v27, %v1522_v8  ;;  %v1593_v46 = vpop.permute.xlu2 %1592 }
 0x56c   : > { %v1546_v35 = vadd.f32 %v1541_v20, %v1534_v43 }
 0x56e   : > { %v1558_v32 = vadd.f32 %v1553_v31, %v1546_v35 }
 0x570   : > { %v1581_v3 = vpop.permute.xlu0 %1580  ;;  %v1562_v2 = vadd.f32 %v1560_v52, %v1558_v32 }
 0x571   : > { %v1569_v5 = vpop.permute.xlu1 %1568 }
 0x572   : > { %v1574_v15 = vadd.f32 %v1569_v5, %v1562_v2  ;;  %v1709_v37 = vpop.permute.xlu2 %1708 }
 0x573   : > { %v1713_v62 = vadd.f32 %v1709_v37, %v1701_v11  ;;  %v1783_v37 = vmul.f32 %v2779_v6, %v2768_v9 }
 0x574   : > { %v1586_v7 = vadd.f32 %v1581_v3, %v1574_v15  ;;  %v1612_v15 = vsub.f32 1.0, %v2788_v4 }
 0x576   : > { %v1598_v47 = vadd.f32 %v1593_v46, %v1586_v7 }
 0x578   : > { %v1600_v22 = vadd.f32 %v1598_v47, %v432_v0  ;;  %v1555_v13 = vpop.permute.xlu0 %1554 }
 0x579   : > { %v1543_v28 = vpop.permute.xlu1 %1542 }
 0x57a   : > { %2011 = vtanh.f32 %v1600_v22  ;;  %v1547_v17 = vadd.f32 %v1543_v28, %v1535_v50  ;;  %v1731_v60 = vpop.permute.xlu2 %1730  ;;  %v1613_v50 = vsub.f32 1.0, %v2777_v1 }
 0x57c   : > { %v1559_v18 = vadd.f32 %v1555_v13, %v1547_v17 }
 0x57e   : > { %v1563_v30 = vadd.f32 %v1561_v48, %v1559_v18 }
 0x580   : > { %v2012_v10 = vpop.eup %2011  ;;  %v1595_v19 = vpop.permute.xlu0 %1594  ;;  %v1575_v26 = vadd.f32 %v1571_v45, %v1563_v30 }
 0x581   : > { %v1583_v38 = vpop.permute.xlu1 %1582  ;;  %1616 = vrot.lane.b32.xlu0 %v2012_v10, %s2050_s23 }
 0x582   : > { %v1587_v24 = vadd.f32 %v1583_v38, %v1575_v26  ;;  %v1749_v53 = vpop.permute.xlu2 %1748 }
 0x584   : > { %v1599_v59 = vadd.f32 %v1595_v19, %v1587_v24  ;;  %v1782_v24 = vmul.f32 %v2790_v57, %v2773_v44 }
 0x586   : > { %v1601_v39 = vadd.f32 %v1599_v59, %v433_v36 }
 0x588   : > { %2013 = vtanh.f32 %v1601_v39  ;;  %v1719_v23 = vpop.permute.xlu0 %1718 }
 0x589   : > { %v1707_v51 = vpop.permute.xlu1 %1706 }
 0x58a   : > { %v1712_v16 = vadd.f32 %v1707_v51, %v1700_v21  ;;  %v1771_v43 = vpop.permute.xlu2 %1770 }
 0x58c   : > { %v1724_v40 = vadd.f32 %v1719_v23, %v1712_v16 }
 0x58e   : > { %v2014_v61 = vpop.eup %2013  ;;  %v1736_v63 = vadd.f32 %v1731_v60, %v1724_v40 }
 0x58f   : > { %1618 = vrot.lane.b32.xlu1 %v2014_v61, %s2050_s23 }
 0x590   : > { %v1733_v29 = vpop.permute.xlu0 %1732  ;;  %v1740_v41 = vadd.f32 %v1738_v12, %v1736_v63 }
 0x591   : > { %v1721_v42 = vpop.permute.xlu1 %1720 }
 0x592   : > { %v1725_v31 = vadd.f32 %v1721_v42, %v1713_v62  ;;  %v1607_v47 = vpop.permute.xlu2 %1606 }
 0x593   : > { %v1611_v13 = vmul.f32 %v1607_v47, %v2777_v1  ;;  %v1784_v1 = vsub.f32 1.0, %v2773_v44 }
 0x594   : > { %v1737_v14 = vadd.f32 %v1733_v29, %v1725_v31 }
 0x596   : > { %v1741_v20 = vadd.f32 %v1739_v49, %v1737_v14 }
 0x598   : > { %v1759_v8 = vpop.permute.xlu0 %1758  ;;  %v1753_v45 = vadd.f32 %v1749_v53, %v1741_v20 }
 0x599   : > { %v1747_v27 = vpop.permute.xlu1 %1746 }
 0x59a   : > { %v1752_v55 = vadd.f32 %v1747_v27, %v1740_v41 }
 0x59c   : > { %v1764_v33 = vadd.f32 %v1759_v8, %v1752_v55 }
 0x59e   : > { %v1776_v58 = vadd.f32 %v1771_v43, %v1764_v33 }
 0x5a0   : > { %v1778_v54 = vadd.f32 %v1776_v58, %v432_v0  ;;  %v1773_v52 = vpop.permute.xlu0 %1772 }
 0x5a1   : > { %v1761_v35 = vpop.permute.xlu1 %1760 }
 0x5a2   : > { %2015 = vtanh.f32 %v1778_v54  ;;  %v1765_v32 = vadd.f32 %v1761_v35, %v1753_v45 }
 0x5a4   : > { %v1777_v3 = vadd.f32 %v1773_v52, %v1765_v32 }
 0x5a6   : > { %v1779_v2 = vadd.f32 %v1777_v3, %v433_v36 }
 0x5a8   : > { %v2016_v5 = vpop.eup %2015  ;;  %2017 = vtanh.f32 %v1779_v2 }
 0x5a9   : > { %1788 = vrot.lane.b32.xlu2 %v2016_v5, %s2050_s23  ;;  %v1605_v34 = vpop.permute.xlu1 %1604 }
 0x5aa   : > { %v1610_v46 = vmul.f32 %v1605_v34, %v2788_v4  ;;  %v1785_v4 = vsub.f32 1.0, %v2768_v9 }
 0x5ae   : > { %v2018_v56 = vpop.eup %2017 }
 0x5af   : > { %1790 = vrot.lane.b32.xlu0 %v2018_v56, %s2050_s23 }
 0x5f3   : > { %v1617_v7 = vpop.permute.xlu0 %1616 }
 0x5f4   : > { %v1622_v0 = vmul.f32 %v1617_v7, %v1612_v15 }
 0x5f6   : > { %v1624_v25 = vadd.f32 %v1622_v0, %v1610_v46 }
 0x5f8   : > { %1800 = vrot.lane.b32.xlu1 %v1624_v25, %s2049_s17 }
 0x601   : > { %v1619_v22 = vpop.permute.xlu1 %1618 }
 0x602   : > { %v1623_v28 = vmul.f32 %v1619_v22, %v1613_v50 }
 0x603   : > { %v1789_v18 = vpop.permute.xlu2 %1788 }
 0x604   : > { %v1625_v17 = vadd.f32 %v1623_v28, %v1611_v13  ;;  %v1794_v38 = vmul.f32 %v1789_v18, %v1784_v1 }
 0x606   : > { %1802 = vrot.lane.b32.xlu2 %v1625_v17, %s2049_s17  ;;  %v1796_v36 = vadd.f32 %v1794_v38, %v1782_v24 }
 0x621   : > { %v1791_v48 = vpop.permute.xlu0 %1790 }
 0x622   : > { %v1795_v30 = vmul.f32 %v1791_v48, %v1785_v4 }
 0x624   : > { %v1797_v10 = vadd.f32 %v1795_v30, %v1783_v37 }
 0x660   : > { %v1803_v19 = vpop.permute.xlu2 %1802 }
 0x661   : > { %v1807_v26 = vsel %vm545_vm6, %v1803_v19, %v1797_v10 }
 0x662   : > { %1809 = vst.msk [vmem:[#allocation2 + $0x8] sm:$0xff] %vm548_vm7, %v1807_v26 }
 0x663   : > { %1811 = vst.msk [vmem:[%s2115_s18 + $0x8] sm:$0xff] %vm548_vm7, %v1807_v26 }
 0x66a   : > { %v1801_v59 = vpop.permute.xlu1 %1800 }
 0x66b   : > { %v1806_v39 = vsel %vm545_vm6, %v1801_v59, %v1796_v36 }
 0x66c   : > { %1808 = vst.msk [vmem:[#allocation2] sm:$0xff] %vm548_vm7, %v1806_v39 }
 0x66d   : > { %1810 = vst.msk [vmem:[%s2115_s18] sm:$0xff] %vm548_vm7, %v1806_v39 }
 0x66e PF: > { %s19_s30 = sadd.s32 1, %s2031_s30  }
 0x66f   : > { %p16_p5 = scmp.ge.s32.totalorder %s19_s30, 10  }
 0x671   :  { %18 = sbr.rel (!%p16_p5) target bundleno = 1 (0x1), region = 90 }

// kernel: avwdcrnn_forward.5
= control target key start
LH: loop header
LB: loop body
LE: loop exit
PB: predicated region body
PF: predicated region fallthrough
CT: control target
= control target key end

     0   :  { %s2114_s30 = smov 0   ;;  %s3643_s0 = inlined_call_operand.vmem [shape: f32[8,16,64], index: 0, kind: input, shape index: {}]   ;;  %s3644_s1 = inlined_call_operand.vmem [shape: f32[16,64], index: 1, kind: input, shape index: {}]   ;;  %s3645_s2 = inlined_call_operand.vmem [shape: f32[2,16,16], index: 2, kind: input, shape index: {}]   ;;  %s3646_s3 = inlined_call_operand.vmem [shape: f32[16,8], index: 3, kind: input, shape index: {}]   ;;  %s3647_s4 = inlined_call_operand.vmem [shape: f32[96,768], index: 4, kind: input, shape index: {}]   ;;  %s3648_s5 = inlined_call_operand.vmem [shape: f32[96,512], index: 5, kind: input, shape index: {}]   ;;  %s3649_s6 = inlined_call_operand.vmem [shape: f32[96,256], index: 6, kind: input, shape index: {}]   ;;  %s3650_s7 = inlined_call_operand.vmem [shape: f32[16,64], index: 7, kind: input, shape index: {}]   ;;  %s3651_s8 = inlined_call_operand.vmem [shape: f32[16,32], index: 8, kind: input, shape index: {}]   ;;  %s3652_s9 = inlined_call_operand.vmem [shape: f32[8,16,64], index: 9, kind: output, shape index: {}]  }
   0x1 LB: > { %s1905_s10 = sadd.s32 4294967295, %s2051_s30   ;;  %p1909_p0 = scmp.ge.s32.totalorder %s2051_s30, 1  ;;  %s2051_s30 = sphi %s2114_s30, %s19_s30  }
   0x2   : > { %p287_p1 = scmp.lt.s32.totalorder %s2051_s30, 9 }
   0x4   : > { %p288_p2 = pnand %p1909_p0, %p287_p1 }
   0x6   : > { %291 = sbr.rel (%p288_p2) target bundleno = 1684 (0x694), region = 56 }
   0xb   : > { %p323_p3 = scmp.lt.s32.totalorder %s1905_s10, 7  ;;  %p1914_p4 = scmp.ne.s32.totalorder %s1905_s10, 0 }
   0xd   : > { %s324_s11 = scalar_select %p323_p3, %s1905_s10, 7 }
   0xe   : > { %336 = sbr.rel (%p1914_p4) target bundleno = 22 (0x16), region = 60 }
   0xf   : > { %s1977_s12 = sshll.u32 %s324_s11, 4 }
  0x10   : > { %s327_s15 = scalar_lea.vmem %s3643_s0, %s1977_s12  ;;  %s2128_s18 = scalar_lea.vmem %s3652_s9, %s1977_s12 }
  0x13   : > { %v337_v0 = vld [vmem:[%s3644_s1] sm:$0xff]  ;;  %vm339_vm0 = vcmask 523264   ;;  %v338_v1 = vld [vmem:[%s3644_s1 + $0x8] sm:$0xff] }
  0x14   : > { %340 = vst.msk [vmem:[#allocation2] sm:$0xff] %vm339_vm0, %v337_v0 }
  0x15   : > { %341 = vst.msk [vmem:[#allocation2 + $0x8] sm:$0xff] %vm339_vm0, %v338_v1 }
  0x16 PF: > { %s2053_s23 = smov 64   ;;  %vm508_vm1 = vcmask 523264   ;;  %v343_v4 = vld [vmem:[%s327_s15 + $0x8] sm:$0xff]  ;;  %v342_v7 = vld [vmem:[%s327_s15] sm:$0xff]  ;;  %vm511_vm2 = vcmask 130048   ;;  %v348_v11 = vld [vmem:[%s3645_s2 + $0x10] sm:$0xff] }
  0x17   : > { %v346_v9 = vld [vmem:[%s3645_s2] sm:$0xff]  ;;  %v347_v12 = vld [vmem:[%s3645_s2 + $0x8] sm:$0xff]  ;;  %v349_v13 = vld [vmem:[%s3645_s2 + $0x18] sm:$0xff]  ;;  %s2054_s12 = smov 32   ;;  %s2055_s13 = smov 96   ;;  %vm586_vm3 = vcmask 261120  }
  0x18   : > { %v2191_v18 = vld [vmem:[%s3647_s4 + $0x210] sm:$0xff]  ;;  %v2196_v19 = vld [vmem:[%s3647_s4 + $0x218] sm:$0xff]  ;;  %v2201_v20 = vld [vmem:[%s3647_s4 + $0x220] sm:$0xff]  ;;  %vm609_vm4 = vcmask 785408  }
  0x19   : > { %620 = vmatpush.msra.mxu2 %v2191_v18  ;;  %643 = vmatpush.msra.mxu3 %v2196_v19  ;;  %v2208_v21 = vld [vmem:[%s3647_s4 + $0x228] sm:$0xff]  ;;  %v2213_v22 = vld [vmem:[%s3647_s4 + $0x1e0] sm:$0xff]  ;;  %v2225_v24 = vld [vmem:[%s3647_s4 + $0x1f0] sm:$0xff] }
  0x1a   : > { %v2218_v23 = vld [vmem:[%s3647_s4 + $0x1e8] sm:$0xff]  ;;  %v2230_v25 = vld [vmem:[%s3647_s4 + $0x1f8] sm:$0xff]  ;;  %v2235_v26 = vld [vmem:[%s3647_s4 + $0x1b0] sm:$0xff] }
  0x1b   : > { %v344_v3 = vld [vmem:[#allocation2] sm:$0xff]  ;;  %621 = vmatpush.msra.mxu2 %v2213_v22  ;;  %644 = vmatpush.msra.mxu3 %v2218_v23  ;;  %v2242_v27 = vld [vmem:[%s3647_s4 + $0x1b8] sm:$0xff]  ;;  %v2252_v29 = vld [vmem:[%s3647_s4 + $0x1c8] sm:$0xff] }
  0x1c   : > { %v345_v2 = vld [vmem:[#allocation2 + $0x8] sm:$0xff]  ;;  %v2247_v28 = vld [vmem:[%s3647_s4 + $0x1c0] sm:$0xff]  ;;  %v2273_v32 = vld [vmem:[%s3647_s4 + $0x190] sm:$0xff] }
  0x1d   : > { %504 = vrot.lane.b32.xlu0 %v345_v2, %s2053_s23  ;;  %622 = vmatpush.msra.mxu2 %v2235_v26  ;;  %v2261_v30 = vld [vmem:[%s3647_s4 + $0x180] sm:$0xff]  ;;  %v2268_v31 = vld [vmem:[%s3647_s4 + $0x188] sm:$0xff]  ;;  %v2282_v33 = vld [vmem:[%s3647_s4 + $0x198] sm:$0xff] }
  0x1e   : > { %645 = vmatpush.msra.mxu3 %v2242_v27  ;;  %v2287_v34 = vld [vmem:[%s3647_s4 + $0x150] sm:$0xff]  ;;  %v2295_v35 = vld [vmem:[%s3647_s4 + $0x158] sm:$0xff]  ;;  %v2300_v36 = vld [vmem:[%s3647_s4 + $0x160] sm:$0xff] }
  0x1f   : > { %623 = vmatpush.msra.mxu2 %v2261_v30  ;;  %v2307_v37 = vld [vmem:[%s3647_s4 + $0x168] sm:$0xff]  ;;  %v2312_v38 = vld [vmem:[%s3647_s4 + $0x120] sm:$0xff]  ;;  %v2324_v40 = vld [vmem:[%s3647_s4 + $0x130] sm:$0xff] }
  0x20   : > { %646 = vmatpush.msra.mxu3 %v2268_v31  ;;  %v2319_v39 = vld [vmem:[%s3647_s4 + $0x128] sm:$0xff]  ;;  %v2331_v41 = vld [vmem:[%s3647_s4 + $0x138] sm:$0xff]  ;;  %v2336_v42 = vld [vmem:[%s3647_s4 + $0xf0] sm:$0xff] }
  0x21   : > { %624 = vmatpush.msra.mxu2 %v2287_v34  ;;  %v2345_v43 = vld [vmem:[%s3647_s4 + $0xf8] sm:$0xff]  ;;  %v2352_v44 = vld [vmem:[%s3647_s4 + $0x100] sm:$0xff]  ;;  %v2357_v45 = vld [vmem:[%s3647_s4 + $0x108] sm:$0xff] }
  0x22   : > { %647 = vmatpush.msra.mxu3 %v2295_v35  ;;  %v2366_v46 = vld [vmem:[%s3647_s4 + $0xc0] sm:$0xff]  ;;  %v2371_v47 = vld [vmem:[%s3647_s4 + $0xc8] sm:$0xff]  ;;  %v2379_v48 = vld [vmem:[%s3647_s4 + $0xd0] sm:$0xff] }
  0x23   : > { %625 = vmatpush.msra.mxu2 %v2312_v38  ;;  %3708 = vst [vmem:[#allocation4_spill] sm:$0xff] %v2379_v48  ;;  %v2384_v49 = vld [vmem:[%s3647_s4 + $0xd8] sm:$0xff]  ;;  %v2391_v50 = vld [vmem:[%s3647_s4 + $0x90] sm:$0xff]  ;;  %v2403_v52 = vld [vmem:[%s3647_s4 + $0xa0] sm:$0xff] }
  0x24   : > { %648 = vmatpush.msra.mxu3 %v2319_v39  ;;  %3709 = vst [vmem:[#allocation5_spill] sm:$0xff] %v2384_v49  ;;  %v2396_v51 = vld [vmem:[%s3647_s4 + $0x98] sm:$0xff]  ;;  %v2408_v53 = vld [vmem:[%s3647_s4 + $0xa8] sm:$0xff]  ;;  %v2415_v54 = vld [vmem:[%s3647_s4 + $0x60] sm:$0xff] }
  0x25   : > { %502 = vrot.lane.b32.xlu0 %v344_v3, %s2053_s23  ;;  %626 = vmatpush.msra.mxu2 %v2336_v42  ;;  %3710 = vst [vmem:[#allocation6_spill] sm:$0xff] %v2403_v52  ;;  %v2420_v55 = vld [vmem:[%s3647_s4 + $0x68] sm:$0xff]  ;;  %v2427_v56 = vld [vmem:[%s3647_s4 + $0x70] sm:$0xff]  ;;  %v2434_v57 = vld [vmem:[%s3647_s4 + $0x78] sm:$0xff] }
  0x26   : > { %649 = vmatpush.msra.mxu3 %v2345_v43  ;;  %3711 = vst [vmem:[#allocation7_spill] sm:$0xff] %v2408_v53  ;;  %v2441_v58 = vld [vmem:[%s3647_s4 + $0x30] sm:$0xff]  ;;  %v2446_v59 = vld [vmem:[%s3647_s4 + $0x38] sm:$0xff]  ;;  %v2454_v60 = vld [vmem:[%s3647_s4 + $0x40] sm:$0xff] }
  0x27   : > { %627 = vmatpush.msra.mxu2 %v2366_v46  ;;  %3712 = vst [vmem:[#allocation8_spill] sm:$0xff] %v2427_v56  ;;  %v2459_v61 = vld [vmem:[%s3647_s4 + $0x48] sm:$0xff]  ;;  %v2475_v62 = vld [vmem:[%s3647_s4] sm:$0xff]  ;;  %v2485_v0 = vld [vmem:[%s3647_s4 + $0x10] sm:$0xff] }
  0x28   : > { %650 = vmatpush.msra.mxu3 %v2371_v47  ;;  %3713 = vst [vmem:[#allocation9_spill] sm:$0xff] %v2434_v57  ;;  %v2480_v63 = vld [vmem:[%s3647_s4 + $0x8] sm:$0xff]  ;;  %v2492_v1 = vld [vmem:[%s3647_s4 + $0x18] sm:$0xff]  ;;  %v2497_v2 = vld [vmem:[%s3647_s4 + $0x230] sm:$0xff] }
  0x29   : > { %628 = vmatpush.msra.mxu2 %v2391_v50  ;;  %3714 = vst [vmem:[#allocation10_spill] sm:$0xff] %v2454_v60  ;;  %v2502_v3 = vld [vmem:[%s3647_s4 + $0x238] sm:$0xff] }
  0x2a   : > { %651 = vmatpush.msra.mxu3 %v2396_v51  ;;  %3715 = vst [vmem:[#allocation11_spill] sm:$0xff] %v2459_v61 }
  0x2b   : > { %629 = vmatpush.msra.mxu2 %v2415_v54  ;;  %3716 = vst [vmem:[#allocation12_spill] sm:$0xff] %v2485_v0 }
  0x2c   : > { %652 = vmatpush.msra.mxu3 %v2420_v55  ;;  %3717 = vst [vmem:[#allocation13_spill] sm:$0xff] %v2492_v1 }
  0x2d   : > { %630 = vmatpush.msra.mxu2 %v2441_v58 }
  0x2e   : > { %653 = vmatpush.msra.mxu3 %v2446_v59 }
  0x2f   : > { %631 = vmatpush.msra.mxu2 %v2475_v62 }
  0x30   : > { %654 = vmatpush.msra.mxu3 %v2480_v63 }
  0x31   : > { %712 = vmatpush.msrb.mxu2 %v2497_v2 }
  0x32   : > { %735 = vmatpush.msrb.mxu3 %v2502_v3 }
  0x8f   : > { %v505_v5 = vpop.permute.xlu0 %504 }
  0x90   : > { %v2139_v6 = vsel %vm508_vm1, %v343_v4, %v505_v5  ;;  %v2509_v4 = vld [vmem:[%s3648_s5 + $0x160] sm:$0xff]  ;;  %v2514_v5 = vld [vmem:[%s3648_s5 + $0x168] sm:$0xff] }
  0x91   : > { %532 = vmatpush.msra.mxu0 %v2139_v6  ;;  %561 = vmatpush.msra.mxu1 %v2139_v6  ;;  %3718 = vst [vmem:[#allocation14_spill] sm:$0xff] %v2509_v4 }
  0x92   : > { %3719 = vst [vmem:[#allocation15_spill] sm:$0xff] %v2514_v5 }
  0x97   : > { %v503_v8 = vpop.permute.xlu0 %502 }
  0x98   : > { %v2147_v10 = vsel %vm508_vm1, %v342_v7, %v503_v8  ;;  %v2519_v7 = vld [vmem:[%s3647_s4 + $0x200] sm:$0xff]  ;;  %v2526_v8 = vld [vmem:[%s3647_s4 + $0x208] sm:$0xff] }
  0x99   : > { %593 = vrot.lane.b32.xlu0 %v2147_v10, %s2053_s23  ;;  %533 = vmatpush.msra.mxu0 %v2147_v10 }
  0x9a   : > { %562 = vmatpush.msra.mxu1 %v2147_v10  ;;  %1915 = vmatmul.msk.f32.vlgmr.msra.gmra.mxu0 %vm511_vm2, %v346_v9  ;;  %v2531_v9 = vld [vmem:[%s3648_s5 + $0x140] sm:$0xff] }
  0x9b   : > { %1917 = vmatmul.msk.f32.vlgmr.msra.gmra.mxu1 %vm511_vm2, %v348_v11  ;;  %666 = vmatpush.msrb.mxu0 %v2201_v20  ;;  %3720 = vst [vmem:[#allocation16_spill] sm:$0xff] %v2531_v9  ;;  %v2536_v11 = vld [vmem:[%s3648_s5 + $0x148] sm:$0xff] }
  0x9c   : > { %689 = vmatpush.msrb.mxu1 %v2208_v21  ;;  %3721 = vst [vmem:[#allocation17_spill] sm:$0xff] %v2536_v11  ;;  %713 = vmatpush.msrb.mxu2 %v2519_v7 }
  0x9d   : > { %667 = vmatpush.msrb.mxu0 %v2225_v24  ;;  %736 = vmatpush.msrb.mxu3 %v2526_v8 }
  0x9e   : > { %690 = vmatpush.msrb.mxu1 %v2230_v25 }
  0x9f   : > { %668 = vmatpush.msrb.mxu0 %v2247_v28 }
  0xa0   : > { %691 = vmatpush.msrb.mxu1 %v2252_v29 }
  0xa1   : > { %669 = vmatpush.msrb.mxu0 %v2273_v32 }
  0xa2   : > { %1916 = vmatmul.msk.f32.gmra.mxu0 %vm511_vm2, %v347_v12  ;;  %692 = vmatpush.msrb.mxu1 %v2282_v33  ;;  %v2543_v12 = vld [vmem:[%s3647_s4 + $0x1d0] sm:$0xff] }
  0xa3   : > { %1918 = vmatmul.msk.f32.gmra.mxu1 %vm511_vm2, %v349_v13  ;;  %670 = vmatpush.msrb.mxu0 %v2300_v36  ;;  %v2548_v13 = vld [vmem:[%s3647_s4 + $0x1d8] sm:$0xff] }
  0xa4   : > { %693 = vmatpush.msrb.mxu1 %v2307_v37  ;;  %714 = vmatpush.msrb.mxu2 %v2543_v12 }
  0xa5   : > { %671 = vmatpush.msrb.mxu0 %v2324_v40  ;;  %737 = vmatpush.msrb.mxu3 %v2548_v13 }
  0xa6   : > { %694 = vmatpush.msrb.mxu1 %v2331_v41 }
  0xa7   : > { %672 = vmatpush.msrb.mxu0 %v2352_v44 }
  0xa8   : > { %695 = vmatpush.msrb.mxu1 %v2357_v45 }
  0xa9   : > { %673 = vmatpush.msrb.mxu0 %v2379_v48  ;;  %v2687_v48 = vld [vmem:[%s3647_s4 + $0xb0] sm:$0xff] }
  0xaa   : > { %696 = vmatpush.msrb.mxu1 %v2384_v49  ;;  %v2670_v49 = vld [vmem:[%s3647_s4 + $0xe8] sm:$0xff]  ;;  %3738 = vst [vmem:[#allocation34_spill] sm:$0xff] %v2687_v48 }
  0xab   : > { %674 = vmatpush.msrb.mxu0 %v2403_v52  ;;  %v2665_v52 = vld [vmem:[%s3647_s4 + $0xe0] sm:$0xff]  ;;  %3735 = vst [vmem:[#allocation31_spill] sm:$0xff] %v2670_v49 }
  0xac   : > { %697 = vmatpush.msrb.mxu1 %v2408_v53  ;;  %v2644_v53 = vld [vmem:[%s3647_s4 + $0x118] sm:$0xff]  ;;  %3734 = vst [vmem:[#allocation30_spill] sm:$0xff] %v2665_v52 }
  0xad   : > { %675 = vmatpush.msrb.mxu0 %v2427_v56  ;;  %v2620_v56 = vld [vmem:[%s3647_s4 + $0x148] sm:$0xff]  ;;  %3731 = vst [vmem:[#allocation27_spill] sm:$0xff] %v2644_v53 }
  0xae   : > { %698 = vmatpush.msrb.mxu1 %v2434_v57  ;;  %v2615_v57 = vld [vmem:[%s3647_s4 + $0x140] sm:$0xff] }
  0xaf   : > { %676 = vmatpush.msrb.mxu0 %v2454_v60  ;;  %v2596_v60 = vld [vmem:[%s3647_s4 + $0x178] sm:$0xff] }
  0xb0   : > { %699 = vmatpush.msrb.mxu1 %v2459_v61  ;;  %v2591_v61 = vld [vmem:[%s3647_s4 + $0x170] sm:$0xff] }
  0xb1   : > { %677 = vmatpush.msrb.mxu0 %v2485_v0  ;;  %v2574_v0 = vld [vmem:[%s3647_s4 + $0x1a8] sm:$0xff] }
  0xb2   : > { %700 = vmatpush.msrb.mxu1 %v2492_v1  ;;  %v2569_v1 = vld [vmem:[%s3647_s4 + $0x1a0] sm:$0xff]  ;;  %738 = vmatpush.msrb.mxu3 %v2574_v0 }
  0xb3   : > { %764 = vmatpush.msra.mxu0 %v2509_v4  ;;  %v2555_v4 = vld [vmem:[%s3648_s5 + $0x120] sm:$0xff]  ;;  %715 = vmatpush.msrb.mxu2 %v2569_v1 }
  0xb4   : > { %787 = vmatpush.msra.mxu1 %v2514_v5  ;;  %3722 = vst [vmem:[#allocation18_spill] sm:$0xff] %v2555_v4  ;;  %v2560_v5 = vld [vmem:[%s3648_s5 + $0x128] sm:$0xff]  ;;  %739 = vmatpush.msrb.mxu3 %v2596_v60 }
  0xb5   : > { %3723 = vst [vmem:[#allocation19_spill] sm:$0xff] %v2560_v5  ;;  %765 = vmatpush.msra.mxu0 %v2531_v9  ;;  %v2579_v9 = vld [vmem:[%s3648_s5 + $0x100] sm:$0xff]  ;;  %716 = vmatpush.msrb.mxu2 %v2591_v61 }
  0xb6   : > { %788 = vmatpush.msra.mxu1 %v2536_v11  ;;  %3724 = vst [vmem:[#allocation20_spill] sm:$0xff] %v2579_v9  ;;  %v2586_v11 = vld [vmem:[%s3648_s5 + $0x108] sm:$0xff]  ;;  %740 = vmatpush.msrb.mxu3 %v2620_v56 }
  0xb7   : > { %766 = vmatpush.msra.mxu0 %v2555_v4  ;;  %3725 = vst [vmem:[#allocation21_spill] sm:$0xff] %v2586_v11  ;;  %v2608_v4 = vld [vmem:[%s3648_s5 + $0xe8] sm:$0xff]  ;;  %717 = vmatpush.msrb.mxu2 %v2615_v57 }
  0xb8   : > { %789 = vmatpush.msra.mxu1 %v2560_v5  ;;  %v2603_v5 = vld [vmem:[%s3648_s5 + $0xe0] sm:$0xff]  ;;  %3727 = vst [vmem:[#allocation23_spill] sm:$0xff] %v2608_v4  ;;  %741 = vmatpush.msrb.mxu3 %v2644_v53  ;;  %v3683_v53 = vmov 3  }
  0xb9   : > { %3726 = vst [vmem:[#allocation22_spill] sm:$0xff] %v2603_v5  ;;  %767 = vmatpush.msra.mxu0 %v2579_v9  ;;  %v2627_v9 = vld [vmem:[%s3648_s5 + $0xc0] sm:$0xff]  ;;  %2000 = vset.pattern.permute.xlu1 %v3683_v53 }
  0xba   : > { %790 = vmatpush.msra.mxu1 %v2586_v11  ;;  %3728 = vst [vmem:[#allocation24_spill] sm:$0xff] %v2627_v9  ;;  %v2632_v11 = vld [vmem:[%s3648_s5 + $0xc8] sm:$0xff]  ;;  %742 = vmatpush.msrb.mxu3 %v2670_v49  ;;  %v2730_v53 = vld [vmem:[%s3648_s5 + $0x40] sm:$0xff] }
  0xbb   : > { %3729 = vst [vmem:[#allocation25_spill] sm:$0xff] %v2632_v11  ;;  %768 = vmatpush.msra.mxu0 %v2603_v5  ;;  %v2651_v5 = vld [vmem:[%s3648_s5 + $0xa0] sm:$0xff]  ;;  %v2711_v49 = vld [vmem:[%s3646_s3 + $0x8] sm:$0xff] }
  0xbc   : > { %791 = vmatpush.msra.mxu1 %v2608_v4  ;;  %3732 = vst [vmem:[#allocation28_spill] sm:$0xff] %v2651_v5  ;;  %v2656_v4 = vld [vmem:[%s3648_s5 + $0xa8] sm:$0xff] }
  0xbd   : > { %3733 = vst [vmem:[#allocation29_spill] sm:$0xff] %v2656_v4  ;;  %769 = vmatpush.msra.mxu0 %v2627_v9  ;;  %v2675_v9 = vld [vmem:[%s3648_s5 + $0x80] sm:$0xff] }
  0xbe   : > { %792 = vmatpush.msra.mxu1 %v2632_v11  ;;  %3736 = vst [vmem:[#allocation32_spill] sm:$0xff] %v2675_v9  ;;  %v2682_v11 = vld [vmem:[%s3648_s5 + $0x88] sm:$0xff] }
  0xbf   : > { %770 = vmatpush.msra.mxu0 %v2651_v5  ;;  %3737 = vst [vmem:[#allocation33_spill] sm:$0xff] %v2682_v11  ;;  %v2694_v5 = vld [vmem:[%s3647_s4 + $0xb8] sm:$0xff] }
  0xc0   : > { %793 = vmatpush.msra.mxu1 %v2656_v4  ;;  %3739 = vst [vmem:[#allocation35_spill] sm:$0xff] %v2694_v5  ;;  %v2699_v4 = vld [vmem:[%s3648_s5 + $0x60] sm:$0xff]  ;;  %743 = vmatpush.msrb.mxu3 %v2694_v5  ;;  %v2742_v5 = vld [vmem:[%s3647_s4 + $0x50] sm:$0xff] }
  0xc1   : > { %3740 = vst [vmem:[#allocation36_spill] sm:$0xff] %v2699_v4  ;;  %771 = vmatpush.msra.mxu0 %v2675_v9  ;;  %v2718_v9 = vld [vmem:[%s3647_s4 + $0x80] sm:$0xff] }
  0xc2   : > { %794 = vmatpush.msra.mxu1 %v2682_v11  ;;  %3742 = vst [vmem:[#allocation38_spill] sm:$0xff] %v2718_v9  ;;  %v2723_v11 = vld [vmem:[%s3647_s4 + $0x88] sm:$0xff] }
  0xc3   : > { %3743 = vst [vmem:[#allocation39_spill] sm:$0xff] %v2723_v11  ;;  %772 = vmatpush.msra.mxu0 %v2699_v4  ;;  %v2747_v4 = vld [vmem:[%s3647_s4 + $0x58] sm:$0xff]  ;;  %744 = vmatpush.msrb.mxu3 %v2723_v11  ;;  %v2771_v11 = vld [vmem:[%s3647_s4 + $0x28] sm:$0xff] }
  0xc4   : > { %3744 = vst [vmem:[#allocation40_spill] sm:$0xff] %v2730_v53 }
  0xc5   : > { %3746 = vst [vmem:[#allocation42_spill] sm:$0xff] %v2742_v5  ;;  %773 = vmatpush.msra.mxu0 %v2730_v53  ;;  %745 = vmatpush.msrb.mxu3 %v2747_v4  ;;  %v2778_v53 = vld [vmem:[%s3648_s5] sm:$0xff] }
  0xc6   : > { %3747 = vst [vmem:[#allocation43_spill] sm:$0xff] %v2747_v4  ;;  %v3699_v4 = vmov 5  }
  0xc7   : > { %3751 = vst [vmem:[#allocation47_spill] sm:$0xff] %v2771_v11  ;;  %746 = vmatpush.msrb.mxu3 %v2771_v11  ;;  %v3704_v11 = vmov 0  }
  0xc8   : > { %3752 = vst [vmem:[#allocation48_spill] sm:$0xff] %v2778_v53 }
 0x117   : > { %v2166_v14 = vpop.f32.mrf.mxu0 }
 0x118   : > { %572 = vrot.lane.b32.xlu1 %v2166_v14, %s2054_s12  ;;  %v2170_v15 = vpop.f32.mrf.mxu1 }
 0x11f   : > { %v2172_v16 = vpop.f32.mrf.mxu0 }
 0x120   : > { %3707 = vst [vmem:[#allocation3_spill] sm:$0xff] %v2172_v16  ;;  %580 = vrot.lane.b32.xlu1 %v2170_v15, %s2053_s23  ;;  %601 = vrot.lane.b32.xlu0 %v2172_v16, %s2055_s13  ;;  %v2180_v17 = vpop.f32.mrf.mxu1 }
 0x121   : > { %574 = vrot.lane.b32.xlu2 %v2172_v16, %s2054_s12 }
 0x128   : > { %599 = vrot.lane.b32.xlu1 %v2166_v14, %s2055_s13  ;;  %1032 = vrot.lane.b32.xlu0 %v2139_v6, %s2055_s13 }
 0x129   : > { %582 = vrot.lane.b32.xlu2 %v2180_v17, %s2053_s23 }
 0x130   : > { %1030 = vrot.lane.b32.xlu1 %v2147_v10, %s2055_s13  ;;  %1052 = vrot.lane.b32.xlu0 %v2166_v14, %s2053_s23 }
 0x131   : > { %595 = vrot.lane.b32.xlu2 %v2139_v6, %s2053_s23 }
 0x138   : > { %1038 = vrot.lane.b32.xlu1 %v2180_v17, %s2054_s12  ;;  %1054 = vrot.lane.b32.xlu0 %v2172_v16, %s2053_s23  ;;  %v2639_v16 = vld [vmem:[%s3647_s4 + $0x110] sm:$0xff] }
 0x139   : > { %1036 = vrot.lane.b32.xlu2 %v2170_v15, %s2054_s12  ;;  %3730 = vst [vmem:[#allocation26_spill] sm:$0xff] %v2639_v16  ;;  %718 = vmatpush.msrb.mxu2 %v2639_v16  ;;  %v2759_v16 = vld [vmem:[%s3648_s5 + $0x28] sm:$0xff] }
 0x13a   : > { %3749 = vst [vmem:[#allocation45_spill] sm:$0xff] %v2759_v16 }
 0x13b   : > { %719 = vmatpush.msrb.mxu2 %v2665_v52  ;;  %v2706_v52 = vld [vmem:[%s3648_s5 + $0x68] sm:$0xff] }
 0x13c   : > { %3741 = vst [vmem:[#allocation37_spill] sm:$0xff] %v2706_v52  ;;  %795 = vmatpush.msra.mxu1 %v2706_v52  ;;  %v2754_v52 = vld [vmem:[%s3648_s5 + $0x20] sm:$0xff] }
 0x13d   : > { %720 = vmatpush.msrb.mxu2 %v2687_v48  ;;  %v2735_v48 = vld [vmem:[%s3648_s5 + $0x48] sm:$0xff]  ;;  %3748 = vst [vmem:[#allocation44_spill] sm:$0xff] %v2754_v52  ;;  %774 = vmatpush.msra.mxu0 %v2754_v52 }
 0x13e   : > { %3745 = vst [vmem:[#allocation41_spill] sm:$0xff] %v2735_v48  ;;  %796 = vmatpush.msra.mxu1 %v2735_v48  ;;  %v2783_v48 = vld [vmem:[%s3648_s5 + $0x8] sm:$0xff] }
 0x13f   : > { %721 = vmatpush.msrb.mxu2 %v2718_v9  ;;  %v2766_v9 = vld [vmem:[%s3647_s4 + $0x20] sm:$0xff]  ;;  %3753 = vst [vmem:[#allocation49_spill] sm:$0xff] %v2783_v48  ;;  %775 = vmatpush.msra.mxu0 %v2778_v53 }
 0x140   : > { %1058 = vrot.lane.b32.xlu1 %v2170_v15, %s2055_s13  ;;  %3750 = vst [vmem:[#allocation46_spill] sm:$0xff] %v2766_v9  ;;  %797 = vmatpush.msra.mxu1 %v2759_v16  ;;  %v2797_v16 = vld [vmem:[%s3646_s3] sm:$0xff] }
 0x141   : > { %1046 = vrot.lane.b32.xlu2 %v2147_v10, %s2054_s12  ;;  %722 = vmatpush.msrb.mxu2 %v2742_v5  ;;  %v3700_v5 = vmov 7  }
 0x142   : > { %798 = vmatpush.msra.mxu1 %v2783_v48 }
 0x143   : > { %723 = vmatpush.msrb.mxu2 %v2766_v9  ;;  %v2810_v9 = vld [vmem:[%s3648_s5 + $0x170] sm:$0xff] }
 0x148   : > { %1060 = vrot.lane.b32.xlu1 %v2180_v17, %s2055_s13 }
 0x149   : > { %1048 = vrot.lane.b32.xlu2 %v2139_v6, %s2054_s12 }
 0x150   : > { %909 = vperm.xlu1 %2000, %v2711_v49  }
 0x158   : > { %2002 = vset.pattern.permute.xlu1 %v3699_v4 }
 0x159   : > { %941 = vperm.xlu1 %2002, %v2711_v49  }
 0x161   : > { %2005 = vset.pattern.permute.xlu1 %v3700_v5 }
 0x162   : > { %969 = vperm.xlu1 %2005, %v2797_v16  }
 0x16a   : > { %2007 = vset.pattern.permute.xlu1 %v3704_v11  ;;  %v2815_v11 = vld [vmem:[%s3648_s5 + $0x178] sm:$0xff] }
 0x16b   : > { %862 = vperm.xlu1 %2007, %v2797_v16   ;;  %3754 = vst [vmem:[#allocation50_spill] sm:$0xff] %v2815_v11 }
 0x17b   : > { %v575_v48 = vpop.permute.xlu2 %574 }
 0x18a   : > { %v573_v52 = vpop.permute.xlu1 %572 }
 0x18b   : > { %v587_v4 = vsel %vm586_vm3, %v2147_v10, %v573_v52  ;;  %v2828_v10 = vld [vmem:[%s3648_s5 + $0x150] sm:$0xff]  ;;  %v2833_v52 = vld [vmem:[%s3648_s5 + $0x158] sm:$0xff] }
 0x192   : > { %v581_v5 = vpop.permute.xlu1 %580 }
 0x193   : > { %v2805_v53 = vsel %vm508_vm1, %v587_v4, %v581_v5  ;;  %v2842_v4 = vld [vmem:[%s3648_s5 + $0x130] sm:$0xff]  ;;  %v2847_v5 = vld [vmem:[%s3648_s5 + $0x138] sm:$0xff] }
 0x194   : > { %1919 = vmatmul.msk.f32.vlgmr.msra.gmra.mxu2 %vm609_vm4, %v2805_v53  ;;  %1921 = vmatmul.msk.f32.vlgmr.msra.gmra.mxu3 %vm609_vm4, %v2805_v53 }
 0x195   : > { %1923 = vmatmul.msk.f32.vlgmr.msrb.gmra.mxu0 %vm609_vm4, %v2805_v53  ;;  %1925 = vmatmul.msk.f32.vlgmr.msrb.gmra.mxu1 %vm609_vm4, %v2805_v53 }
 0x196   : > { %810 = vmatpush.msra.mxu2 %v2810_v9  ;;  %833 = vmatpush.msra.mxu3 %v2815_v11  ;;  %v583_v11 = vpop.permute.xlu2 %582 }
 0x197   : > { %1078 = vmatpush.msrb.mxu0 %v2191_v18  ;;  %1101 = vmatpush.msrb.mxu1 %v2196_v19  ;;  %v2856_v18 = vld [vmem:[%s3648_s5 + $0x110] sm:$0xff]  ;;  %v2861_v19 = vld [vmem:[%s3648_s5 + $0x118] sm:$0xff] }
 0x198   : > { %811 = vmatpush.msra.mxu2 %v2828_v10  ;;  %834 = vmatpush.msra.mxu3 %v2833_v52 }
 0x199   : > { %1079 = vmatpush.msrb.mxu0 %v2213_v22  ;;  %1102 = vmatpush.msrb.mxu1 %v2218_v23  ;;  %v588_v22 = vsel %vm586_vm3, %v2139_v6, %v575_v48  ;;  %v2884_v6 = vld [vmem:[%s3648_s5 + $0xf8] sm:$0xff] }
 0x19a   : > { %812 = vmatpush.msra.mxu2 %v2842_v4  ;;  %835 = vmatpush.msra.mxu3 %v2847_v5  ;;  %v2872_v23 = vsel %vm508_vm1, %v588_v22, %v583_v11  ;;  %v2916_v48 = vld [vmem:[%s3648_s5 + $0xb8] sm:$0xff]  ;;  %v600_v11 = vpop.permute.xlu1 %599  ;;  %v594_v22 = vpop.permute.xlu0 %593 }
 0x19b   : > { %1080 = vmatpush.msrb.mxu0 %v2235_v26  ;;  %1103 = vmatpush.msrb.mxu1 %v2242_v27  ;;  %v2879_v26 = vld [vmem:[%s3648_s5 + $0xf0] sm:$0xff] }
 0x19c   : > { %813 = vmatpush.msra.mxu2 %v2856_v18  ;;  %836 = vmatpush.msra.mxu3 %v2861_v19  ;;  %v2897_v27 = vld [vmem:[%s3648_s5 + $0xd0] sm:$0xff] }
 0x19d   : > { %1081 = vmatpush.msrb.mxu0 %v2261_v30  ;;  %1104 = vmatpush.msrb.mxu1 %v2268_v31  ;;  %v2902_v30 = vld [vmem:[%s3648_s5 + $0xd8] sm:$0xff]  ;;  %v2911_v31 = vld [vmem:[%s3648_s5 + $0xb0] sm:$0xff] }
 0x19e   : > { %1920 = vmatmul.msk.f32.gmra.mxu2 %vm609_vm4, %v2872_v23  ;;  %1922 = vmatmul.msk.f32.gmra.mxu3 %vm609_vm4, %v2872_v23  ;;  %3755 = vst [vmem:[#allocation51_spill] sm:$0xff] %v2902_v30 }
 0x19f   : > { %1924 = vmatmul.msk.f32.gmra.mxu0 %vm609_vm4, %v2872_v23  ;;  %1926 = vmatmul.msk.f32.gmra.mxu1 %vm609_vm4, %v2872_v23 }
 0x1a0   : > { %814 = vmatpush.msra.mxu2 %v2879_v26  ;;  %837 = vmatpush.msra.mxu3 %v2884_v6 }
 0x1a1   : > { %1082 = vmatpush.msrb.mxu0 %v2287_v34  ;;  %1105 = vmatpush.msrb.mxu1 %v2295_v35  ;;  %v2925_v34 = vld [vmem:[%s3648_s5 + $0x90] sm:$0xff]  ;;  %v2930_v35 = vld [vmem:[%s3648_s5 + $0x98] sm:$0xff] }
 0x1a2   : > { %815 = vmatpush.msra.mxu2 %v2897_v27  ;;  %838 = vmatpush.msra.mxu3 %v2902_v30  ;;  %v605_v30 = vsel %vm586_vm3, %v594_v22, %v600_v11  ;;  %v3779_v11 = vld [vmem:[#allocation46_spill] sm:$0xff]  ;;  %v3780_v22 = vld [vmem:[#allocation47_spill] sm:$0xff] }
 0x1a3   : > { %1083 = vmatpush.msrb.mxu0 %v2312_v38  ;;  %1106 = vmatpush.msrb.mxu1 %v2319_v39  ;;  %v2944_v38 = vld [vmem:[%s3648_s5 + $0x70] sm:$0xff]  ;;  %v2949_v39 = vld [vmem:[%s3648_s5 + $0x78] sm:$0xff] }
 0x1a4   : > { %816 = vmatpush.msra.mxu2 %v2911_v31  ;;  %839 = vmatpush.msra.mxu3 %v2916_v48 }
 0x1a5   : > { %1084 = vmatpush.msrb.mxu0 %v2336_v42  ;;  %1107 = vmatpush.msrb.mxu1 %v2345_v43  ;;  %v2953_v42 = vsel %vm508_vm1, %v605_v30, %v2170_v15  ;;  %v2966_v43 = vld [vmem:[%s3648_s5 + $0x50] sm:$0xff]  ;;  %v2971_v15 = vld [vmem:[%s3648_s5 + $0x58] sm:$0xff]  ;;  %v3778_v30 = vld [vmem:[#allocation13_spill] sm:$0xff] }
 0x1a6   : > { %817 = vmatpush.msra.mxu2 %v2925_v34  ;;  %840 = vmatpush.msra.mxu3 %v2930_v35 }
 0x1a7   : > { %1085 = vmatpush.msrb.mxu0 %v2366_v46  ;;  %1108 = vmatpush.msrb.mxu1 %v2371_v47  ;;  %v2980_v46 = vld [vmem:[%s3648_s5 + $0x30] sm:$0xff]  ;;  %v2985_v47 = vld [vmem:[%s3648_s5 + $0x38] sm:$0xff] }
 0x1a8   : > { %1927 = vmatmul.msk.f32.vlgmr.msrb.gmra.mxu2 %vm609_vm4, %v2805_v53  ;;  %1929 = vmatmul.msk.f32.vlgmr.msrb.gmra.mxu3 %vm609_vm4, %v2805_v53  ;;  %v602_v53 = vpop.permute.xlu0 %601 }
 0x1a9   : > { %1931 = vmatmul.msk.f32.vlgmr.msra.gmra.mxu0 %vm609_vm4, %v2953_v42  ;;  %1933 = vmatmul.msk.f32.vlgmr.msra.gmra.mxu1 %vm609_vm4, %v2953_v42 }
 0x1aa   : > { %818 = vmatpush.msra.mxu2 %v2944_v38  ;;  %841 = vmatpush.msra.mxu3 %v2949_v39 }
 0x1ab   : > { %1086 = vmatpush.msrb.mxu0 %v2391_v50  ;;  %1109 = vmatpush.msrb.mxu1 %v2396_v51  ;;  %v2994_v50 = vld [vmem:[%s3648_s5 + $0x10] sm:$0xff]  ;;  %v2999_v51 = vld [vmem:[%s3648_s5 + $0x18] sm:$0xff] }
 0x1ac   : > { %819 = vmatpush.msra.mxu2 %v2966_v43  ;;  %842 = vmatpush.msra.mxu3 %v2971_v15 }
 0x1ad   : > { %1087 = vmatpush.msrb.mxu0 %v2415_v54  ;;  %1110 = vmatpush.msrb.mxu1 %v2420_v55  ;;  %v596_v54 = vpop.permute.xlu2 %595 }
 0x1ae   : > { %820 = vmatpush.msra.mxu2 %v2980_v46  ;;  %843 = vmatpush.msra.mxu3 %v2985_v47  ;;  %v606_v55 = vsel %vm586_vm3, %v596_v54, %v602_v53  ;;  %v3782_v53 = vld [vmem:[#allocation15_spill] sm:$0xff]  ;;  %v3783_v54 = vld [vmem:[#allocation50_spill] sm:$0xff] }
 0x1af   : > { %1088 = vmatpush.msrb.mxu0 %v2441_v58  ;;  %1111 = vmatpush.msrb.mxu1 %v2446_v59  ;;  %v2060_v58 = vmov 1   ;;  %v608_v59 = vsel %vm508_vm1, %v606_v55, %v2180_v17  ;;  %v1031_v17 = vpop.permute.xlu1 %1030  ;;  %v3784_v55 = vld [vmem:[#allocation16_spill] sm:$0xff] }
 0x1b0   : > { %821 = vmatpush.msra.mxu2 %v2994_v50  ;;  %844 = vmatpush.msra.mxu3 %v2999_v51 }
 0x1b1   : > { %1089 = vmatpush.msrb.mxu0 %v2475_v62  ;;  %1112 = vmatpush.msrb.mxu1 %v2480_v63  ;;  %v3768_v63 = vld [vmem:[#allocation8_spill] sm:$0xff] }
 0x1b2   : > { %1124 = vmatpush.msrb.mxu2 %v2201_v20  ;;  %1147 = vmatpush.msrb.mxu3 %v2208_v21  ;;  %v2061_v20 = vmov 2   ;;  %v1042_v21 = vsel %vm586_vm3, %v1031_v17, %v2166_v14  ;;  %v3756_v14 = vmov 3   ;;  %v3788_v17 = vld [vmem:[#allocation19_spill] sm:$0xff] }
 0x1b3   : > { %1170 = vmatpush.msra.mxu0 %v2497_v2  ;;  %1193 = vmatpush.msra.mxu1 %v2502_v3  ;;  %v3771_v2 = vld [vmem:[#allocation39_spill] sm:$0xff]  ;;  %v3772_v3 = vmov 5  }
 0x1b4   : > { %1998 = vset.pattern.permute.xlu2 %v2060_v58  ;;  %1928 = vmatmul.msk.f32.gmra.mxu2 %vm609_vm4, %v2872_v23 }
 0x1b5   : > { %1930 = vmatmul.msk.f32.gmra.mxu3 %vm609_vm4, %v2872_v23  ;;  %1932 = vmatmul.msk.f32.gmra.mxu0 %vm609_vm4, %v608_v59  ;;  %v3777_v23 = vld [vmem:[#allocation12_spill] sm:$0xff] }
 0x1b6   : > { %1934 = vmatmul.msk.f32.gmra.mxu1 %vm609_vm4, %v608_v59  ;;  %877 = vperm.xlu2 %1998, %v2711_v49  }
 0x1b7   : > { %1125 = vmatpush.msrb.mxu2 %v2225_v24  ;;  %1148 = vmatpush.msrb.mxu3 %v2230_v25  ;;  %v1037_v24 = vpop.permute.xlu2 %1036 }
 0x1b8   : > { %1171 = vmatpush.msra.mxu0 %v2519_v7  ;;  %1194 = vmatpush.msra.mxu1 %v2526_v8  ;;  %v1044_v25 = vsel %vm508_vm1, %v1042_v21, %v1037_v24  ;;  %v3773_v7 = vld [vmem:[#allocation10_spill] sm:$0xff]  ;;  %v3774_v8 = vld [vmem:[#allocation11_spill] sm:$0xff]  ;;  %v3789_v21 = vmov 0   ;;  %v3790_v24 = vld [vmem:[#allocation20_spill] sm:$0xff] }
 0x1b9   : > { %1126 = vmatpush.msrb.mxu2 %v2247_v28  ;;  %1149 = vmatpush.msrb.mxu3 %v2252_v29  ;;  %v3757_v28 = vld [vmem:[#allocation26_spill] sm:$0xff]  ;;  %v3758_v29 = vld [vmem:[#allocation27_spill] sm:$0xff] }
 0x1ba   : > { %1172 = vmatpush.msra.mxu0 %v2543_v12  ;;  %1195 = vmatpush.msra.mxu1 %v2548_v13  ;;  %v3775_v12 = vld [vmem:[#allocation42_spill] sm:$0xff]  ;;  %v3776_v13 = vld [vmem:[#allocation43_spill] sm:$0xff] }
 0x1bb   : > { %1999 = vset.pattern.permute.xlu0 %v2060_v58  ;;  %2009 = vset.pattern.permute.xlu1 %v2061_v20  ;;  %v3785_v58 = vld [vmem:[#allocation17_spill] sm:$0xff] }
 0x1bc   : > { %893 = vperm.xlu1 %2009, %v2797_v16   ;;  %873 = vperm.xlu0 %1999, %v2797_v16  }
 0x1bd   : > { %1127 = vmatpush.msrb.mxu2 %v2273_v32  ;;  %1150 = vmatpush.msrb.mxu3 %v2282_v33  ;;  %v1033_v32 = vpop.permute.xlu0 %1032  ;;  %v3759_v33 = vld [vmem:[#allocation4_spill] sm:$0xff] }
 0x1be   : > { %1173 = vmatpush.msra.mxu0 %v2569_v1  ;;  %1196 = vmatpush.msra.mxu1 %v2574_v0  ;;  %v3769_v0 = vld [vmem:[#allocation9_spill] sm:$0xff]  ;;  %v3770_v1 = vld [vmem:[#allocation38_spill] sm:$0xff] }
 0x1bf   : > { %1128 = vmatpush.msrb.mxu2 %v2300_v36  ;;  %1151 = vmatpush.msrb.mxu3 %v2307_v37  ;;  %v3760_v36 = vld [vmem:[#allocation5_spill] sm:$0xff]  ;;  %v1039_v37 = vpop.permute.xlu1 %1038 }
 0x1c0   : > { %1174 = vmatpush.msra.mxu0 %v2591_v61  ;;  %1197 = vmatpush.msra.mxu1 %v2596_v60  ;;  %v3766_v60 = vld [vmem:[#allocation34_spill] sm:$0xff]  ;;  %v3767_v61 = vld [vmem:[#allocation35_spill] sm:$0xff] }
 0x1c1   : > { %1935 = vmatmul.msk.f32.vlgmr.msra.gmra.mxu2 %vm609_vm4, %v2953_v42  ;;  %1937 = vmatmul.msk.f32.vlgmr.msra.gmra.mxu3 %vm609_vm4, %v2953_v42  ;;  %v3781_v42 = vld [vmem:[#allocation14_spill] sm:$0xff] }
 0x1c2   : > { %1941 = vmatmul.msk.f32.vlgmr.msrb.gmra.mxu0 %vm609_vm4, %v1044_v25  ;;  %1943 = vmatmul.msk.f32.vlgmr.msrb.gmra.mxu1 %vm609_vm4, %v1044_v25 }
 0x1c3   : > { %2001 = vset.pattern.permute.xlu2 %v3756_v14  ;;  %1129 = vmatpush.msrb.mxu2 %v2324_v40  ;;  %v3761_v40 = vld [vmem:[#allocation30_spill] sm:$0xff]  ;;  %v3799_v14 = vld [vmem:[#allocation32_spill] sm:$0xff] }
 0x1c4   : > { %1152 = vmatpush.msrb.mxu3 %v2331_v41  ;;  %1175 = vmatpush.msra.mxu0 %v2615_v57  ;;  %v3762_v41 = vld [vmem:[#allocation31_spill] sm:$0xff] }
 0x1c5   : > { %1198 = vmatpush.msra.mxu1 %v2620_v56  ;;  %905 = vperm.xlu2 %2001, %v2797_v16   ;;  %v3763_v56 = vld [vmem:[#allocation6_spill] sm:$0xff]  ;;  %v3764_v57 = vld [vmem:[#allocation7_spill] sm:$0xff] }
 0x1c6   : > { %1130 = vmatpush.msrb.mxu2 %v2352_v44  ;;  %1153 = vmatpush.msrb.mxu3 %v2357_v45  ;;  %v3765_v44 = vld [vmem:[#allocation3_spill] sm:$0xff] }
 0x1c7   : > { %1176 = vmatpush.msra.mxu0 %v3757_v28  ;;  %1199 = vmatpush.msra.mxu1 %v3758_v29  ;;  %v1043_v45 = vsel %vm586_vm3, %v1033_v32, %v3765_v44  ;;  %v3800_v28 = vld [vmem:[#allocation33_spill] sm:$0xff] }
 0x1c8   : > { %1131 = vmatpush.msrb.mxu2 %v3759_v33  ;;  %1154 = vmatpush.msrb.mxu3 %v3760_v36  ;;  %v1045_v62 = vsel %vm508_vm1, %v1043_v45, %v1039_v37  ;;  %v3802_v29 = vld [vmem:[#allocation37_spill] sm:$0xff]  ;;  %v1047_v33 = vpop.permute.xlu2 %1046 }
 0x1c9   : > { %1177 = vmatpush.msra.mxu0 %v3761_v40  ;;  %1200 = vmatpush.msra.mxu1 %v3762_v41  ;;  %v3804_v32 = vld [vmem:[#allocation41_spill] sm:$0xff] }
 0x1ca   : > { %1132 = vmatpush.msrb.mxu2 %v3763_v56  ;;  %1155 = vmatpush.msrb.mxu3 %v3764_v57  ;;  %v3808_v36 = vld [vmem:[#allocation49_spill] sm:$0xff] }
 0x1cb   : > { %1178 = vmatpush.msra.mxu0 %v3766_v60  ;;  %1201 = vmatpush.msra.mxu1 %v3767_v61 }
 0x1cc   : > { %1936 = vmatmul.msk.f32.gmra.mxu2 %vm609_vm4, %v608_v59  ;;  %1938 = vmatmul.msk.f32.gmra.mxu3 %vm609_vm4, %v608_v59  ;;  %v3786_v59 = vmov 7  }
 0x1cd   : > { %1942 = vmatmul.msk.f32.gmra.mxu0 %vm609_vm4, %v1045_v62  ;;  %1944 = vmatmul.msk.f32.gmra.mxu1 %vm609_vm4, %v1045_v62 }
 0x1ce   : > { %1133 = vmatpush.msrb.mxu2 %v3768_v63  ;;  %1156 = vmatpush.msrb.mxu3 %v3769_v0 }
 0x1cf   : > { %1179 = vmatpush.msra.mxu0 %v3770_v1  ;;  %1202 = vmatpush.msra.mxu1 %v3771_v2 }
 0x1d0   : > { %2003 = vset.pattern.permute.xlu2 %v3772_v3  ;;  %1134 = vmatpush.msrb.mxu2 %v3773_v7 }
 0x1d1   : > { %937 = vperm.xlu2 %2003, %v2797_v16   ;;  %1157 = vmatpush.msrb.mxu3 %v3774_v8 }
 0x1d2   : > { %1180 = vmatpush.msra.mxu0 %v3775_v12  ;;  %1203 = vmatpush.msra.mxu1 %v3776_v13 }
 0x1d3   : > { %1135 = vmatpush.msrb.mxu2 %v3777_v23  ;;  %1158 = vmatpush.msrb.mxu3 %v3778_v30 }
 0x1d4   : > { %1181 = vmatpush.msra.mxu0 %v3779_v11  ;;  %1204 = vmatpush.msra.mxu1 %v3780_v22 }
 0x1d5   : > { %1222 = vmatpush.msra.mxu2 %v3781_v42  ;;  %1245 = vmatpush.msra.mxu3 %v3782_v53 }
 0x1d6   : > { %1268 = vmatpush.msrb.mxu0 %v2810_v9  ;;  %1291 = vmatpush.msrb.mxu1 %v3783_v54  ;;  %v3787_v9 = vld [vmem:[#allocation18_spill] sm:$0xff] }
 0x1d7   : > { %1945 = vmatmul.msk.f32.vlgmr.msrb.gmra.mxu2 %vm609_vm4, %v1044_v25  ;;  %1947 = vmatmul.msk.f32.vlgmr.msrb.gmra.mxu3 %vm609_vm4, %v1044_v25 }
 0x1d8   : > { %1949 = vmatmul.msk.f32.vlgmr.msra.gmra.mxu0 %vm609_vm4, %v1044_v25  ;;  %1951 = vmatmul.msk.f32.vlgmr.msra.gmra.mxu1 %vm609_vm4, %v1044_v25  ;;  %v3793_v25 = vld [vmem:[#allocation23_spill] sm:$0xff] }
 0x1d9   : > { %1223 = vmatpush.msra.mxu2 %v3784_v55  ;;  %1246 = vmatpush.msra.mxu3 %v3785_v58 }
 0x1da   : > { %1269 = vmatpush.msrb.mxu0 %v2828_v10  ;;  %1292 = vmatpush.msrb.mxu1 %v2833_v52  ;;  %v3791_v10 = vld [vmem:[#allocation21_spill] sm:$0xff]  ;;  %v3792_v52 = vld [vmem:[#allocation22_spill] sm:$0xff] }
 0x1db   : > { %2004 = vset.pattern.permute.xlu0 %v3786_v59  ;;  %1224 = vmatpush.msra.mxu2 %v3787_v9 }
 0x1dc   : > { %973 = vperm.xlu0 %2004, %v2711_v49   ;;  %1247 = vmatpush.msra.mxu3 %v3788_v17 }
 0x1dd   : > { %1270 = vmatpush.msrb.mxu0 %v2842_v4  ;;  %1293 = vmatpush.msrb.mxu1 %v2847_v5  ;;  %v3794_v4 = vld [vmem:[#allocation24_spill] sm:$0xff]  ;;  %v3795_v5 = vld [vmem:[#allocation25_spill] sm:$0xff] }
 0x1de   : > { %2006 = vset.pattern.permute.xlu2 %v3789_v21  ;;  %1225 = vmatpush.msra.mxu2 %v3790_v24 }
 0x1df   : > { %867 = vperm.xlu2 %2006, %v2711_v49   ;;  %1248 = vmatpush.msra.mxu3 %v3791_v10 }
 0x1e0   : > { %1271 = vmatpush.msrb.mxu0 %v2856_v18  ;;  %1294 = vmatpush.msrb.mxu1 %v2861_v19  ;;  %v3796_v18 = vld [vmem:[#allocation51_spill] sm:$0xff]  ;;  %v2062_v19 = vmov 4  }
 0x1e1   : > { %1226 = vmatpush.msra.mxu2 %v3792_v52  ;;  %1249 = vmatpush.msra.mxu3 %v3793_v25 }
 0x1e2   : > { %1272 = vmatpush.msrb.mxu0 %v2879_v26  ;;  %1295 = vmatpush.msrb.mxu1 %v2884_v6  ;;  %v3797_v26 = vld [vmem:[#allocation28_spill] sm:$0xff]  ;;  %v3798_v6 = vld [vmem:[#allocation29_spill] sm:$0xff] }
 0x1e3   : > { %1946 = vmatmul.msk.f32.gmra.mxu2 %vm609_vm4, %v1045_v62  ;;  %1948 = vmatmul.msk.f32.gmra.mxu3 %vm609_vm4, %v1045_v62 }
 0x1e4   : > { %1950 = vmatmul.msk.f32.gmra.mxu0 %vm609_vm4, %v1045_v62  ;;  %1952 = vmatmul.msk.f32.gmra.mxu1 %vm609_vm4, %v1045_v62 }
 0x1e5   : > { %1227 = vmatpush.msra.mxu2 %v3794_v4  ;;  %1250 = vmatpush.msra.mxu3 %v3795_v5 }
 0x1e6   : > { %1273 = vmatpush.msrb.mxu0 %v2897_v27  ;;  %1296 = vmatpush.msrb.mxu1 %v3796_v18  ;;  %v3801_v27 = vld [vmem:[#allocation36_spill] sm:$0xff] }
 0x1e7   : > { %2010 = vset.pattern.permute.xlu0 %v2062_v19  ;;  %1228 = vmatpush.msra.mxu2 %v3797_v26 }
 0x1e8   : > { %1251 = vmatpush.msra.mxu3 %v3798_v6  ;;  %1274 = vmatpush.msrb.mxu0 %v2911_v31  ;;  %v1053_v31 = vpop.permute.xlu0 %1052 }
 0x1e9   : > { %1297 = vmatpush.msrb.mxu1 %v2916_v48  ;;  %929 = vperm.xlu0 %2010, %v2711_v49   ;;  %v1059_v48 = vpop.permute.xlu1 %1058 }
 0x1ea   : > { %2008 = vset.pattern.permute.xlu2 %v2061_v20  ;;  %1229 = vmatpush.msra.mxu2 %v3799_v14  ;;  %v3803_v20 = vld [vmem:[#allocation40_spill] sm:$0xff] }
 0x1eb   : > { %1252 = vmatpush.msra.mxu3 %v3800_v28  ;;  %1275 = vmatpush.msrb.mxu0 %v2925_v34  ;;  %v3805_v34 = vld [vmem:[#allocation44_spill] sm:$0xff] }
 0x1ec   : > { %1298 = vmatpush.msrb.mxu1 %v2930_v35  ;;  %897 = vperm.xlu2 %2008, %v2711_v49   ;;  %v3806_v35 = vld [vmem:[#allocation45_spill] sm:$0xff] }
 0x1ed   : > { %1230 = vmatpush.msra.mxu2 %v3801_v27  ;;  %1253 = vmatpush.msra.mxu3 %v3802_v29 }
 0x1ee   : > { %1276 = vmatpush.msrb.mxu0 %v2944_v38  ;;  %1299 = vmatpush.msrb.mxu1 %v2949_v39  ;;  %v1064_v38 = vsel %vm586_vm3, %v1047_v33, %v1053_v31  ;;  %v3807_v39 = vld [vmem:[#allocation48_spill] sm:$0xff] }
 0x1ef   : > { %1231 = vmatpush.msra.mxu2 %v3803_v20  ;;  %1254 = vmatpush.msra.mxu3 %v3804_v32  ;;  %v1066_v37 = vsel %vm508_vm1, %v1064_v38, %v1059_v48 }
 0x1f0   : > { %1277 = vmatpush.msrb.mxu0 %v2966_v43  ;;  %1300 = vmatpush.msrb.mxu1 %v2971_v15  ;;  %v2063_v43 = vmov 6   ;;  %v1055_v15 = vpop.permute.xlu0 %1054 }
 0x1f1   : > { %1232 = vmatpush.msra.mxu2 %v3805_v34  ;;  %1255 = vmatpush.msra.mxu3 %v3806_v35 }
 0x1f2   : > { %1278 = vmatpush.msrb.mxu0 %v2980_v46  ;;  %1301 = vmatpush.msrb.mxu1 %v2985_v47  ;;  %v1061_v46 = vpop.permute.xlu1 %1060  ;;  %v1049_v47 = vpop.permute.xlu2 %1048 }
 0x1f3   : > { %1233 = vmatpush.msra.mxu2 %v3807_v39  ;;  %1256 = vmatpush.msra.mxu3 %v3808_v36 }
 0x1f4   : > { %1279 = vmatpush.msrb.mxu0 %v2994_v50  ;;  %1302 = vmatpush.msrb.mxu1 %v2999_v51  ;;  %v1065_v50 = vsel %vm586_vm3, %v1049_v47, %v1055_v15 }
 0x1f5   : > { %1953 = vmatmul.msk.f32.vlgmr.msra.gmra.mxu2 %vm609_vm4, %v1066_v37  ;;  %1955 = vmatmul.msk.f32.vlgmr.msra.gmra.mxu3 %vm609_vm4, %v1066_v37  ;;  %v1067_v51 = vsel %vm508_vm1, %v1065_v50, %v1061_v46 }
 0x1f6   : > { %1957 = vmatmul.msk.f32.vlgmr.msrb.gmra.mxu0 %vm609_vm4, %v1066_v37  ;;  %1959 = vmatmul.msk.f32.vlgmr.msrb.gmra.mxu1 %vm609_vm4, %v1066_v37 }
 0x1f7   : > { %2011 = vset.pattern.permute.xlu2 %v2062_v19  ;;  %2013 = vset.pattern.permute.xlu1 %v2063_v43 }
 0x1f8   : > { %925 = vperm.xlu2 %2011, %v2797_v16   ;;  %2014 = vset.pattern.permute.xlu0 %v3786_v59 }
 0x1fa   : > { %v3214_v48 = vpop.permute.xlu1 %909 }
 0x1fd   : > { %1954 = vmatmul.msk.f32.gmra.mxu2 %vm609_vm4, %v1067_v51  ;;  %1956 = vmatmul.msk.f32.gmra.mxu3 %vm609_vm4, %v1067_v51 }
 0x1fe   : > { %1958 = vmatmul.msk.f32.gmra.mxu0 %vm609_vm4, %v1067_v51  ;;  %1960 = vmatmul.msk.f32.gmra.mxu1 %vm609_vm4, %v1067_v51 }
 0x200   : > { %2012 = vset.pattern.permute.xlu2 %v2063_v43 }
 0x201   : > { %961 = vperm.xlu2 %2012, %v2711_v49  }
 0x202   : > { %v3235_v47 = vpop.permute.xlu1 %941 }
 0x210   : > { %v3192_v24 = vpop.permute.xlu2 %877 }
 0x212   : > { %v679_v40 = vpop.f32.mrf.mxu0  ;;  %v702_v41 = vpop.f32.mrf.mxu1 }
 0x217   : > { %v633_v56 = vpop.f32.mrf.mxu2  ;;  %v656_v57 = vpop.f32.mrf.mxu3 }
 0x21c   : > { %v3168_v44 = vpop.f32.mrf.mxu0  ;;  %v705_v45 = vpop.f32.mrf.mxu1 }
 0x21f   : > { %v3198_v19 = vpop.permute.xlu2 %905 }
 0x221   : > { %v636_v60 = vpop.f32.mrf.mxu2  ;;  %v3170_v61 = vpop.f32.mrf.mxu3 }
 0x226   : > { %v777_v62 = vpop.f32.mrf.mxu0  ;;  %v800_v63 = vpop.f32.mrf.mxu1 }
 0x227   : > { %v3172_v0 = vadd.f32 %v777_v62, %v633_v56  ;;  %v3174_v1 = vadd.f32 %v800_v63, %v656_v57 }
 0x22b   : > { %v3176_v2 = vpop.f32.mrf.mxu2  ;;  %v3178_v3 = vpop.f32.mrf.mxu3 }
 0x22c   : > { %v3222_v39 = vpop.permute.xlu2 %937 }
 0x22e   : > { %v3200_v26 = vpop.permute.xlu0 %873 }
 0x232   : > { %v780_v30 = vpop.f32.mrf.mxu0 }
 0x233   : > { %v803_v42 = vpop.f32.mrf.mxu1  ;;  %v856_v50 = vadd.f32 %v780_v30, %v636_v60 }
 0x237   : > { %v3180_v49 = vpop.f32.mrf.mxu2 }
 0x238   : > { %v3182_v7 = vpop.f32.mrf.mxu3 }
 0x23f   : > { %v1091_v53 = vpop.f32.mrf.mxu0  ;;  %v1114_v54 = vpop.f32.mrf.mxu1 }
 0x244   : > { %v823_v8 = vpop.f32.mrf.mxu2  ;;  %v846_v12 = vpop.f32.mrf.mxu3 }
 0x245   : > { %v3184_v13 = vadd.f32 %v823_v8, %v679_v40  ;;  %v3186_v23 = vadd.f32 %v846_v12, %v702_v41  ;;  %v881_v40 = vmul.f32 %v3192_v24, %v856_v50  ;;  %v857_v8 = vadd.f32 %v803_v42, %v3170_v61  ;;  %v3274_v42 = vld [vmem:[#allocation2] sm:$0xff] }
 0x246   : > { %v912_v61 = vmul.f32 %v3198_v19, %v3174_v1 }
 0x247   : > { %v913_v30 = vmul.f32 %v3214_v48, %v857_v8 }
 0x24a   : > { %v1094_v58 = vpop.f32.mrf.mxu0  ;;  %v1117_v59 = vpop.f32.mrf.mxu1 }
 0x24e   : > { %v3247_v62 = vpop.permute.xlu0 %973 }
 0x24f   : > { %v849_v11 = vpop.f32.mrf.mxu3  ;;  %v826_v55 = vpop.f32.mrf.mxu2 }
 0x250   : > { %v3188_v22 = vadd.f32 %v849_v11, %v705_v45  ;;  %v3245_v45 = vpop.permute.xlu1 %969  ;;  %v3260_v12 = vadd.f32 %v826_v55, %v3168_v44  ;;  %v880_v11 = vmul.f32 %v3200_v26, %v3172_v0 }
 0x251   : > { %v976_v44 = vmul.f32 %v3245_v45, %v3186_v23 }
 0x252   : > { %v977_v55 = vmul.f32 %v3247_v62, %v3188_v22 }
 0x255   : > { %v3190_v21 = vpop.f32.mrf.mxu0  ;;  %v3194_v10 = vpop.f32.mrf.mxu1 }
 0x25a   : > { %v1137_v9 = vpop.f32.mrf.mxu2  ;;  %v1160_v17 = vpop.f32.mrf.mxu3 }
 0x261   : > { %v3196_v4 = vpop.f32.mrf.mxu0  ;;  %v3206_v28 = vpop.f32.mrf.mxu1 }
 0x266   : > { %v1140_v52 = vpop.f32.mrf.mxu2  ;;  %v1163_v25 = vpop.f32.mrf.mxu3 }
 0x273   : > { %v1281_v27 = vpop.f32.mrf.mxu0  ;;  %v1304_v38 = vpop.f32.mrf.mxu1 }
 0x274   : > { %v3216_v20 = vadd.f32 %v1281_v27, %v1137_v9  ;;  %v3243_v56 = vadd.f32 %v1304_v38, %v1160_v17  ;;  %v3292_v17 = vpop.permute.xlu1 %862 }
 0x276   : > { %v1352_v43 = vmul.f32 %v3216_v20, %v3222_v39  ;;  %v1368_v60 = vmul.f32 %v3243_v56, %v3245_v45 }
 0x278   : > { %v1235_v5 = vpop.f32.mrf.mxu2  ;;  %v1258_v18 = vpop.f32.mrf.mxu3 }
 0x279   : > { %v3202_v6 = vadd.f32 %v1235_v5, %v1091_v53  ;;  %v3204_v14 = vadd.f32 %v1258_v18, %v1114_v54  ;;  %v945_v53 = vmul.f32 %v3235_v47, %v3260_v12  ;;  %v944_v54 = vmul.f32 %v3222_v39, %v3184_v13 }
 0x27b   : > { %v1320_v29 = vmul.f32 %v3202_v6, %v3200_v26  ;;  %v1336_v31 = vmul.f32 %v3204_v14, %v3198_v19  ;;  %v1284_v15 = vpop.f32.mrf.mxu0  ;;  %v1307_v41 = vpop.f32.mrf.mxu1 }
 0x27c   : > { %v3233_v46 = vadd.f32 %v1284_v15, %v1140_v52  ;;  %v1317_v57 = vadd.f32 %v1307_v41, %v1163_v25  ;;  %v1318_v25 = vmul.f32 %v3202_v6, %v3292_v17  ;;  %v3298_v5 = vpop.permute.xlu1 %893  ;;  %v3304_v15 = vpop.permute.xlu0 %929 }
 0x27d   : > { %1340 = vrot.lane.b32.xlu1 %v1336_v31, %s2053_s23  ;;  %1324 = vrot.lane.b32.xlu2 %v1320_v29, %s2053_s23  ;;  %v1332_v27 = vmul.f32 %v3204_v14, %v3298_v5 }
 0x27e   : > { %v1353_v51 = vmul.f32 %v3233_v46, %v3235_v47  ;;  %v1369_v63 = vmul.f32 %v1317_v57, %v3247_v62 }
 0x280   : > { %v1238_v32 = vpop.f32.mrf.mxu2  ;;  %v1261_v33 = vpop.f32.mrf.mxu3 }
 0x281   : > { %v3218_v34 = vadd.f32 %v1238_v32, %v1094_v58  ;;  %v3220_v35 = vadd.f32 %v1261_v33, %v1117_v59  ;;  %v3286_v58 = vpop.permute.xlu2 %867 }
 0x282   : > { %v871_v33 = vmul.f32 %v3286_v58, %v856_v50 }
 0x283   : > { %v1321_v36 = vmul.f32 %v3218_v34, %v3192_v24  ;;  %v1337_v37 = vmul.f32 %v3220_v35, %v3214_v48  ;;  %v1319_v14 = vmul.f32 %v3218_v34, %v3286_v58 }
 0x285   : > { %1342 = vrot.lane.b32.xlu1 %v1337_v37, %s2053_s23  ;;  %1326 = vrot.lane.b32.xlu0 %v1321_v36, %s2053_s23 }
 0x286   : > { %1356 = vrot.lane.b32.xlu2 %v1352_v43, %s2053_s23 }
 0x289   : > { %v3288_v59 = vpop.permute.xlu2 %897 }
 0x28a   : > { %v901_v37 = vmul.f32 %v3288_v59, %v857_v8  ;;  %v1333_v50 = vmul.f32 %v3220_v35, %v3288_v59  ;;  %v1349_v8 = vmul.f32 %v3233_v46, %v3304_v15  ;;  %v3322_v35 = vld [vmem:[%s3650_s7] sm:$0xff] }
 0x28d   : > { %957 = vperm.xlu1 %2013, %v2797_v16   ;;  %1358 = vrot.lane.b32.xlu0 %v1353_v51, %s2053_s23  ;;  %v3254_v16 = vld [vmem:[#allocation2 + $0x8] sm:$0xff] }
 0x28e   : > { %886 = vrot.lane.b32.xlu2 %v881_v40, %s2053_s23 }
 0x291   : > { %v3290_v9 = vpop.permute.xlu2 %925 }
 0x292   : > { %v1348_v6 = vmul.f32 %v3216_v20, %v3290_v9 }
 0x295   : > { %1372 = vrot.lane.b32.xlu1 %v1368_v60, %s2053_s23  ;;  %1374 = vrot.lane.b32.xlu0 %v1369_v63, %s2053_s23 }
 0x296   : > { %1422 = vrot.lane.b32.xlu2 %v3254_v16, %s2055_s13 }
 0x299   : > { %v3294_v52 = vpop.permute.xlu2 %961 }
 0x29d   : > { %918 = vrot.lane.b32.xlu1 %v913_v30, %s2053_s23  ;;  %884 = vrot.lane.b32.xlu0 %v880_v11, %s2053_s23 }
 0x29e   : > { %950 = vrot.lane.b32.xlu2 %v945_v53, %s2053_s23 }
 0x2a5   : > { %1420 = vrot.lane.b32.xlu1 %v3274_v42, %s2055_s13  ;;  %916 = vrot.lane.b32.xlu0 %v912_v61, %s2053_s23 }
 0x2a6   : > { %980 = vrot.lane.b32.xlu2 %v976_v44, %s2053_s23 }
 0x2ad   : > { %982 = vrot.lane.b32.xlu1 %v977_v55, %s2053_s23  ;;  %948 = vrot.lane.b32.xlu0 %v944_v54, %s2053_s23  ;;  %v1365_v54 = vmul.f32 %v1317_v57, %v3294_v52 }
 0x2d7   : > { %v1325_v18 = vpop.permute.xlu2 %1324 }
 0x2d8   : > { %v1330_v29 = vadd.f32 %v1325_v18, %v1318_v25 }
 0x2da   : > { %v1334_v31 = vadd.f32 %v1332_v27, %v1330_v29  ;;  %v497_v29 = vld [vmem:[%s3650_s7 + $0x8] sm:$0xff] }
 0x2e0   : > { %v1357_v32 = vpop.permute.xlu2 %1356 }
 0x2e8   : > { %v887_v38 = vpop.permute.xlu2 %886 }
 0x2e9   : > { %v891_v36 = vadd.f32 %v887_v38, %v871_v33 }
 0x2eb   : > { %v903_v43 = vadd.f32 %v901_v37, %v891_v36 }
 0x2ef   : > { %v1341_v51 = vpop.permute.xlu1 %1340 }
 0x2f0   : > { %v1346_v40 = vadd.f32 %v1341_v51, %v1334_v31  ;;  %v3327_v38 = vpop.permute.xlu2 %1422  ;;  %v870_v51 = vmul.f32 %v3292_v17, %v3172_v0 }
 0x2f2   : > { %v1350_v41 = vadd.f32 %v1348_v6, %v1346_v40 }
 0x2f4   : > { %v1362_v18 = vadd.f32 %v1357_v32, %v1350_v41 }
 0x2f7   : > { %v1343_v60 = vpop.permute.xlu1 %1342  ;;  %v1327_v63 = vpop.permute.xlu0 %1326 }
 0x2f8   : > { %v1331_v30 = vadd.f32 %v1327_v63, %v1319_v14  ;;  %v933_v14 = vmul.f32 %v3304_v15, %v3260_v12  ;;  %v900_v63 = vmul.f32 %v3298_v5, %v3174_v1  ;;  %v932_v1 = vmul.f32 %v3290_v9, %v3184_v13 }
 0x2fa   : > { %v1335_v11 = vadd.f32 %v1333_v50, %v1331_v30 }
 0x2fc   : > { %v1347_v53 = vadd.f32 %v1343_v60, %v1335_v11  ;;  %v951_v11 = vpop.permute.xlu2 %950 }
 0x2fe   : > { %v1351_v61 = vadd.f32 %v1349_v8, %v1347_v53 }
 0x2ff   : > { %v3314_v44 = vpop.permute.xlu1 %957  ;;  %v1359_v20 = vpop.permute.xlu0 %1358 }
 0x300   : > { %v1363_v55 = vadd.f32 %v1359_v20, %v1351_v61  ;;  %v1364_v34 = vmul.f32 %v3243_v56, %v3314_v44  ;;  %v965_v61 = vmul.f32 %v3294_v52, %v3188_v22 }
 0x302   : > { %v1367_v25 = vadd.f32 %v1365_v54, %v1363_v55  ;;  %v1366_v27 = vadd.f32 %v1364_v34, %v1362_v18 }
 0x307   : > { %v1373_v46 = vpop.permute.xlu1 %1372  ;;  %v1375_v31 = vpop.permute.xlu0 %1374 }
 0x308   : > { %v1378_v33 = vadd.f32 %v1373_v46, %v1366_v27  ;;  %v1379_v57 = vadd.f32 %v1375_v31, %v1367_v25 }
 0x30a   : > { %v1380_v56 = vadd.f32 %v1378_v33, %v3322_v35  ;;  %v1381_v36 = vadd.f32 %v1379_v57, %v497_v29 }
 0x30c   : > { %v1961_v32 = vmul.f32 -1.442695, %v1380_v56  ;;  %v1962_v37 = vmul.f32 -1.442695, %v1381_v36  ;;  %v964_v36 = vmul.f32 %v3314_v44, %v3186_v23 }
 0x30e   : > { %2015 = vpow2.f32 %v1961_v32 }
 0x30f   : > { %2017 = vpow2.f32 %v1962_v37  ;;  %v919_v6 = vpop.permute.xlu1 %918  ;;  %v885_v40 = vpop.permute.xlu0 %884 }
 0x310   : > { %v923_v41 = vadd.f32 %v919_v6, %v903_v43  ;;  %v890_v60 = vadd.f32 %v885_v40, %v870_v51 }
 0x312   : > { %v935_v50 = vadd.f32 %v933_v14, %v923_v41  ;;  %v902_v30 = vadd.f32 %v900_v63, %v890_v60  ;;  %v981_v60 = vpop.permute.xlu2 %980 }
 0x314   : > { %v2016_v8 = vpop.eup %2015  ;;  %v955_v53 = vadd.f32 %v951_v11, %v935_v50 }
 0x315   : > { %v2018_v0 = vpop.eup %2017  ;;  %v1388_v20 = vadd.f32 1.0, %v2016_v8 }
 0x316   : > { %v1389_v54 = vadd.f32 1.0, %v2018_v0  ;;  %v967_v55 = vadd.f32 %v965_v61, %v955_v53 }
 0x317   : > { %2019 = vrcp.f32 %v1388_v20  ;;  %v1421_v43 = vpop.permute.xlu1 %1420  ;;  %v917_v34 = vpop.permute.xlu0 %916  ;;  %v1399_v37 = vand.u32 2147483647, %v1388_v20  ;;  %v1401_v51 = vand.u32 2147483648, %v1388_v20  ;;  %vm1395_vm7 = vweird.f32 %v1388_v20 }
 0x318   : > { %2021 = vrcp.f32 %v1389_v54  ;;  %v922_v12 = vadd.f32 %v917_v34, %v902_v30  ;;  %v1416_v40 = vand.u32 2147483648, %v1389_v54  ;;  %v1414_v50 = vand.u32 2147483647, %v1389_v54 }
 0x319   : > { %v1402_v8 = vor.u32 1.1754944e-38, %v1401_v51  ;;  %vm1410_vm9 = vweird.f32 %v1389_v54  ;;  %vm1400_vm10 = vcmp.eq.f32.partialorder %v1399_v37, 8.507059e+37 }
 0x31a   : > { %v934_v25 = vadd.f32 %v932_v1, %v922_v12  ;;  %v1417_v0 = vor.u32 1.1754944e-38, %v1416_v40  ;;  %vm1415_vm12 = vcmp.eq.f32.partialorder %v1414_v50, 8.507059e+37 }
 0x31d   : > { %v2020_v18 = vpop.eup %2019 }
 0x31e   : > { %v2022_v27 = vpop.eup %2021  ;;  %v1391_v46 = vmul.f32 %v2020_v18, %v1388_v20  ;;  %vm1396_vm5 = vweird.f32 %v2020_v18 }
 0x31f   : > { %v983_v31 = vpop.permute.xlu1 %982  ;;  %v949_v33 = vpop.permute.xlu0 %948  ;;  %v1406_v57 = vmul.f32 %v2022_v27, %v1389_v54  ;;  %vm1411_vm6 = vweird.f32 %v2022_v27  ;;  %vm1397_vm8 = vmor %vm1395_vm7, %vm1396_vm5 }
 0x320   : > { %v1392_v22 = vsub.f32 1.0, %v1391_v46  ;;  %v987_v56 = vadd.f32 %v983_v31, %v967_v55  ;;  %v954_v32 = vadd.f32 %v949_v33, %v934_v25  ;;  %vm1412_vm11 = vmor %vm1410_vm9, %vm1411_vm6 }
 0x321   : > { %v1407_v6 = vsub.f32 1.0, %v1406_v57 }
 0x322   : > { %v1393_v41 = vmul.f32 %v2020_v18, %v1392_v22  ;;  %v989_v13 = vadd.f32 %v987_v56, %v497_v29  ;;  %v966_v14 = vadd.f32 %v964_v36, %v954_v32 }
 0x323   : > { %v1408_v63 = vmul.f32 %v2022_v27, %v1407_v6 }
 0x324   : > { %v1394_v30 = vadd.f32 %v2020_v18, %v1393_v41  ;;  %v986_v11 = vadd.f32 %v981_v60, %v966_v14  ;;  %v1940_v54 = vmul.f32 -1.442695, %v989_v13 }
 0x325   : > { %v1409_v53 = vadd.f32 %v2022_v27, %v1408_v63 }
 0x326   : > { %v1398_v23 = vsel %vm1397_vm8, %v2020_v18, %v1394_v30  ;;  %v988_v61 = vadd.f32 %v986_v11, %v3322_v35  ;;  %2023 = vpow2.f32 %v1940_v54 }
 0x327   : > { %v3343_v55 = vsel %vm1400_vm10, %v1402_v8, %v1398_v23  ;;  %v1413_v29 = vsel %vm1412_vm11, %v2022_v27, %v1409_v53 }
 0x328   : > { %v1426_v34 = vmul.f32 %v1421_v43, %v3343_v55  ;;  %v3346_v12 = vsel %vm1415_vm12, %v1417_v0, %v1413_v29  ;;  %v1939_v1 = vmul.f32 -1.442695, %v988_v61  ;;  %v2041_v0 = vld [vmem:[%s3645_s2] sm:$0xff]  ;;  %v2042_v29 = vld [vmem:[%s3645_s2 + $0x10] sm:$0xff] }
 0x329   : > { %v1427_v20 = vmul.f32 %v3327_v38, %v3346_v12 }
 0x32a   : > { %1430 = vrot.lane.b32.xlu1 %v1426_v34, %s2054_s12  ;;  %2025 = vpow2.f32 %v1939_v1  ;;  %v2043_v34 = vld [vmem:[%s3645_s2 + $0x8] sm:$0xff] }
 0x32b   : > { %1432 = vrot.lane.b32.xlu0 %v1427_v20, %s2054_s12  ;;  %v2044_v20 = vld [vmem:[%s3645_s2 + $0x18] sm:$0xff] }
 0x32c   : > { %v2024_v35 = vpop.eup %2023 }
 0x32d   : > { %v997_v18 = vadd.f32 1.0, %v2024_v35 }
 0x32f   : > { %2027 = vrcp.f32 %v997_v18  ;;  %v1024_v32 = vand.u32 2147483648, %v997_v18  ;;  %vm1018_vm15 = vweird.f32 %v997_v18  ;;  %v1022_v51 = vand.u32 2147483647, %v997_v18 }
 0x330   : > { %v2026_v25 = vpop.eup %2025 }
 0x331   : > { %v996_v27 = vadd.f32 1.0, %v2026_v25  ;;  %v1025_v13 = vor.u32 1.1754944e-38, %v1024_v32  ;;  %vm1023_vm7 = vcmp.eq.f32.partialorder %v1022_v51, 8.507059e+37  ;;  %v485_v32 = vld [vmem:[%s3649_s6 + $0x68] sm:$0xff]  ;;  %v483_v51 = vld [vmem:[%s3649_s6 + $0x58] sm:$0xff] }
 0x333   : > { %2029 = vrcp.f32 %v996_v27  ;;  %v1009_v6 = vand.u32 2147483648, %v996_v27  ;;  %vm1003_vm5 = vweird.f32 %v996_v27  ;;  %v1007_v40 = vand.u32 2147483647, %v996_v27 }
 0x335   : > { %v2028_v43 = vpop.eup %2027  ;;  %v1010_v60 = vor.u32 1.1754944e-38, %v1009_v6  ;;  %vm1008_vm8 = vcmp.eq.f32.partialorder %v1007_v40, 8.507059e+37  ;;  %v480_v6 = vld [vmem:[%s3649_s6 + $0x40] sm:$0xff]  ;;  %v481_v40 = vld [vmem:[%s3649_s6 + $0x48] sm:$0xff] }
 0x336   : > { %v1014_v31 = vmul.f32 %v2028_v43, %v997_v18  ;;  %vm1019_vm13 = vweird.f32 %v2028_v43  ;;  %v494_v18 = vld [vmem:[%s3649_s6 + $0xb0] sm:$0xff] }
 0x337   : > { %vm1020_vm0 = vmor %vm1018_vm15, %vm1019_vm13  ;;  %1514 = vmatpush.msra.mxu0 %v494_v18 }
 0x338   : > { %v1015_v57 = vsub.f32 1.0, %v1014_v31  ;;  %v490_v31 = vld [vmem:[%s3649_s6 + $0x90] sm:$0xff] }
 0x339   : > { %v2030_v46 = vpop.eup %2029 }
 0x33a   : > { %v999_v33 = vmul.f32 %v2030_v46, %v996_v27  ;;  %v1016_v22 = vmul.f32 %v2028_v43, %v1015_v57  ;;  %vm1004_vm14 = vweird.f32 %v2030_v46  ;;  %v495_v27 = vld [vmem:[%s3649_s6 + $0xb8] sm:$0xff]  ;;  %v488_v57 = vld [vmem:[%s3649_s6 + $0x80] sm:$0xff] }
 0x33b   : > { %vm1005_vm6 = vmor %vm1003_vm5, %vm1004_vm14  ;;  %1537 = vmatpush.msra.mxu1 %v495_v27 }
 0x33c   : > { %v1000_v38 = vsub.f32 1.0, %v999_v33  ;;  %v1017_v36 = vadd.f32 %v2028_v43, %v1016_v22  ;;  %v491_v33 = vld [vmem:[%s3649_s6 + $0x98] sm:$0xff]  ;;  %v486_v22 = vld [vmem:[%s3649_s6 + $0x70] sm:$0xff] }
 0x33e   : > { %v1001_v56 = vmul.f32 %v2030_v46, %v1000_v38  ;;  %v1021_v41 = vsel %vm1020_vm0, %v2028_v43, %v1017_v36  ;;  %v492_v43 = vld [vmem:[%s3649_s6 + $0xa0] sm:$0xff]  ;;  %v489_v38 = vld [vmem:[%s3649_s6 + $0x88] sm:$0xff] }
 0x33f   : > { %v3352_v63 = vsel %vm1023_vm7, %v1025_v13, %v1021_v41  ;;  %1515 = vmatpush.msra.mxu0 %v492_v43  ;;  %v484_v36 = vld [vmem:[%s3649_s6 + $0x60] sm:$0xff]  ;;  %v478_v41 = vld [vmem:[%s3649_s6 + $0x30] sm:$0xff]  ;;  %v479_v13 = vld [vmem:[%s3649_s6 + $0x38] sm:$0xff] }
 0x340   : > { %v1002_v37 = vadd.f32 %v2030_v46, %v1001_v56  ;;  %v1029_v30 = vmul.f32 %v3254_v16, %v3352_v63  ;;  %v487_v56 = vld [vmem:[%s3649_s6 + $0x78] sm:$0xff] }
 0x341   : > { %1516 = vmatpush.msra.mxu0 %v490_v31 }
 0x342   : > { %v1006_v14 = vsel %vm1005_vm6, %v2030_v46, %v1002_v37  ;;  %v493_v46 = vld [vmem:[%s3649_s6 + $0xa8] sm:$0xff]  ;;  %v482_v37 = vld [vmem:[%s3649_s6 + $0x50] sm:$0xff] }
 0x343   : > { %v3354_v50 = vsel %vm1008_vm8, %v1010_v60, %v1006_v14  ;;  %1538 = vmatpush.msra.mxu1 %v493_v46  ;;  %1517 = vmatpush.msra.mxu0 %v488_v57  ;;  %v476_v14 = vld [vmem:[%s3649_s6 + $0x20] sm:$0xff]  ;;  %v477_v60 = vld [vmem:[%s3649_s6 + $0x28] sm:$0xff] }
 0x344   : > { %v1028_v53 = vmul.f32 %v3274_v42, %v3354_v50 }
 0x345   : > { %1539 = vmatpush.msra.mxu1 %v491_v33  ;;  %1518 = vmatpush.msra.mxu0 %v486_v22 }
 0x347   : > { %1540 = vmatpush.msra.mxu1 %v489_v38  ;;  %1519 = vmatpush.msra.mxu0 %v484_v36 }
 0x349   : > { %1541 = vmatpush.msra.mxu1 %v487_v56  ;;  %1520 = vmatpush.msra.mxu0 %v482_v37 }
 0x34b   : > { %1542 = vmatpush.msra.mxu1 %v485_v32  ;;  %1521 = vmatpush.msra.mxu0 %v480_v6 }
 0x34d   : > { %1543 = vmatpush.msra.mxu1 %v483_v51  ;;  %1522 = vmatpush.msra.mxu0 %v478_v41 }
 0x34f   : > { %1544 = vmatpush.msra.mxu1 %v481_v40  ;;  %1523 = vmatpush.msra.mxu0 %v476_v14 }
 0x351   : > { %1545 = vmatpush.msra.mxu1 %v479_v13 }
 0x353   : > { %1546 = vmatpush.msra.mxu1 %v477_v60 }
 0x39c   : > { %v1431_v11 = vpop.permute.xlu1 %1430 }
 0x39d   : > { %v1433_v8 = vpop.permute.xlu0 %1432  ;;  %v3366_v61 = vsel %vm586_vm3, %v1028_v53, %v1431_v11  ;;  %v475_v11 = vld [vmem:[%s3649_s6 + $0x18] sm:$0xff]  ;;  %v473_v53 = vld [vmem:[%s3649_s6 + $0x8] sm:$0xff] }
 0x39e   : > { %v3361_v23 = vsel %vm586_vm3, %v1029_v30, %v1433_v8  ;;  %v474_v30 = vld [vmem:[%s3649_s6 + $0x10] sm:$0xff]  ;;  %1547 = vmatpush.msra.mxu1 %v475_v11  ;;  %v472_v8 = vld [vmem:[%s3649_s6] sm:$0xff] }
 0x39f   : > { %1452 = vmatpush.msrb.mxu2 %v3361_v23  ;;  %1475 = vmatpush.msrb.mxu3 %v3361_v23 }
 0x3a0   : > { %1524 = vmatpush.msra.mxu0 %v474_v30  ;;  %1548 = vmatpush.msra.mxu1 %v473_v53 }
 0x3a1   : > { %1453 = vmatpush.msrb.mxu2 %v3366_v61  ;;  %1476 = vmatpush.msrb.mxu3 %v3366_v61 }
 0x3a2   : > { %1963 = vmatmul.msk.f32.vlgmr.msrb.gmra.mxu2 %vm511_vm2, %v2041_v0  ;;  %1965 = vmatmul.msk.f32.vlgmr.msrb.gmra.mxu3 %vm511_vm2, %v2042_v29 }
 0x3a3   : > { %1692 = vmatpush.msra.mxu2 %v494_v18  ;;  %1715 = vmatpush.msra.mxu3 %v495_v27 }
 0x3a4   : > { %1525 = vmatpush.msra.mxu0 %v472_v8 }
 0x3a5   : > { %1693 = vmatpush.msra.mxu2 %v492_v43  ;;  %1716 = vmatpush.msra.mxu3 %v493_v46 }
 0x3a7   : > { %1694 = vmatpush.msra.mxu2 %v490_v31  ;;  %1717 = vmatpush.msra.mxu3 %v491_v33 }
 0x3a9   : > { %1695 = vmatpush.msra.mxu2 %v488_v57  ;;  %1718 = vmatpush.msra.mxu3 %v489_v38 }
 0x3aa   : > { %1964 = vmatmul.msk.f32.gmra.mxu2 %vm511_vm2, %v2043_v34  ;;  %1966 = vmatmul.msk.f32.gmra.mxu3 %vm511_vm2, %v2044_v20 }
 0x3ab   : > { %1696 = vmatpush.msra.mxu2 %v486_v22  ;;  %1719 = vmatpush.msra.mxu3 %v487_v56 }
 0x3ad   : > { %1697 = vmatpush.msra.mxu2 %v484_v36  ;;  %1720 = vmatpush.msra.mxu3 %v485_v32 }
 0x3af   : > { %1698 = vmatpush.msra.mxu2 %v482_v37  ;;  %1721 = vmatpush.msra.mxu3 %v483_v51 }
 0x3b1   : > { %1699 = vmatpush.msra.mxu2 %v480_v6  ;;  %1722 = vmatpush.msra.mxu3 %v481_v40 }
 0x3b3   : > { %1700 = vmatpush.msra.mxu2 %v478_v41  ;;  %1723 = vmatpush.msra.mxu3 %v479_v13 }
 0x3b5   : > { %1701 = vmatpush.msra.mxu2 %v476_v14  ;;  %1724 = vmatpush.msra.mxu3 %v477_v60 }
 0x3b7   : > { %1702 = vmatpush.msra.mxu2 %v474_v30  ;;  %1725 = vmatpush.msra.mxu3 %v475_v11 }
 0x3b9   : > { %1703 = vmatpush.msra.mxu2 %v472_v8  ;;  %1726 = vmatpush.msra.mxu3 %v473_v53 }
 0x425   : > { %v3386_v54 = vpop.f32.mrf.mxu2  ;;  %v1478_v1 = vpop.f32.mrf.mxu3 }
 0x426   : > { %1494 = vrot.lane.b32.xlu0 %v1478_v1, %s2053_s23  ;;  %1486 = vrot.lane.b32.xlu2 %v3386_v54, %s2054_s12 }
 0x42d   : > { %v3391_v35 = vpop.f32.mrf.mxu2  ;;  %v1481_v25 = vpop.f32.mrf.mxu3 }
 0x42e   : > { %1666 = vrot.lane.b32.xlu0 %v3366_v61, %s2055_s13  ;;  %1496 = vrot.lane.b32.xlu2 %v1481_v25, %s2053_s23 }
 0x42f   : > { %1488 = vrot.lane.b32.xlu1 %v3391_v35, %s2054_s12 }
 0x436   : > { %1674 = vrot.lane.b32.xlu0 %v1481_v25, %s2054_s12  ;;  %1668 = vrot.lane.b32.xlu2 %v3361_v23, %s2055_s13 }
 0x437   : > { %1672 = vrot.lane.b32.xlu1 %v1478_v1, %s2054_s12 }
 0x480   : > { %v1487_v0 = vpop.permute.xlu2 %1486 }
 0x481   : > { %v1500_v29 = vsel %vm586_vm3, %v3366_v61, %v1487_v0 }
 0x488   : > { %v1497_v25 = vpop.permute.xlu2 %1496 }
 0x490   : > { %v1669_v33 = vpop.permute.xlu2 %1668 }
 0x498   : > { %v1495_v34 = vpop.permute.xlu0 %1494 }
 0x499   : > { %v1502_v20 = vsel %vm508_vm1, %v1500_v29, %v1495_v34 }
 0x49a   : > { %1967 = vmatmul.msk.f32.vlgmr.msra.gmra.mxu0 %vm609_vm4, %v1502_v20  ;;  %1969 = vmatmul.msk.f32.vlgmr.msra.gmra.mxu1 %vm609_vm4, %v1502_v20 }
 0x4a0   : > { %v1667_v43 = vpop.permute.xlu0 %1666 }
 0x4a1   : > { %v1489_v1 = vpop.permute.xlu1 %1488  ;;  %v1678_v61 = vsel %vm586_vm3, %v1667_v43, %v3386_v54 }
 0x4a2   : > { %v1501_v18 = vsel %vm586_vm3, %v3361_v23, %v1489_v1  ;;  %v1679_v23 = vsel %vm586_vm3, %v1669_v33, %v3391_v35 }
 0x4a3   : > { %v1503_v27 = vsel %vm508_vm1, %v1501_v18, %v1497_v25 }
 0x4a4   : > { %1968 = vmatmul.msk.f32.gmra.mxu0 %vm609_vm4, %v1503_v27  ;;  %1970 = vmatmul.msk.f32.gmra.mxu1 %vm609_vm4, %v1503_v27 }
 0x4a8   : > { %v1675_v57 = vpop.permute.xlu0 %1674 }
 0x4a9   : > { %v1673_v46 = vpop.permute.xlu1 %1672  ;;  %v1681_v38 = vsel %vm508_vm1, %v1679_v23, %v1675_v57 }
 0x4aa   : > { %v1680_v31 = vsel %vm508_vm1, %v1678_v61, %v1673_v46 }
 0x4ab   : > { %1971 = vmatmul.msk.f32.vlgmr.msra.gmra.mxu2 %vm609_vm4, %v1680_v31  ;;  %1973 = vmatmul.msk.f32.vlgmr.msra.gmra.mxu3 %vm609_vm4, %v1680_v31 }
 0x4b3   : > { %1972 = vmatmul.msk.f32.gmra.mxu2 %vm609_vm4, %v1681_v38  ;;  %1974 = vmatmul.msk.f32.gmra.mxu3 %vm609_vm4, %v1681_v38 }
 0x517   : > { %v1527_v22 = vpop.f32.mrf.mxu0  ;;  %v1550_v35 = vpop.f32.mrf.mxu1 }
 0x518   : > { %v3495_v54 = vadd.f32 %v1527_v22, %v3176_v2  ;;  %v3507_v37 = vadd.f32 %v1550_v35, %v3178_v3 }
 0x51a   : > { %v1586_v56 = vmul.f32 %v3495_v54, %v3198_v19  ;;  %v1574_v36 = vmul.f32 %v3495_v54, %v3298_v5  ;;  %v1562_v32 = vmul.f32 %v3495_v54, %v3200_v26  ;;  %v1614_v6 = vmul.f32 %v3507_v37, %v3314_v44 }
 0x51b   : > { %v1602_v40 = vmul.f32 %v3507_v37, %v3222_v39  ;;  %v1626_v8 = vmul.f32 %v3507_v37, %v3245_v45  ;;  %v1598_v33 = vmul.f32 %v3507_v37, %v3290_v9 }
 0x51c   : > { %1590 = vrot.lane.b32.xlu2 %v1586_v56, %s2054_s12  ;;  %1578 = vrot.lane.b32.xlu0 %v1574_v36, %s2053_s23  ;;  %v498_v36 = vld [vmem:[%s3651_s8] sm:$0xff] }
 0x51d   : > { %1566 = vrot.lane.b32.xlu1 %v1562_v32, %s2055_s13 }
 0x521   : > { %v1530_v2 = vpop.f32.mrf.mxu0  ;;  %v1553_v13 = vpop.f32.mrf.mxu1 }
 0x522   : > { %v3510_v51 = vadd.f32 %v1530_v2, %v3180_v49  ;;  %v3522_v3 = vadd.f32 %v1553_v13, %v3182_v7 }
 0x524   : > { %1618 = vrot.lane.b32.xlu0 %v1614_v6, %s2053_s23  ;;  %v1563_v41 = vmul.f32 %v3510_v51, %v3192_v24  ;;  %v1587_v49 = vmul.f32 %v3510_v51, %v3214_v48  ;;  %v1575_v14 = vmul.f32 %v3510_v51, %v3288_v59  ;;  %v1603_v60 = vmul.f32 %v3522_v3, %v3235_v47 }
 0x525   : > { %1606 = vrot.lane.b32.xlu1 %v1602_v40, %s2055_s13  ;;  %v1627_v30 = vmul.f32 %v3522_v3, %v3247_v62  ;;  %v1615_v11 = vmul.f32 %v3522_v3, %v3294_v52 }
 0x526   : > { %1568 = vrot.lane.b32.xlu2 %v1563_v41, %s2055_s13 }
 0x52c   : > { %1592 = vrot.lane.b32.xlu0 %v1587_v49, %s2054_s12  ;;  %v1599_v49 = vmul.f32 %v3522_v3, %v3304_v15 }
 0x52d   : > { %1580 = vrot.lane.b32.xlu1 %v1575_v14, %s2053_s23 }
 0x52e   : > { %1608 = vrot.lane.b32.xlu2 %v1603_v60, %s2055_s13  ;;  %v1705_v7 = vpop.f32.mrf.mxu2  ;;  %v1728_v29 = vpop.f32.mrf.mxu3 }
 0x52f   : > { %v3542_v53 = vadd.f32 %v1705_v7, %v3190_v21  ;;  %v3554_v21 = vadd.f32 %v1728_v29, %v3194_v10 }
 0x531   : > { %v1752_v0 = vmul.f32 %v3542_v53, %v3298_v5  ;;  %v1740_v34 = vmul.f32 %v3542_v53, %v3200_v26  ;;  %v1764_v20 = vmul.f32 %v3542_v53, %v3198_v19  ;;  %v1792_v5 = vmul.f32 %v3554_v21, %v3314_v44 }
 0x532   : > { %v1780_v26 = vmul.f32 %v3554_v21, %v3222_v39  ;;  %v1738_v3 = vmul.f32 %v3542_v53, %v3292_v17 }
 0x534   : > { %1632 = vrot.lane.b32.xlu0 %v1627_v30, %s2054_s12 }
 0x535   : > { %1620 = vrot.lane.b32.xlu1 %v1615_v11, %s2053_s23 }
 0x536   : > { %1630 = vrot.lane.b32.xlu2 %v1626_v8, %s2054_s12  ;;  %v1708_v1 = vpop.f32.mrf.mxu2  ;;  %v1731_v18 = vpop.f32.mrf.mxu3 }
 0x537   : > { %v3558_v25 = vadd.f32 %v1708_v1, %v3196_v4  ;;  %v3570_v10 = vadd.f32 %v1731_v18, %v3206_v28 }
 0x539   : > { %v1741_v19 = vmul.f32 %v3558_v25, %v3192_v24  ;;  %v1765_v4 = vmul.f32 %v3558_v25, %v3214_v48  ;;  %v1753_v44 = vmul.f32 %v3558_v25, %v3288_v59  ;;  %v1781_v39 = vmul.f32 %v3570_v10, %v3235_v47 }
 0x53a   : > { %v1805_v24 = vmul.f32 %v3570_v10, %v3247_v62  ;;  %v1793_v28 = vmul.f32 %v3570_v10, %v3294_v52  ;;  %v1804_v48 = vmul.f32 %v3554_v21, %v3245_v45  ;;  %v1560_v52 = vmul.f32 %v3495_v54, %v3292_v17 }
 0x53b   : > { %v1561_v54 = vmul.f32 %v3510_v51, %v3286_v58  ;;  %v1739_v17 = vmul.f32 %v3558_v25, %v3286_v58 }
 0x53c   : > { %1756 = vrot.lane.b32.xlu0 %v1752_v0, %s2053_s23  ;;  %v499_v0 = vld [vmem:[%s3651_s8 + $0x8] sm:$0xff] }
 0x53d   : > { %1744 = vrot.lane.b32.xlu1 %v1740_v34, %s2055_s13 }
 0x53e   : > { %1768 = vrot.lane.b32.xlu2 %v1764_v20, %s2054_s12 }
 0x544   : > { %1796 = vrot.lane.b32.xlu0 %v1792_v5, %s2053_s23 }
 0x545   : > { %1784 = vrot.lane.b32.xlu1 %v1780_v26, %s2055_s13 }
 0x546   : > { %1746 = vrot.lane.b32.xlu2 %v1741_v19, %s2055_s13 }
 0x54c   : > { %1770 = vrot.lane.b32.xlu0 %v1765_v4, %s2054_s12 }
 0x54d   : > { %1758 = vrot.lane.b32.xlu1 %v1753_v44, %s2053_s23  ;;  %v1776_v44 = vmul.f32 %v3554_v21, %v3290_v9  ;;  %v1777_v9 = vmul.f32 %v3570_v10, %v3304_v15 }
 0x54e   : > { %1786 = vrot.lane.b32.xlu2 %v1781_v39, %s2055_s13 }
 0x554   : > { %1810 = vrot.lane.b32.xlu0 %v1805_v24, %s2054_s12 }
 0x555   : > { %1798 = vrot.lane.b32.xlu1 %v1793_v28, %s2053_s23 }
 0x556   : > { %1808 = vrot.lane.b32.xlu2 %v1804_v48, %s2054_s12 }
 0x55d   : > { %1642 = vrot.lane.b32.xlu1 %v3274_v42, %s2054_s12 }
 0x55e   : > { %1644 = vrot.lane.b32.xlu2 %v3254_v16, %s2054_s12 }
 0x576   : > { %v1591_v47 = vpop.permute.xlu2 %1590 }
 0x580   : > { %v1569_v62 = vpop.permute.xlu2 %1568 }
 0x581   : > { %v1573_v2 = vadd.f32 %v1569_v62, %v1561_v54 }
 0x588   : > { %v1609_v59 = vpop.permute.xlu2 %1608 }
 0x58e   : > { %v1579_v27 = vpop.permute.xlu0 %1578 }
 0x58f   : > { %v1567_v43 = vpop.permute.xlu1 %1566 }
 0x590   : > { %v1572_v61 = vadd.f32 %v1567_v43, %v1560_v52  ;;  %v1631_v46 = vpop.permute.xlu2 %1630 }
 0x592   : > { %v1584_v45 = vadd.f32 %v1579_v27, %v1572_v61 }
 0x594   : > { %v1596_v31 = vadd.f32 %v1591_v47, %v1584_v45 }
 0x596   : > { %v1619_v57 = vpop.permute.xlu0 %1618  ;;  %v1600_v23 = vadd.f32 %v1598_v33, %v1596_v31 }
 0x597   : > { %v1607_v38 = vpop.permute.xlu1 %1606 }
 0x598   : > { %v1612_v22 = vadd.f32 %v1607_v38, %v1600_v23  ;;  %v1769_v35 = vpop.permute.xlu2 %1768 }
 0x59a   : > { %v1624_v56 = vadd.f32 %v1619_v57, %v1612_v22 }
 0x59c   : > { %v1636_v32 = vadd.f32 %v1631_v46, %v1624_v56  ;;  %v1650_v56 = vsub.f32 1.0, %v3354_v50 }
 0x59e   : > { %v1638_v6 = vadd.f32 %v1636_v32, %v498_v36  ;;  %v1593_v40 = vpop.permute.xlu0 %1592 }
 0x59f   : > { %v1581_v41 = vpop.permute.xlu1 %1580 }
 0x5a0   : > { %2031 = vtanh.f32 %v1638_v6  ;;  %v1585_v37 = vadd.f32 %v1581_v41, %v1573_v2  ;;  %v1747_v11 = vpop.permute.xlu2 %1746 }
 0x5a2   : > { %v1597_v13 = vadd.f32 %v1593_v40, %v1585_v37 }
 0x5a4   : > { %v1601_v14 = vadd.f32 %v1599_v49, %v1597_v13 }
 0x5a6   : > { %v2032_v60 = vpop.eup %2031  ;;  %v1633_v30 = vpop.permute.xlu0 %1632  ;;  %v1613_v7 = vadd.f32 %v1609_v59, %v1601_v14  ;;  %v1751_v59 = vadd.f32 %v1747_v11, %v1739_v17  ;;  %v1821_v14 = vmul.f32 %v3254_v16, %v3346_v12 }
 0x5a7   : > { %v1621_v8 = vpop.permute.xlu1 %1620  ;;  %1654 = vrot.lane.b32.xlu0 %v2032_v60, %s2054_s12 }
 0x5a8   : > { %v1625_v51 = vadd.f32 %v1621_v8, %v1613_v7  ;;  %v1787_v26 = vpop.permute.xlu2 %1786  ;;  %v1820_v8 = vmul.f32 %v3274_v42, %v3343_v55 }
 0x5aa   : > { %v1637_v29 = vadd.f32 %v1633_v30, %v1625_v51 }
 0x5ac   : > { %v1639_v34 = vadd.f32 %v1637_v29, %v499_v0 }
 0x5ae   : > { %2033 = vtanh.f32 %v1639_v34  ;;  %v1757_v20 = vpop.permute.xlu0 %1756 }
 0x5af   : > { %v1745_v1 = vpop.permute.xlu1 %1744 }
 0x5b0   : > { %v1750_v5 = vadd.f32 %v1745_v1, %v1738_v3  ;;  %v1809_v62 = vpop.permute.xlu2 %1808 }
 0x5b2   : > { %v1762_v19 = vadd.f32 %v1757_v20, %v1750_v5 }
 0x5b4   : > { %v2034_v18 = vpop.eup %2033  ;;  %v1774_v4 = vadd.f32 %v1769_v35, %v1762_v19  ;;  %v1651_v35 = vsub.f32 1.0, %v3352_v63 }
 0x5b5   : > { %1656 = vrot.lane.b32.xlu1 %v2034_v18, %s2054_s12 }
 0x5b6   : > { %v1797_v39 = vpop.permute.xlu0 %1796  ;;  %v1778_v24 = vadd.f32 %v1776_v44, %v1774_v4 }
 0x5b7   : > { %v1785_v28 = vpop.permute.xlu1 %1784 }
 0x5b8   : > { %v1790_v48 = vadd.f32 %v1785_v28, %v1778_v24  ;;  %v1645_v32 = vpop.permute.xlu2 %1644 }
 0x5b9   : > { %v1649_v6 = vmul.f32 %v1645_v32, %v3352_v63  ;;  %v1822_v63 = vsub.f32 1.0, %v3343_v55 }
 0x5ba   : > { %v1802_v47 = vadd.f32 %v1797_v39, %v1790_v48 }
 0x5bc   : > { %v1814_v53 = vadd.f32 %v1809_v62, %v1802_v47 }
 0x5be   : > { %v1816_v27 = vadd.f32 %v1814_v53, %v498_v36  ;;  %v1771_v52 = vpop.permute.xlu0 %1770 }
 0x5bf   : > { %v1759_v43 = vpop.permute.xlu1 %1758 }
 0x5c0   : > { %2035 = vtanh.f32 %v1816_v27  ;;  %v1763_v61 = vadd.f32 %v1759_v43, %v1751_v59 }
 0x5c2   : > { %v1775_v45 = vadd.f32 %v1771_v52, %v1763_v61 }
 0x5c4   : > { %v1779_v21 = vadd.f32 %v1777_v9, %v1775_v45 }
 0x5c6   : > { %v2036_v46 = vpop.eup %2035  ;;  %v1791_v31 = vadd.f32 %v1787_v26, %v1779_v21  ;;  %v1811_v23 = vpop.permute.xlu0 %1810 }
 0x5c7   : > { %v1799_v33 = vpop.permute.xlu1 %1798  ;;  %1826 = vrot.lane.b32.xlu2 %v2036_v46, %s2054_s12 }
 0x5c8   : > { %v1803_v57 = vadd.f32 %v1799_v33, %v1791_v31 }
 0x5ca   : > { %v1815_v58 = vadd.f32 %v1811_v23, %v1803_v57 }
 0x5cc   : > { %v1817_v25 = vadd.f32 %v1815_v58, %v499_v0 }
 0x5ce   : > { %2037 = vtanh.f32 %v1817_v25 }
 0x5cf   : > { %v1643_v22 = vpop.permute.xlu1 %1642 }
 0x5d0   : > { %v1648_v15 = vmul.f32 %v1643_v22, %v3354_v50  ;;  %v1823_v50 = vsub.f32 1.0, %v3346_v12 }
 0x5d4   : > { %v2038_v38 = vpop.eup %2037 }
 0x5d5   : > { %1828 = vrot.lane.b32.xlu0 %v2038_v38, %s2054_s12 }
 0x619   : > { %v1655_v36 = vpop.permute.xlu0 %1654 }
 0x61a   : > { %v1660_v10 = vmul.f32 %v1655_v36, %v1650_v56 }
 0x61c   : > { %v1662_v54 = vadd.f32 %v1660_v10, %v1648_v15 }
 0x61e   : > { %1838 = vrot.lane.b32.xlu1 %v1662_v54, %s2055_s13 }
 0x621   : > { %v1827_v37 = vpop.permute.xlu2 %1826 }
 0x622   : > { %v1832_v11 = vmul.f32 %v1827_v37, %v1822_v63 }
 0x624   : > { %v1834_v51 = vadd.f32 %v1832_v11, %v1820_v8 }
 0x627   : > { %v1657_v2 = vpop.permute.xlu1 %1656 }
 0x628   : > { %v1661_v40 = vmul.f32 %v1657_v2, %v1651_v35 }
 0x62a   : > { %v1663_v41 = vadd.f32 %v1661_v40, %v1649_v6 }
 0x62c   : > { %1840 = vrot.lane.b32.xlu2 %v1663_v41, %s2055_s13 }
 0x647   : > { %v1829_v13 = vpop.permute.xlu0 %1828 }
 0x648   : > { %v1833_v49 = vmul.f32 %v1829_v13, %v1823_v50 }
 0x64a   : > { %v1835_v60 = vadd.f32 %v1833_v49, %v1821_v14 }
 0x686   : > { %v1841_v30 = vpop.permute.xlu2 %1840 }
 0x687   : > { %v1845_v7 = vsel %vm586_vm3, %v1841_v30, %v1835_v60 }
 0x688   : > { %1847 = vst.msk [vmem:[#allocation2 + $0x8] sm:$0xff] %vm508_vm1, %v1845_v7 }
 0x689   : > { %1849 = vst.msk [vmem:[%s2128_s18 + $0x8] sm:$0xff] %vm508_vm1, %v1845_v7 }
 0x690   : > { %v1839_v0 = vpop.permute.xlu1 %1838 }
 0x691   : > { %v1844_v29 = vsel %vm586_vm3, %v1839_v0, %v1834_v51 }
 0x692   : > { %1846 = vst.msk [vmem:[#allocation2] sm:$0xff] %vm508_vm1, %v1844_v29 }
 0x693   : > { %1848 = vst.msk [vmem:[%s2128_s18] sm:$0xff] %vm508_vm1, %v1844_v29 }
 0x694 PF: > { %s19_s30 = sadd.s32 1, %s2051_s30  }
 0x695   : > { %p16_p5 = scmp.ge.s32.totalorder %s19_s30, 10  }
 0x697   :  { %18 = sbr.rel (!%p16_p5) target bundleno = 1 (0x1), region = 90 }

</bundles_post_ra>
